<compile_context>
chip_gen: v7x
topology: tpu7x:2x2x1
jax: 0.10.0
libtpu: 0.0.40
codegen_flags: <defaults>
</compile_context>

<pallas_src>
import functools

import jax
import jax.numpy as jnp
from jax.experimental import pallas as pl
from jax.experimental.pallas import tpu as pltpu


def _largest_divisor_leq(n, cap):
    cap = max(1, min(n, cap))
    for d in range(cap, 0, -1):
        if n % d == 0:
            return d
    return 1


# ----------------------------------------------------------------------------
# Conv2d (+ optional fused ReLU) kernel
# ----------------------------------------------------------------------------
def _conv_kernel(x_ref, w_ref, b_ref, o_ref, *, K, dil, relu, Hblk):
    # x_ref: (1, Hp, Wp, Cin)        zero-padded input, one batch element (bf16)
    # w_ref: (K, K, Cin, Cout_blk)   weights (HWIO, bf16)
    # b_ref: (1, Cout_blk)           bias (f32)
    # o_ref: (1, Hblk, Wout, Cout_blk)
    _, _, Wout, Cout_blk = o_ref.shape
    Cin = x_ref.shape[-1]
    h0 = pl.program_id(2) * Hblk          # first output row of this block

    bias = b_ref[...].astype(jnp.float32)  # hoisted: one load/broadcast per step
    acc = jnp.zeros((Hblk * Wout, Cout_blk), jnp.float32)
    for ky in range(K):
        for kx in range(K):
            # (Hblk, Wout, Cin) window for this tap, all output rows of the block.
            win = x_ref[0, pl.ds(h0 + ky * dil, Hblk), pl.ds(kx * dil, Wout), :]
            acc = acc + jnp.dot(
                win.reshape(Hblk * Wout, Cin),
                w_ref[ky, kx],
                preferred_element_type=jnp.float32,
            )
    acc = acc + bias
    if relu:
        acc = jnp.maximum(acc, 0.0)
    o_ref[0] = acc.reshape(Hblk, Wout, Cout_blk).astype(o_ref.dtype)


def conv2d(x_nhwc, w, b, *, padding, dilation, relu):
    # x_nhwc: (N, H, W, Cin) bf16; w: (K, K, Cin, Cout) bf16; b: (Cout,) f32
    N, H, W, Cin = x_nhwc.shape
    K = w.shape[0]
    Cout = w.shape[-1]
    Hout = H + 2 * padding - dilation * (K - 1)
    Wout = W + 2 * padding - dilation * (K - 1)

    xp = jnp.pad(x_nhwc, ((0, 0), (padding, padding), (padding, padding), (0, 0)))
    Hp, Wp = xp.shape[1], xp.shape[2]
    b2 = b.reshape(1, Cout).astype(jnp.float32)

    # Row-block size: aim for >=256 MXU rows per dot; must divide Hout.
    Hblk = _largest_divisor_leq(Hout, max(1, pl.cdiv(256, Wout)))
    # Cout tiling for wide (FC1/FC2-style) layers.
    Cout_blk = 256 if (Cout > 256 and Cout % 256 == 0) else Cout

    grid = (N, Cout // Cout_blk, Hout // Hblk)
    kernel = functools.partial(_conv_kernel, K=K, dil=dilation, relu=relu, Hblk=Hblk)
    return pl.pallas_call(
        kernel,
        out_shape=jax.ShapeDtypeStruct((N, Hout, Wout, Cout), x_nhwc.dtype),
        grid=grid,
        in_specs=[
            # Full padded image, resident across Cout/row-block axes (refetched per n).
            pl.BlockSpec((1, Hp, Wp, Cin), lambda n, cb, hb: (n, 0, 0, 0)),
            pl.BlockSpec((K, K, Cin, Cout_blk), lambda n, cb, hb: (0, 0, 0, cb)),
            pl.BlockSpec((1, Cout_blk), lambda n, cb, hb: (0, cb)),
        ],
        out_specs=pl.BlockSpec(
            (1, Hblk, Wout, Cout_blk), lambda n, cb, hb: (n, hb, 0, cb)
        ),
        compiler_params=pltpu.CompilerParams(
            dimension_semantics=("parallel", "parallel", "parallel"),
            vmem_limit_bytes=64 * 1024 * 1024,
        ),
    )(xp, w, b2)


# ----------------------------------------------------------------------------
# MaxPool2d(kernel_size=2, stride=2)  -- arch token 'M'
# ----------------------------------------------------------------------------
def _maxpool2_kernel(x_ref, o_ref):
    # x_ref: (1, Hblk, 2, Wo, 2, C), o_ref: (1, Hblk, Wo, C)
    a = x_ref[0, :, 0, :, 0, :]
    b = x_ref[0, :, 0, :, 1, :]
    c = x_ref[0, :, 1, :, 0, :]
    d = x_ref[0, :, 1, :, 1, :]
    o_ref[0] = jnp.maximum(jnp.maximum(a, b), jnp.maximum(c, d))


def maxpool_2x2(x_nhwc):
    N, H, W, C = x_nhwc.shape
    Ho, Wo = H // 2, W // 2  # floors odd H/W, matching PyTorch's default
    # Free row-major reshape: (N, 2Ho, 2Wo, C) -> (N, Ho, 2, Wo, 2, C).
    xr = x_nhwc[:, : 2 * Ho, : 2 * Wo, :].reshape(N, Ho, 2, Wo, 2, C)
    Hblk = _largest_divisor_leq(Ho, 8)
    return pl.pallas_call(
        _maxpool2_kernel,
        out_shape=jax.ShapeDtypeStruct((N, Ho, Wo, C), x_nhwc.dtype),
        grid=(N, Ho // Hblk),
        in_specs=[
            pl.BlockSpec((1, Hblk, 2, Wo, 2, C), lambda n, hb: (n, hb, 0, 0, 0, 0))
        ],
        out_specs=pl.BlockSpec((1, Hblk, Wo, C), lambda n, hb: (n, hb, 0, 0)),
        compiler_params=pltpu.CompilerParams(
            dimension_semantics=("parallel", "parallel")
        ),
    )(xr)


# ----------------------------------------------------------------------------
# MaxPool2d(kernel_size=3, stride=1, padding=1)  -- arch token 'M5'
# ----------------------------------------------------------------------------
def _maxpool3_kernel(x_ref, o_ref, *, Hblk):
    # x_ref: (1, H+2, W+2, C) padded with -inf, o_ref: (1, Hblk, W, C)
    _, _, W, _ = o_ref.shape
    h0 = pl.program_id(1) * Hblk
    m = x_ref[0, pl.ds(h0, Hblk), pl.ds(0, W), :]
    for dy in range(3):
        for dx in range(3):
            if dy == 0 and dx == 0:
                continue
            m = jnp.maximum(m, x_ref[0, pl.ds(h0 + dy, Hblk), pl.ds(dx, W), :])
    o_ref[0] = m


def maxpool_3x3_s1_p1(x_nhwc):
    N, H, W, C = x_nhwc.shape
    if jnp.issubdtype(x_nhwc.dtype, jnp.floating):
        neg = jnp.array(-jnp.inf, x_nhwc.dtype)
    else:
        neg = jnp.array(jnp.iinfo(x_nhwc.dtype).min, x_nhwc.dtype)
    xp = jnp.pad(x_nhwc, ((0, 0), (1, 1), (1, 1), (0, 0)), constant_values=neg)
    Hblk = _largest_divisor_leq(H, 8)
    kernel = functools.partial(_maxpool3_kernel, Hblk=Hblk)
    return pl.pallas_call(
        kernel,
        out_shape=jax.ShapeDtypeStruct((N, H, W, C), x_nhwc.dtype),
        grid=(N, H // Hblk),
        in_specs=[pl.BlockSpec((1, H + 2, W + 2, C), lambda n, hb: (n, 0, 0, 0))],
        out_specs=pl.BlockSpec((1, Hblk, W, C), lambda n, hb: (n, hb, 0, 0)),
        compiler_params=pltpu.CompilerParams(
            dimension_semantics=("parallel", "parallel")
        ),
    )(xp)


# ----------------------------------------------------------------------------
# VGGNet builder / forward (mirrors the PyTorch module's __init__ / forward)
# ----------------------------------------------------------------------------
def _init_conv(key, cin, cout, k):
    # Deterministic init mimicking PyTorch's default U(-1/sqrt(fan_in), +...).
    kw, kb = jax.random.split(key)
    fan_in = cin * k * k
    bound = 1.0 / (fan_in ** 0.5)
    w = jax.random.uniform(kw, (k, k, cin, cout), jnp.float32, -bound, bound)
    b = jax.random.uniform(kb, (cout,), jnp.float32, -bound, bound)
    # bf16 weights for MXU fast path / half the HBM traffic; bias stays f32.
    return w.astype(jnp.bfloat16), b


def build_vggnet(key, net_arch, num_classes=10):
    layers = []
    in_ch = 3
    for arch in net_arch:
        if arch == 'M':
            layers.append({'kind': 'maxpool2'})
        elif arch == 'M5':
            layers.append({'kind': 'maxpool3'})
        elif arch == 'FC1':
            key, sk = jax.random.split(key)
            w, b = _init_conv(sk, 512, 1024, 3)
            layers.append({'kind': 'conv', 'w': w, 'b': b,
                           'padding': 6, 'dilation': 6, 'relu': True})
            in_ch = 1024
        elif arch == 'FC2':
            key, sk = jax.random.split(key)
            w, b = _init_conv(sk, 1024, 1024, 1)
            layers.append({'kind': 'conv', 'w': w, 'b': b,
                           'padding': 0, 'dilation': 1, 'relu': True})
            in_ch = 1024
        elif arch == 'FC':
            key, sk = jax.random.split(key)
            w, b = _init_conv(sk, 1024, num_classes, 1)
            layers.append({'kind': 'conv', 'w': w, 'b': b,
                           'padding': 0, 'dilation': 1, 'relu': False})
        else:
            key, sk = jax.random.split(key)
            w, b = _init_conv(sk, in_ch, int(arch), 3)
            layers.append({'kind': 'conv', 'w': w, 'b': b,
                           'padding': 1, 'dilation': 1, 'relu': True})
            in_ch = int(arch)
    return layers


def vggnet_forward(x_nchw, layers):
    # NCHW -> NHWC, bf16 activations between layers (f32 accumulation in-kernel).
    x = jnp.transpose(x_nchw, (0, 2, 3, 1)).astype(jnp.bfloat16)
    for layer in layers:
        if layer['kind'] == 'conv':
            x = conv2d(x, layer['w'], layer['b'], padding=layer['padding'],
                       dilation=layer['dilation'], relu=layer['relu'])
        elif layer['kind'] == 'maxpool2':
            x = maxpool_2x2(x)
        else:  # 'maxpool3'
            x = maxpool_3x3_s1_p1(x)
    x = x.astype(x_nchw.dtype)
    return jnp.transpose(x, (0, 3, 1, 2))  # back to NCHW


if __name__ == "__main__":
    key = jax.random.PRNGKey(0)
    k_params, k_input = jax.random.split(key)

    # Small VGG-style architecture exercising conv3x3+ReLU, 'M' and 'M5' pools.
    # ('FC1'/'FC2'/'FC' tokens use the same dilated/1x1 conv kernel but need
    # 512/1024 channels, so they are left out of this small demo arch.)
    net_arch = [8, 'M', 16, 'M5', 16, 'M']
    layers = build_vggnet(k_params, net_arch, num_classes=10)

    # Input matches the module's NCHW convention with in_channels=3.
    x = jax.random.normal(k_input, (2, 3, 16, 16), jnp.float32)

    out = vggnet_forward(x, layers)
    out = jax.block_until_ready(out)
    assert out.shape == (2, 16, 4, 4), out.shape
    print("KERNEL_OK")
</pallas_src>

<mosaic_0001>
module attributes {stable_mosaic.version = 11 : i64} {
  func.func @_conv_kernel(%arg0: i32, %arg1: i32, %arg2: i32, %arg3: memref<1x18x18x3xbf16, #tpu.memory_space<vmem>>, %arg4: memref<3x3x3x8xbf16, #tpu.memory_space<vmem>>, %arg5: memref<1x8xf32, #tpu.memory_space<vmem>>, %arg6: memref<1x16x16x8xbf16, #tpu.memory_space<vmem>>) attributes {dimension_semantics = [#tpu.dimension_semantics<parallel>, #tpu.dimension_semantics<parallel>, #tpu.dimension_semantics<parallel>], iteration_bounds = array<i64: 2, 1, 1>, scalar_prefetch = 0 : i64, scratch_operands = 0 : i64, tpu.core_type = #tpu.core_type<tc>, window_params = [{transform_indices = @transform_0, window_bounds = array<i64: 1, 18, 18, 3>}, {transform_indices = @transform_1, window_bounds = array<i64: 3, 3, 3, 8>}, {transform_indices = @transform_2, window_bounds = array<i64: 1, 8>}, {transform_indices = @transform_3, window_bounds = array<i64: 1, 16, 16, 8>}]} {
    %c16_i32 = arith.constant 16 : i32
    %0 = arith.muli %arg2, %c16_i32 : i32
    %c0 = arith.constant 0 : index
    %c0_0 = arith.constant 0 : index
    %1 = vector.load %arg5[%c0, %c0_0] : memref<1x8xf32, #tpu.memory_space<vmem>>, vector<1x8xf32>
    %cst = arith.constant 0.000000e+00 : f32
    %2 = vector.broadcast %cst : f32 to vector<256x8xf32>
    %c0_i32 = arith.constant 0 : i32
    %3 = arith.addi %0, %c0_i32 : i32
    %c0_1 = arith.constant 0 : index
    %4 = arith.index_cast %3 : i32 to index
    %c0_2 = arith.constant 0 : index
    %c0_3 = arith.constant 0 : index
    %5 = vector.load %arg3[%c0_1, %4, %c0_2, %c0_3] : memref<1x18x18x3xbf16, #tpu.memory_space<vmem>>, vector<1x16x16x3xbf16>
    %6 = vector.shape_cast %5 : vector<1x16x16x3xbf16> to vector<16x16x3xbf16>
    %7 = vector.shape_cast %6 : vector<16x16x3xbf16> to vector<256x3xbf16>
    %c0_4 = arith.constant 0 : index
    %c0_5 = arith.constant 0 : index
    %c0_6 = arith.constant 0 : index
    %c0_7 = arith.constant 0 : index
    %8 = vector.load %arg4[%c0_4, %c0_5, %c0_6, %c0_7] : memref<3x3x3x8xbf16, #tpu.memory_space<vmem>>, vector<1x1x3x8xbf16>
    %9 = vector.shape_cast %8 : vector<1x1x3x8xbf16> to vector<3x8xbf16>
    %cst_8 = arith.constant dense<0.000000e+00> : vector<256x8xf32>
    %10 = tpu.matmul %7, %9, %cst_8 {dimension_numbers = #tpu.dot_dimension_numbers<[1], [0], [0], [1], [0, 0, 1, 1], [], []>} : vector<256x3xbf16>, vector<3x8xbf16>, vector<256x8xf32> -> vector<256x8xf32>
    %11 = arith.addf %2, %10 : vector<256x8xf32>
    %c0_i32_9 = arith.constant 0 : i32
    %12 = arith.addi %0, %c0_i32_9 : i32
    %c0_10 = arith.constant 0 : index
    %13 = arith.index_cast %12 : i32 to index
    %c1 = arith.constant 1 : index
    %c0_11 = arith.constant 0 : index
    %14 = vector.load %arg3[%c0_10, %13, %c1, %c0_11] : memref<1x18x18x3xbf16, #tpu.memory_space<vmem>>, vector<1x16x16x3xbf16>
    %15 = vector.shape_cast %14 : vector<1x16x16x3xbf16> to vector<16x16x3xbf16>
    %16 = vector.shape_cast %15 : vector<16x16x3xbf16> to vector<256x3xbf16>
    %c0_12 = arith.constant 0 : index
    %c1_13 = arith.constant 1 : index
    %c0_14 = arith.constant 0 : index
    %c0_15 = arith.constant 0 : index
    %17 = vector.load %arg4[%c0_12, %c1_13, %c0_14, %c0_15] : memref<3x3x3x8xbf16, #tpu.memory_space<vmem>>, vector<1x1x3x8xbf16>
    %18 = vector.shape_cast %17 : vector<1x1x3x8xbf16> to vector<3x8xbf16>
    %cst_16 = arith.constant dense<0.000000e+00> : vector<256x8xf32>
    %19 = tpu.matmul %16, %18, %cst_16 {dimension_numbers = #tpu.dot_dimension_numbers<[1], [0], [0], [1], [0, 0, 1, 1], [], []>} : vector<256x3xbf16>, vector<3x8xbf16>, vector<256x8xf32> -> vector<256x8xf32>
    %20 = arith.addf %11, %19 : vector<256x8xf32>
    %c0_i32_17 = arith.constant 0 : i32
    %21 = arith.addi %0, %c0_i32_17 : i32
    %c0_18 = arith.constant 0 : index
    %22 = arith.index_cast %21 : i32 to index
    %c2 = arith.constant 2 : index
    %c0_19 = arith.constant 0 : index
    %23 = vector.load %arg3[%c0_18, %22, %c2, %c0_19] : memref<1x18x18x3xbf16, #tpu.memory_space<vmem>>, vector<1x16x16x3xbf16>
    %24 = vector.shape_cast %23 : vector<1x16x16x3xbf16> to vector<16x16x3xbf16>
    %25 = vector.shape_cast %24 : vector<16x16x3xbf16> to vector<256x3xbf16>
    %c0_20 = arith.constant 0 : index
    %c2_21 = arith.constant 2 : index
    %c0_22 = arith.constant 0 : index
    %c0_23 = arith.constant 0 : index
    %26 = vector.load %arg4[%c0_20, %c2_21, %c0_22, %c0_23] : memref<3x3x3x8xbf16, #tpu.memory_space<vmem>>, vector<1x1x3x8xbf16>
    %27 = vector.shape_cast %26 : vector<1x1x3x8xbf16> to vector<3x8xbf16>
    %cst_24 = arith.constant dense<0.000000e+00> : vector<256x8xf32>
    %28 = tpu.matmul %25, %27, %cst_24 {dimension_numbers = #tpu.dot_dimension_numbers<[1], [0], [0], [1], [0, 0, 1, 1], [], []>} : vector<256x3xbf16>, vector<3x8xbf16>, vector<256x8xf32> -> vector<256x8xf32>
    %29 = arith.addf %20, %28 : vector<256x8xf32>
    %c1_i32 = arith.constant 1 : i32
    %30 = arith.addi %0, %c1_i32 : i32
    %c0_25 = arith.constant 0 : index
    %31 = arith.index_cast %30 : i32 to index
    %c0_26 = arith.constant 0 : index
    %c0_27 = arith.constant 0 : index
    %32 = vector.load %arg3[%c0_25, %31, %c0_26, %c0_27] : memref<1x18x18x3xbf16, #tpu.memory_space<vmem>>, vector<1x16x16x3xbf16>
    %33 = vector.shape_cast %32 : vector<1x16x16x3xbf16> to vector<16x16x3xbf16>
    %34 = vector.shape_cast %33 : vector<16x16x3xbf16> to vector<256x3xbf16>
    %c1_28 = arith.constant 1 : index
    %c0_29 = arith.constant 0 : index
    %c0_30 = arith.constant 0 : index
    %c0_31 = arith.constant 0 : index
    %35 = vector.load %arg4[%c1_28, %c0_29, %c0_30, %c0_31] : memref<3x3x3x8xbf16, #tpu.memory_space<vmem>>, vector<1x1x3x8xbf16>
    %36 = vector.shape_cast %35 : vector<1x1x3x8xbf16> to vector<3x8xbf16>
    %cst_32 = arith.constant dense<0.000000e+00> : vector<256x8xf32>
    %37 = tpu.matmul %34, %36, %cst_32 {dimension_numbers = #tpu.dot_dimension_numbers<[1], [0], [0], [1], [0, 0, 1, 1], [], []>} : vector<256x3xbf16>, vector<3x8xbf16>, vector<256x8xf32> -> vector<256x8xf32>
    %38 = arith.addf %29, %37 : vector<256x8xf32>
    %c1_i32_33 = arith.constant 1 : i32
    %39 = arith.addi %0, %c1_i32_33 : i32
    %c0_34 = arith.constant 0 : index
    %40 = arith.index_cast %39 : i32 to index
    %c1_35 = arith.constant 1 : index
    %c0_36 = arith.constant 0 : index
    %41 = vector.load %arg3[%c0_34, %40, %c1_35, %c0_36] : memref<1x18x18x3xbf16, #tpu.memory_space<vmem>>, vector<1x16x16x3xbf16>
    %42 = vector.shape_cast %41 : vector<1x16x16x3xbf16> to vector<16x16x3xbf16>
    %43 = vector.shape_cast %42 : vector<16x16x3xbf16> to vector<256x3xbf16>
    %c1_37 = arith.constant 1 : index
    %c1_38 = arith.constant 1 : index
    %c0_39 = arith.constant 0 : index
    %c0_40 = arith.constant 0 : index
    %44 = vector.load %arg4[%c1_37, %c1_38, %c0_39, %c0_40] : memref<3x3x3x8xbf16, #tpu.memory_space<vmem>>, vector<1x1x3x8xbf16>
    %45 = vector.shape_cast %44 : vector<1x1x3x8xbf16> to vector<3x8xbf16>
    %cst_41 = arith.constant dense<0.000000e+00> : vector<256x8xf32>
    %46 = tpu.matmul %43, %45, %cst_41 {dimension_numbers = #tpu.dot_dimension_numbers<[1], [0], [0], [1], [0, 0, 1, 1], [], []>} : vector<256x3xbf16>, vector<3x8xbf16>, vector<256x8xf32> -> vector<256x8xf32>
    %47 = arith.addf %38, %46 : vector<256x8xf32>
    %c1_i32_42 = arith.constant 1 : i32
    %48 = arith.addi %0, %c1_i32_42 : i32
    %c0_43 = arith.constant 0 : index
    %49 = arith.index_cast %48 : i32 to index
    %c2_44 = arith.constant 2 : index
    %c0_45 = arith.constant 0 : index
    %50 = vector.load %arg3[%c0_43, %49, %c2_44, %c0_45] : memref<1x18x18x3xbf16, #tpu.memory_space<vmem>>, vector<1x16x16x3xbf16>
    %51 = vector.shape_cast %50 : vector<1x16x16x3xbf16> to vector<16x16x3xbf16>
    %52 = vector.shape_cast %51 : vector<16x16x3xbf16> to vector<256x3xbf16>
    %c1_46 = arith.constant 1 : index
    %c2_47 = arith.constant 2 : index
    %c0_48 = arith.constant 0 : index
    %c0_49 = arith.constant 0 : index
    %53 = vector.load %arg4[%c1_46, %c2_47, %c0_48, %c0_49] : memref<3x3x3x8xbf16, #tpu.memory_space<vmem>>, vector<1x1x3x8xbf16>
    %54 = vector.shape_cast %53 : vector<1x1x3x8xbf16> to vector<3x8xbf16>
    %cst_50 = arith.constant dense<0.000000e+00> : vector<256x8xf32>
    %55 = tpu.matmul %52, %54, %cst_50 {dimension_numbers = #tpu.dot_dimension_numbers<[1], [0], [0], [1], [0, 0, 1, 1], [], []>} : vector<256x3xbf16>, vector<3x8xbf16>, vector<256x8xf32> -> vector<256x8xf32>
    %56 = arith.addf %47, %55 : vector<256x8xf32>
    %c2_i32 = arith.constant 2 : i32
    %57 = arith.addi %0, %c2_i32 : i32
    %c0_51 = arith.constant 0 : index
    %58 = arith.index_cast %57 : i32 to index
    %c0_52 = arith.constant 0 : index
    %c0_53 = arith.constant 0 : index
    %59 = vector.load %arg3[%c0_51, %58, %c0_52, %c0_53] : memref<1x18x18x3xbf16, #tpu.memory_space<vmem>>, vector<1x16x16x3xbf16>
    %60 = vector.shape_cast %59 : vector<1x16x16x3xbf16> to vector<16x16x3xbf16>
    %61 = vector.shape_cast %60 : vector<16x16x3xbf16> to vector<256x3xbf16>
    %c2_54 = arith.constant 2 : index
    %c0_55 = arith.constant 0 : index
    %c0_56 = arith.constant 0 : index
    %c0_57 = arith.constant 0 : index
    %62 = vector.load %arg4[%c2_54, %c0_55, %c0_56, %c0_57] : memref<3x3x3x8xbf16, #tpu.memory_space<vmem>>, vector<1x1x3x8xbf16>
    %63 = vector.shape_cast %62 : vector<1x1x3x8xbf16> to vector<3x8xbf16>
    %cst_58 = arith.constant dense<0.000000e+00> : vector<256x8xf32>
    %64 = tpu.matmul %61, %63, %cst_58 {dimension_numbers = #tpu.dot_dimension_numbers<[1], [0], [0], [1], [0, 0, 1, 1], [], []>} : vector<256x3xbf16>, vector<3x8xbf16>, vector<256x8xf32> -> vector<256x8xf32>
    %65 = arith.addf %56, %64 : vector<256x8xf32>
    %c2_i32_59 = arith.constant 2 : i32
    %66 = arith.addi %0, %c2_i32_59 : i32
    %c0_60 = arith.constant 0 : index
    %67 = arith.index_cast %66 : i32 to index
    %c1_61 = arith.constant 1 : index
    %c0_62 = arith.constant 0 : index
    %68 = vector.load %arg3[%c0_60, %67, %c1_61, %c0_62] : memref<1x18x18x3xbf16, #tpu.memory_space<vmem>>, vector<1x16x16x3xbf16>
    %69 = vector.shape_cast %68 : vector<1x16x16x3xbf16> to vector<16x16x3xbf16>
    %70 = vector.shape_cast %69 : vector<16x16x3xbf16> to vector<256x3xbf16>
    %c2_63 = arith.constant 2 : index
    %c1_64 = arith.constant 1 : index
    %c0_65 = arith.constant 0 : index
    %c0_66 = arith.constant 0 : index
    %71 = vector.load %arg4[%c2_63, %c1_64, %c0_65, %c0_66] : memref<3x3x3x8xbf16, #tpu.memory_space<vmem>>, vector<1x1x3x8xbf16>
    %72 = vector.shape_cast %71 : vector<1x1x3x8xbf16> to vector<3x8xbf16>
    %cst_67 = arith.constant dense<0.000000e+00> : vector<256x8xf32>
    %73 = tpu.matmul %70, %72, %cst_67 {dimension_numbers = #tpu.dot_dimension_numbers<[1], [0], [0], [1], [0, 0, 1, 1], [], []>} : vector<256x3xbf16>, vector<3x8xbf16>, vector<256x8xf32> -> vector<256x8xf32>
    %74 = arith.addf %65, %73 : vector<256x8xf32>
    %c2_i32_68 = arith.constant 2 : i32
    %75 = arith.addi %0, %c2_i32_68 : i32
    %c0_69 = arith.constant 0 : index
    %76 = arith.index_cast %75 : i32 to index
    %c2_70 = arith.constant 2 : index
    %c0_71 = arith.constant 0 : index
    %77 = vector.load %arg3[%c0_69, %76, %c2_70, %c0_71] : memref<1x18x18x3xbf16, #tpu.memory_space<vmem>>, vector<1x16x16x3xbf16>
    %78 = vector.shape_cast %77 : vector<1x16x16x3xbf16> to vector<16x16x3xbf16>
    %79 = vector.shape_cast %78 : vector<16x16x3xbf16> to vector<256x3xbf16>
    %c2_72 = arith.constant 2 : index
    %c2_73 = arith.constant 2 : index
    %c0_74 = arith.constant 0 : index
    %c0_75 = arith.constant 0 : index
    %80 = vector.load %arg4[%c2_72, %c2_73, %c0_74, %c0_75] : memref<3x3x3x8xbf16, #tpu.memory_space<vmem>>, vector<1x1x3x8xbf16>
    %81 = vector.shape_cast %80 : vector<1x1x3x8xbf16> to vector<3x8xbf16>
    %cst_76 = arith.constant dense<0.000000e+00> : vector<256x8xf32>
    %82 = tpu.matmul %79, %81, %cst_76 {dimension_numbers = #tpu.dot_dimension_numbers<[1], [0], [0], [1], [0, 0, 1, 1], [], []>} : vector<256x3xbf16>, vector<3x8xbf16>, vector<256x8xf32> -> vector<256x8xf32>
    %83 = arith.addf %74, %82 : vector<256x8xf32>
    %84 = vector.broadcast %1 : vector<1x8xf32> to vector<256x8xf32>
    %85 = arith.addf %83, %84 : vector<256x8xf32>
    %cst_77 = arith.constant 0.000000e+00 : f32
    %86 = vector.broadcast %cst_77 : f32 to vector<256x8xf32>
    %87 = arith.maximumf %85, %86 : vector<256x8xf32>
    %88 = vector.shape_cast %87 : vector<256x8xf32> to vector<16x16x8xf32>
    %89 = arith.truncf %88 : vector<16x16x8xf32> to vector<16x16x8xbf16>
    %c0_78 = arith.constant 0 : index
    %c0_79 = arith.constant 0 : index
    %c0_80 = arith.constant 0 : index
    %c0_81 = arith.constant 0 : index
    %90 = vector.load %arg6[%c0_78, %c0_79, %c0_80, %c0_81] : memref<1x16x16x8xbf16, #tpu.memory_space<vmem>>, vector<1x16x16x8xbf16>
    %91 = vector.shape_cast %90 : vector<1x16x16x8xbf16> to vector<16x16x8xbf16>
    %92 = vector.shape_cast %89 : vector<16x16x8xbf16> to vector<1x16x16x8xbf16>
    tpu.vector_store %arg6[%c0_78, %c0_79, %c0_80, %c0_81], %92 {strides = array<i32>} : memref<1x16x16x8xbf16, #tpu.memory_space<vmem>>, vector<1x16x16x8xbf16>,
    return
  }
  func.func @transform_0(%arg0: i32, %arg1: i32, %arg2: i32) -> (i32, i32, i32, i32) {
    %c0_i32 = arith.constant 0 : i32
    %c0_i32_0 = arith.constant 0 : i32
    %c0_i32_1 = arith.constant 0 : i32
    %c0_i32_2 = arith.constant 0 : i32
    return %arg0, %c0_i32, %c0_i32_0, %c0_i32_1 : i32, i32, i32, i32
  }
  func.func @transform_1(%arg0: i32, %arg1: i32, %arg2: i32) -> (i32, i32, i32, i32) {
    %c0_i32 = arith.constant 0 : i32
    %c0_i32_0 = arith.constant 0 : i32
    %c0_i32_1 = arith.constant 0 : i32
    %c0_i32_2 = arith.constant 0 : i32
    return %c0_i32, %c0_i32_0, %c0_i32_1, %arg1 : i32, i32, i32, i32
  }
  func.func @transform_2(%arg0: i32, %arg1: i32, %arg2: i32) -> (i32, i32) {
    %c0_i32 = arith.constant 0 : i32
    %c0_i32_0 = arith.constant 0 : i32
    return %c0_i32, %arg1 : i32, i32
  }
  func.func @transform_3(%arg0: i32, %arg1: i32, %arg2: i32) -> (i32, i32, i32, i32) {
    %c0_i32 = arith.constant 0 : i32
    %c0_i32_0 = arith.constant 0 : i32
    return %arg0, %arg2, %c0_i32, %arg1 : i32, i32, i32, i32
  }
}

</mosaic_0001>

<bundles_post_ra>
// kernel: tpu_custom_call.1
= control target key start
LH: loop header
LB: loop body
LE: loop exit
PB: predicated region body
PF: predicated region fallthrough
CT: control target
= control target key end

     0   :  { %8 = vsyncpa [#allocation3], 0  ;;  %s8997_s0 = inlined_call_operand.hbm [shape: bf16[2,18,18,3], index: 0, kind: input, shape index: {}]   ;;  %s8998_s1 = inlined_call_operand.hbm [shape: bf16[3,3,3,8], index: 1, kind: input, shape index: {}]   ;;  %s8999_s2 = inlined_call_operand.hbm [shape: f32[1,8], index: 2, kind: input, shape index: {}]   ;;  %s9000_s3 = inlined_call_operand.hbm [shape: bf16[2,16,16,8], index: 3, kind: output, shape index: {}]  }
   0x1   :  { %10 = vsyncpa [#allocation3 + $0x1], 0 }
   0x2   :  { %11 = vsyncpa [#allocation6], 0 }
   0x3   :  { %12 = vsyncpa [#allocation4], 0 }
   0x4   :  { %14 = vsyncpa [#allocation4 + $0x1], 0  ;;  %s6926_s12 = smov 0   ;;  %s6928_s13 = smov 0  }
   0x5   :  { %s6930_s14 = smov 0   ;;  %s6932_s15 = smov 0  }
   0x6   :  { %s6934_s16 = smov 0   ;;  %s6936_s17 = smov 0  }
   0x7 LB: > { %s5198_s18 = sadd.s32 4294967295, %s6893_s17   ;;  %s5199_s19 = sadd.s32 4294967294, %s6893_s17   ;;  %s6893_s17 = sphi %s6936_s17, %s20_s17   ;;  %s6889_s16 = sphi %s6934_s16, %s9102_s16   ;;  %s6885_s15 = sphi %s6932_s15, %s9101_s15   ;;  %s6881_s14 = sphi %s6930_s14, %s9100_s14   ;;  %s6877_s13 = sphi %s6928_s13, %s9099_s13   ;;  %s6873_s12 = sphi %s6926_s12, %s9098_s12  }
   0x8   : > { %p59_p0 = scmp.ne.s32.totalorder %s6877_s13, %s6873_s12  ;;  %p6960_p1 = scmp.eq.s32.totalorder %s5198_s18, 0 }
   0x9   : > { %p6964_p2 = scmp.eq.s32.totalorder %s5198_s18, 1  ;;  %p145_p3 = scmp.eq.s32.totalorder %s5199_s19, 1 }
   0xa   : > { %s9022_s20 = scalar_select %p6960_p1, 1, 0 }
   0xb   : > { %p6970_p4 = por %p6960_p1, %p59_p0  ;;  %p5200_p5 = scmp.ge.s32.totalorder %s6893_s17, 1 }
   0xc   : > { %p6975_p6 = por %p145_p3, %p59_p0  ;;  %p152_p7 = scmp.lt.s32.totalorder %s6893_s17, 3 }
   0xd   : > { %s9024_s22 = scalar_select %p6970_p4, 1, 0 }
   0xe   : > { %s9025_s23 = scalar_select %p6975_p6, 1, 0 }
   0xf   : > { %p6980_p8 = pnand %p5200_p5, %p152_p7  ;;  %s6895_s25 = smov [#allocation5]  }
  0x10   : > { %s166_s26 = sshll.u32 %s6895_s25, 4  ;;  %s6896_s28 = smov [#allocation7]   ;;  %s6984_s26 = int_to_ptr.vmem [resolvable:$true] %s166_s26 }
  0x11   : > { %p6540_p9 = pneg %p6980_p8  ;;  %s182_s29 = sshll.u32 %s6896_s28, 4  ;;  %s6995_s29 = int_to_ptr.vmem [resolvable:$true] %s182_s29 }
  0x12   : > { %s6721_s5 = scalar_lea.hbm %s8998_s1, 288 }
  0x13   : > { %p6991_p11 = pnand %p6540_p9, %p6960_p1  ;;  %p6722_p12 = scmp.ne.s32.totalorder %s8998_s1, %s6721_s5 }
  0x14   : > { %p6728_p5 = scmp.lt.u32.totalorder %s6721_s5, %s8998_s1 }
  0x15   : > { %p6723_p13 = pneg %p6991_p11 }
  0x17   : > { %p6724_p0 = pnand %p6723_p13, %p6722_p12 }
  0x19   : > { %p6725_p3 = pneg %p6724_p0 }
  0x1b   : > { %p6730_p7 = pnand %p6728_p5, %p6725_p3 }
  0x1d   : > { %6733 = shalt.err (!%p6730_p7)
}
  0x1e   : > { %s6734_s10 = scalar_lea.vmem %s6984_s26, 288  ;;  %p6742_p1 = scmp.lt.s32.totalorder %s6984_s26, %s6984_s26 }
  0x1f   : > { %p6735_p9 = scmp.ne.s32.totalorder %s6984_s26, %s6734_s10  ;;  %p6743_p12 = scmp.lt.s32.totalorder %s6734_s10, %s6734_s10 }
  0x21   : > { %p6737_p10 = pnand %p6735_p9, %p6723_p13  ;;  %p6744_p0 = por %p6743_p12, %p6742_p1 }
  0x23   : > { %p6738_p6 = pneg %p6737_p10 }
  0x25   : > { %p6745_p4 = pnand %p6744_p0, %p6738_p6 }
  0x27   : > { %6748 = shalt.err (!%p6745_p4)
}
  0x28   : > { %s6897_s11 = smov 32   ;;  %s6898_s18 = smov 2  }
  0x29   : > { %6543 = dma.hbm_to_vmem [thread:$0]  (!%p6991_p11), %s8998_s1, 288, %s6984_s26, [#allocation6], %s6897_s11, %s6897_s11, %s6898_s18  }
  0x2a   : > { %s6749_s4 = scalar_lea.hbm %s8999_s2, 16 }
  0x2b   : > { %p6750_p1 = scmp.ne.s32.totalorder %s8999_s2, %s6749_s4  ;;  %p6756_p10 = scmp.lt.u32.totalorder %s6749_s4, %s8999_s2 }
  0x2d   : > { %p6752_p4 = pnand %p6750_p1, %p6723_p13 }
  0x2f   : > { %p6753_p6 = pneg %p6752_p4 }
  0x31   : > { %p6758_p3 = pnand %p6756_p10, %p6753_p6 }
  0x33   : > { %6761 = shalt.err (!%p6758_p3)
}
  0x34   : > { %s6762_s26 = scalar_lea.vmem %s6995_s29, 16  ;;  %s6769_s9 = scalar_lea.vmem %s6995_s29, 32 }
  0x35   : > { %p6763_p5 = scmp.ne.s32.totalorder %s6995_s29, %s6762_s26  ;;  %p6770_p12 = scmp.lt.s32.totalorder %s6995_s29, %s6995_s29 }
  0x36   : > { %p6771_p0 = scmp.lt.s32.totalorder %s6769_s9, %s6762_s26 }
  0x37   : > { %p6765_p7 = pnand %p6763_p5, %p6723_p13 }
  0x38   : > { %p6772_p1 = por %p6771_p0, %p6770_p12 }
  0x39   : > { %p6766_p9 = pneg %p6765_p7 }
  0x3b   : > { %p6773_p4 = pnand %p6772_p1, %p6766_p9 }
  0x3d   : > { %6776 = shalt.err (!%p6773_p4)
}
  0x3e   : > { %6546 = dma.hbm_to_vmem [thread:$0]  (!%p6991_p11), %s8999_s2, 16, %s6995_s29, [#allocation6]  }
  0x3f   : > { %s39_s18 = sadd.s32 1, %s6889_s16  ;;  %s46_s19 = sadd.s32 1, %s6881_s14 }
  0x40   : > { %p41_p13 = scmp.ge.s32.totalorder %s39_s18, 2  ;;  %p53_p6 = scmp.ne.s32.totalorder %s6881_s14, %s6877_s13 }
  0x41   : > { %p54_p10 = scmp.eq.s32.totalorder %s6893_s17, 0  ;;  %p6557_p3 = scmp.lt.s32.totalorder %s6893_s17, 2 }
  0x42   : > { %s9104_s18 = smov (%p41_p13, %s39_s18), 0  ;;  %p7060_p7 = por %p6964_p2, %p53_p6 }
  0x43   : > { %p55_p5 = por %p54_p10, %p53_p6  ;;  %s43_s25 = ssub.s32 %s6889_s16, %s9104_s18 }
  0x44   : > { %s9028_s27 = scalar_select %p7060_p7, 1, 0 }
  0x45   : > { %s193_s28 = sand.u32 1, %s6881_s14   ;;  %p44_p9 = scmp.eq.s32.totalorder %s43_s25, 0 }
  0x46   : > { %s6525_s29 = smul.u32 216, %s193_s28  ;;  %p7067_p11 = pnand %p6557_p3, %p55_p5 }
  0x47   : > { %s7072_s4 = scalar_select %p44_p9, %s6881_s14, %s46_s19  }
  0x48   : > { %s6526_s5 = smul.u32 3456, %s6889_s16  ;;  %s197_s6 = scalar_lea.vmem [#allocation2], %s6525_s29 }
  0x49   : > { %s204_s7 = sshll.u32 %s197_s6, 4  ;;  %s7082_s9 = scalar_lea.sflag [#allocation3], %s193_s28  ;;  %s7080_s7 = int_to_ptr.vmem [resolvable:$true] %s204_s7 }
  0x4a   : > { %s7078_s26 = scalar_lea.hbm %s8997_s0, %s6526_s5  ;;  %p6779_p12 = pneg %p7067_p11 }
  0x4b   : > { %s6777_s10 = scalar_lea.hbm %s7078_s26, 3456  ;;  %s6782_s25 = scalar_lea.hbm %s8997_s0, 6912 }
  0x4c   : > { %p6778_p2 = scmp.ne.s32.totalorder %s7078_s26, %s6777_s10  ;;  %p6783_p4 = scmp.lt.u32.totalorder %s7078_s26, %s8997_s0 }
  0x4d   : > { %p6784_p13 = scmp.lt.u32.totalorder %s6782_s25, %s6777_s10  ;;  %p6786_p10 = scmp.lt.u32.totalorder %s6777_s10, %s7078_s26 }
  0x4e   : > { %p6780_p0 = pnand %p6779_p12, %p6778_p2 }
  0x4f   : > { %p6785_p6 = por %p6784_p13, %p6783_p4 }
  0x50   : > { %p6781_p1 = pneg %p6780_p0 }
  0x51   : > { %p6787_p3 = por %p6786_p10, %p6785_p6 }
  0x53   : > { %p6788_p5 = pnand %p6787_p3, %p6781_p1 }
  0x55   : > { %6791 = shalt.err (!%p6788_p5)
}
  0x56   : > { %s6792_s28 = scalar_lea.vmem %s7080_s7, 3456  ;;  %s6899_s6 = smov [#allocation2]  }
  0x57   : > { %p6793_p9 = scmp.ne.s32.totalorder %s7080_s7, %s6792_s28  ;;  %s6797_s21 = sshll.u32 %s6899_s6, 4  ;;  %s6798_s21 = int_to_ptr.vmem [resolvable:$false] %s6797_s21 }
  0x58   : > { %s6799_s8 = scalar_lea.vmem %s6798_s21, 6912  ;;  %p6800_p7 = scmp.lt.s32.totalorder %s7080_s7, %s6798_s21 }
  0x59   : > { %p6795_p2 = pnand %p6793_p9, %p6779_p12  ;;  %p6801_p4 = scmp.lt.s32.totalorder %s6799_s8, %s6792_s28 }
  0x5b   : > { %p6796_p0 = pneg %p6795_p2  ;;  %p6802_p13 = por %p6801_p4, %p6800_p7 }
  0x5d   : > { %p6803_p6 = pnand %p6802_p13, %p6796_p0 }
  0x5f   : > { %6806 = shalt.err (!%p6803_p6)
}
  0x60   : > { %s6900_s10 = smov 64   ;;  %s6901_s11 = smov 4  }
  0x61   : > { %6550 = dma.hbm_to_vmem [thread:$0]  (!%p7067_p11), %s7078_s26, 3456, %s7080_s7, %s7082_s9, %s6900_s10, %s6900_s10, %s6901_s11  }
  0x62   : > { %216 = sbr.rel (%p6980_p8) target bundleno = 700 (0x2bc), region = 32 }
  0x69   : > { %s7113_s19 = sand.u32 1, %s6877_s13   ;;  %p9030_p7 = scmp.ne.s32.totalorder %s9024_s22, 0 }
  0x6a   : > { %s6527_s25 = smul.u32 216, %s7113_s19  ;;  %s219_s29 = scalar_lea.sflag [#allocation3], %s7113_s19 }
  0x6c   : > { %s7117_s5 = scalar_lea.vmem [#allocation2], %s6527_s25 }
  0x6d   : > { %6860 = dma.done.wait (%p9030_p7), %s219_s29, 3456  }
  0x6e   : > { %6862 = vsyncadd (%p9030_p7), %s219_s29, 4294963840  ;;  %p9031_p11 = scmp.ne.s32.totalorder %s9022_s20, 0 }
  0x70   : > { %6864 = dma.done.wait (%p9031_p11), [#allocation6], 304  }
  0x71   : > { %6866 = vsyncadd (%p9031_p11), [#allocation6], 4294966992  ;;  %vm795_vm0 = vcmask 1040384   ;;  %vm796_vm1 = vcmask 1041408   ;;  %v6902_v0 = vmov 65535   ;;  %vm746_vm5 = vcmask 23552  }
  0x72   : > { %v797_v1 = vsel %vm795_vm0, 4294967295, %v6902_v0  ;;  %vm309_vm2 = vsmask.f32 3328  ;;  %vm310_vm3 = vsmask.f32 7440  ;;  %vm1303_vm6 = vcmask 1042432  }
  0x73   : > { %v7127_v2 = vsel %vm796_vm1, %v797_v1, 0  ;;  %v697_v3 = vld [vmem:[#allocation5 + $0x2] sm:$0x3]  ;;  %v2507_v4 = vld [vmem:[#allocation5 + $0x8] sm:$0x3]  ;;  %vm7153_vm4 = vmor %vm309_vm2, %vm310_vm3  ;;  %vm1304_vm7 = vcmask 1046532  }
  0x74   : > { %v260_v5 = vld [vmem:[%s7117_s5] sm:$0xf]  ;;  %v800_v6 = vand.u32 %v7127_v2, %v697_v3  ;;  %v7132_v7 = vand.u32 %v2507_v4, %v7127_v2  ;;  %v261_v8 = vld [vmem:[%s7117_s5 + $0x4] sm:$0xf]  ;;  %v293_v9 = vld [vmem:[%s7117_s5 + $0x8] sm:$0x1] }
  0x75   : > { %v313_v10 = vshrl.u32 %v260_v5, 16  ;;  %v316_v11 = vshll.u32 %v260_v5, 16  ;;  %v322_v12 = vshll.u32 %v261_v8, 16  ;;  %v326_v13 = vshrl.u32 %v261_v8, 16  ;;  %v292_v15 = vld [vmem:[#allocation5] sm:$0x3]  ;;  %vm7367_vm8 = vmor %vm1303_vm6, %vm1304_vm7 }
  0x76   : > { %9032 = vst [vmem:[#allocation12_spill] sm:$0xff] %v7132_v7  ;;  %v332_v14 = vshll.u32 %v293_v9, 16  ;;  %5961 = vmatprep.subr.bf16.mxu1 %v800_v6  ;;  %6097 = vmatprep.subr.bf16.mxu0 %v7132_v7  ;;  %v7138_v18 = vand.u32 %v7127_v2, %v292_v15  ;;  %v5385_v19 = vld [vmem:[%s7117_s5 + $0xc] sm:$0xf]  ;;  %v7142_v20 = vld [vmem:[%s7117_s5 + $0x10] sm:$0xf] }
  0x77   : > { %v315_v16 = vrot.slane %v313_v10, 4  ;;  %v318_v17 = vrot.slane %v316_v11, 5  ;;  %5962 = vmatpush3.bf16.msra.mxu1 %v800_v6  ;;  %6098 = vmatpush3.bf16.msra.mxu0 %v7132_v7  ;;  %v324_v21 = vrot.slane %v322_v12, 5  ;;  %v328_v22 = vrot.slane %v326_v13, 4  ;;  %v7146_v23 = vld [vmem:[%s7117_s5 + $0x14] sm:$0x1] }
  0x78   : > { %v2123_v24 = vshrl.u32 %v5385_v19, 16  ;;  %5995 = vmatprep.subr.bf16.mxu1 %v7138_v18  ;;  %v2126_v26 = vshll.u32 %v5385_v19, 16  ;;  %v2132_v27 = vshll.u32 %v7142_v20, 16  ;;  %v2136_v28 = vshrl.u32 %v7142_v20, 16  ;;  %v2977_v29 = vld [vmem:[#allocation5 + $0xa] sm:$0x3] }
  0x79   : > { %v319_v25 = vor.u32 %v318_v17, %v315_v16  ;;  %v329_v31 = vor.u32 %v328_v22, %v324_v21  ;;  %v334_v32 = vrot.slane %v332_v14, 5  ;;  %v2142_v34 = vshll.u32 %v7146_v23, 16  ;;  %v262_v35 = vld [vmem:[%s7117_s5 + $0xc] sm:$0xf]  ;;  %v263_v40 = vld [vmem:[%s7117_s5 + $0x10] sm:$0xf] }
  0x7a   : > { %v2125_v33 = vrot.slane %v2123_v24, 4  ;;  %v2128_v37 = vrot.slane %v2126_v26, 5  ;;  %v2134_v38 = vrot.slane %v2132_v27, 5  ;;  %v2138_v39 = vrot.slane %v2136_v28, 4  ;;  %v294_v47 = vld [vmem:[%s7117_s5 + $0x14] sm:$0x1] }
  0x7b   : > { %v320_v36 = vrot.slane %v319_v25, 4  ;;  %v330_v41 = vrot.slane %v329_v31, 4  ;;  %v2144_v42 = vrot.slane %v2142_v34, 5  ;;  %v7161_v43 = vand.u32 %v2977_v29, %v7127_v2  ;;  %v5388_v57 = vld [vmem:[%s7117_s5 + $0x18] sm:$0xf]  ;;  %s5208_s20 = sshll.u32 %s7113_s19, 7 }
  0x7c   : > { %v2129_v45 = vor.u32 %v2128_v37, %v2125_v33  ;;  %v2139_v46 = vor.u32 %v2138_v39, %v2134_v38  ;;  %v337_v48 = vshrl.u32 %v262_v35, 16  ;;  %v340_v50 = vshll.u32 %v262_v35, 16  ;;  %v7171_v62 = vld [vmem:[%s7117_s5 + $0x1c] sm:$0xf]  ;;  %v7181_v4 = vld [vmem:[%s7117_s5 + $0x20] sm:$0x1] }
  0x7d   : > { %v325_v44 = vsel %vm7153_vm4, %v320_v36, %v324_v21  ;;  %v335_v49 = vsel %vm7153_vm4, %v330_v41, %v334_v32  ;;  %6131 = vmatprep.subr.bf16.mxu0 %v7161_v43  ;;  %v346_v51 = vshll.u32 %v263_v40, 16  ;;  %v350_v52 = vshrl.u32 %v263_v40, 16  ;;  %v264_v19 = vld [vmem:[%s7117_s5 + $0x18] sm:$0xf]  ;;  %v265_v26 = vld [vmem:[%s7117_s5 + $0x1c] sm:$0xf] }
  0x7e   : > { %v5209_v53 = vcombine.low %v325_v44, %v335_v49  ;;  %v2130_v54 = vrot.slane %v2129_v45, 4  ;;  %v2140_v55 = vrot.slane %v2139_v46, 4  ;;  %v339_v56 = vrot.slane %v337_v48, 4  ;;  %v295_v32 = vld [vmem:[%s7117_s5 + $0x20] sm:$0x1]  ;;  %s8841_s22 = scalar_lea.vmem [#allocation8], %s5208_s20 }
  0x7f   : > { %v342_v58 = vrot.slane %v340_v50, 5  ;;  %v348_v59 = vrot.slane %v346_v51, 5  ;;  %v352_v60 = vrot.slane %v350_v52, 4  ;;  %v356_v61 = vshll.u32 %v294_v47, 16  ;;  %v5391_v33 = vld [vmem:[%s7117_s5 + $0x24] sm:$0xf] }
  0x80   : > { %5963 = vmatprep.mubr.msk.bf16.mxu1 %vm746_vm5, %v5209_v53  ;;  %v2135_v63 = vsel %vm7153_vm4, %v2130_v54, %v2134_v38  ;;  %v2145_v0 = vsel %vm7153_vm4, %v2140_v55, %v2144_v42  ;;  %v2866_v1 = vrot.slane %v7142_v20, 5  ;;  %v2869_v3 = vrot.slane %v7146_v23, 5  ;;  %v7202_v42 = vld [vmem:[%s7117_s5 + $0x28] sm:$0xf]  ;;  %v7206_v47 = vld [vmem:[%s7117_s5 + $0x2c] sm:$0x1] }
  0x81   : > { %v5433_v5 = vcombine.low %v2135_v63, %v2145_v0  ;;  %v343_v6 = vor.u32 %v342_v58, %v339_v56  ;;  %v353_v8 = vor.u32 %v352_v60, %v348_v59  ;;  %v358_v9 = vrot.slane %v356_v61, 5  ;;  %v266_v53 = vld [vmem:[%s7117_s5 + $0x24] sm:$0xf]  ;;  %s5807_s24 = sshll.u32 %s6885_s15, 11  ;;  %s5077_s30 = sshll.u32 %s8841_s22, 4  ;;  %s8942_s30 = int_to_ptr.vmem [resolvable:$true] %s5077_s30 }
  0x82   : > { %v2147_v10 = vshrl.u32 %v5388_v57, 16  ;;  %v2150_v11 = vshll.u32 %v5388_v57, 16  ;;  %v2156_v12 = vshll.u32 %v7171_v62, 16  ;;  %v2160_v13 = vshrl.u32 %v7171_v62, 16  ;;  %s8940_s9 = scalar_lea.hbm %s9000_s3, %s5807_s24  ;;  %s5060_s15 = scalar_lea.sflag [#allocation4], %s7113_s19 }
  0x83   : > { %6099 = vmatprep.mubr.msk.bf16.mxu0 %vm746_vm5, %v5433_v5  ;;  %v344_v14 = vrot.slane %v343_v6, 4  ;;  %v354_v15 = vrot.slane %v353_v8, 4  ;;  %v2166_v16 = vshll.u32 %v7181_v4, 16  ;;  %v2873_v17 = vrot.slane %v7171_v62, 5  ;;  %v267_v5 = vld [vmem:[%s7117_s5 + $0x28] sm:$0xf] }
  0x84   : > { %v2149_v21 = vrot.slane %v2147_v10, 4  ;;  %v2152_v22 = vrot.slane %v2150_v11, 5  ;;  %v2158_v24 = vrot.slane %v2156_v12, 5  ;;  %v2162_v25 = vrot.slane %v2160_v13, 4  ;;  %v296_v11 = vld [vmem:[%s7117_s5 + $0x2c] sm:$0x1] }
  0x85   : > { %v349_v27 = vsel %vm7153_vm4, %v344_v14, %v348_v59  ;;  %v359_v28 = vsel %vm7153_vm4, %v354_v15, %v358_v9  ;;  %v2168_v29 = vrot.slane %v2166_v16, 5  ;;  %v7196_v31 = vrot.slane %v2873_v17, 4  ;;  %s6807_s28 = scalar_lea.vmem %s8942_s30, 2048  ;;  %p9095_p12 = scmp.ne.s32.totalorder %s9028_s27, 0 }
  0x86   : > { %v5210_v34 = vcombine.low %v349_v27, %v359_v28  ;;  %v2153_v35 = vor.u32 %v2152_v22, %v2149_v21  ;;  %v2163_v36 = vor.u32 %v2162_v25, %v2158_v24  ;;  %v2876_v37 = vrot.slane %v7181_v4, 5  ;;  %p6808_p8 = scmp.ne.s32.totalorder %s8942_s30, %s6807_s28  ;;  %s6903_s6 = smov [#allocation8]  }
  0x87   : > { %v361_v38 = vshrl.u32 %v264_v19, 16  ;;  %v364_v39 = vshll.u32 %v264_v19, 16  ;;  %v370_v40 = vshll.u32 %v265_v26, 16  ;;  %v374_v41 = vshrl.u32 %v265_v26, 16  ;;  %v5394_v19 = vld [vmem:[%s7117_s5 + $0x30] sm:$0xf] }
  0x88   : > { %5964 = vmatmul.mubr.msk.bf16.vlgmr.msra.gmra.mrb[0].mxu1 %vm746_vm5, %v5210_v34  ;;  %v2154_v44 = vrot.slane %v2153_v35, 4  ;;  %v2164_v45 = vrot.slane %v2163_v36, 4  ;;  %v380_v46 = vshll.u32 %v295_v32, 16  ;;  %v2171_v48 = vshrl.u32 %v5391_v33, 16  ;;  %v7227_v34 = vld [vmem:[%s7117_s5 + $0x34] sm:$0xf]  ;;  %p6809_p1 = pnand %p6808_p8, %p9095_p12 }
  0x89   : > { %5996 = vmatpush3.bf16.msra.mxu1 %v7138_v18  ;;  %v363_v49 = vrot.slane %v361_v38, 4  ;;  %v366_v50 = vrot.slane %v364_v39, 5  ;;  %v372_v51 = vrot.slane %v370_v40, 5  ;;  %v376_v52 = vrot.slane %v374_v41, 4  ;;  %v7231_v40 = vld [vmem:[%s7117_s5 + $0x38] sm:$0x1] }
  0x8a   : > { %v2159_v54 = vsel %vm7153_vm4, %v2154_v44, %v2158_v24  ;;  %v2169_v55 = vsel %vm7153_vm4, %v2164_v45, %v2168_v29  ;;  %v382_v56 = vrot.slane %v380_v46, 5  ;;  %v2173_v57 = vrot.slane %v2171_v48, 4  ;;  %p6810_p10 = pneg %p6809_p1  ;;  %s6811_s21 = sshll.u32 %s6903_s6, 4  ;;  %s6812_s21 = int_to_ptr.vmem [resolvable:$false] %s6811_s21 }
  0x8b   : > { %v5434_v58 = vcombine.low %v2159_v54, %v2169_v55  ;;  %v367_v59 = vor.u32 %v366_v50, %v363_v49  ;;  %v377_v60 = vor.u32 %v376_v52, %v372_v51  ;;  %v2174_v61 = vshll.u32 %v5391_v33, 16  ;;  %v268_v49 = vld [vmem:[%s7117_s5 + $0x30] sm:$0xf]  ;;  %v269_v54 = vld [vmem:[%s7117_s5 + $0x34] sm:$0xf]  ;;  %s6813_s8 = scalar_lea.vmem %s6812_s21, 4096  ;;  %p6814_p3 = scmp.lt.s32.totalorder %s8942_s30, %s6812_s21 }
  0x8c   : > { %v2180_v18 = vshll.u32 %v7202_v42, 16  ;;  %v2184_v63 = vshrl.u32 %v7202_v42, 16  ;;  %v2190_v0 = vshll.u32 %v7206_v47, 16  ;;  %v385_v6 = vshrl.u32 %v266_v53, 16  ;;  %p6815_p5 = scmp.lt.s32.totalorder %s6813_s8, %s6807_s28 }
  0x8d   : > { %6100 = vmatmul.mubr.msk.bf16.vlgmr.msra.gmra.mrb[0].mxu0 %vm746_vm5, %v5434_v58  ;;  %v368_v8 = vrot.slane %v367_v59, 4  ;;  %v378_v9 = vrot.slane %v377_v60, 4  ;;  %v2176_v10 = vrot.slane %v2174_v61, 5  ;;  %v388_v12 = vshll.u32 %v266_v53, 16 }
  0x8e   : > { %6132 = vmatpush3.bf16.msra.mxu0 %v7161_v43  ;;  %v2182_v13 = vrot.slane %v2180_v18, 5  ;;  %v2186_v14 = vrot.slane %v2184_v63, 4  ;;  %v2192_v15 = vrot.slane %v2190_v0, 5  ;;  %v387_v16 = vrot.slane %v385_v6, 4  ;;  %v297_v18 = vld [vmem:[%s7117_s5 + $0x38] sm:$0x1]  ;;  %p6816_p9 = por %p6815_p5, %p6814_p3 }
  0x8f   : > { %v373_v21 = vsel %vm7153_vm4, %v368_v8, %v372_v51  ;;  %v383_v22 = vsel %vm7153_vm4, %v378_v9, %v382_v56  ;;  %v2177_v24 = vor.u32 %v2176_v10, %v2173_v57  ;;  %v390_v25 = vrot.slane %v388_v12, 5  ;;  %v5397_v9 = vld [vmem:[%s7117_s5 + $0x3c] sm:$0xf] }
  0x90   : > { %v5211_v26 = vcombine.low %v373_v21, %v383_v22  ;;  %v2187_v27 = vor.u32 %v2186_v14, %v2182_v13  ;;  %v394_v28 = vshll.u32 %v267_v5, 16  ;;  %v398_v29 = vshrl.u32 %v267_v5, 16  ;;  %v7250_v14 = vld [vmem:[%s7117_s5 + $0x40] sm:$0xf]  ;;  %p6817_p2 = pnand %p6816_p9, %p6810_p10 }
  0x91   : > { %v2178_v43 = vrot.slane %v2177_v24, 4  ;;  %v391_v32 = vor.u32 %v390_v25, %v387_v16  ;;  %v404_v33 = vshll.u32 %v296_v11, 16  ;;  %v2195_v35 = vshrl.u32 %v5394_v19, 16 }
  0x92   : > { %5967 = vmatprep.mubr.msk.bf16.mxu1 %vm746_vm5, %v5211_v26  ;;  %v2188_v36 = vrot.slane %v2187_v27, 4  ;;  %v396_v38 = vrot.slane %v394_v28, 5  ;;  %v400_v39 = vrot.slane %v398_v29, 4  ;;  %v2198_v41 = vshll.u32 %v5394_v19, 16  ;;  %v7256_v29 = vld [vmem:[%s7117_s5 + $0x44] sm:$0x1] }
  0x93   : > { %v2183_v44 = vsel %vm7153_vm4, %v2178_v43, %v2182_v13  ;;  %v392_v45 = vrot.slane %v391_v32, 4  ;;  %v406_v46 = vrot.slane %v404_v33, 5  ;;  %v2197_v48 = vrot.slane %v2195_v35, 4 }
  0x94   : > { %v2193_v50 = vsel %vm7153_vm4, %v2188_v36, %v2192_v15  ;;  %v401_v51 = vor.u32 %v400_v39, %v396_v38  ;;  %v2200_v52 = vrot.slane %v2198_v41, 5  ;;  %v2204_v53 = vshll.u32 %v7227_v34, 16  ;;  %v270_v39 = vld [vmem:[%s7117_s5 + $0x3c] sm:$0xf] }
  0x95   : > { %v5435_v55 = vcombine.low %v2183_v44, %v2193_v50  ;;  %v397_v56 = vsel %vm7153_vm4, %v392_v45, %v396_v38  ;;  %v2208_v57 = vshrl.u32 %v7227_v34, 16  ;;  %v2214_v58 = vshll.u32 %v7231_v40, 16 }
  0x96   : > { %v402_v59 = vrot.slane %v401_v51, 4  ;;  %v2201_v60 = vor.u32 %v2200_v52, %v2197_v48  ;;  %v2206_v61 = vrot.slane %v2204_v53, 5  ;;  %v409_v63 = vshrl.u32 %v268_v49, 16  ;;  %v271_v48 = vld [vmem:[%s7117_s5 + $0x40] sm:$0xf] }
  0x97   : > { %6103 = vmatprep.mubr.msk.bf16.mxu0 %vm746_vm5, %v5435_v55  ;;  %v2210_v0 = vrot.slane %v2208_v57, 4  ;;  %v2216_v5 = vrot.slane %v2214_v58, 5  ;;  %v412_v6 = vshll.u32 %v268_v49, 16  ;;  %v418_v8 = vshll.u32 %v269_v54, 16  ;;  %v298_v55 = vld [vmem:[%s7117_s5 + $0x44] sm:$0x1] }
  0x98   : > { %v407_v10 = vsel %vm7153_vm4, %v402_v59, %v406_v46  ;;  %v2202_v11 = vrot.slane %v2201_v60, 4  ;;  %v411_v12 = vrot.slane %v409_v63, 4  ;;  %v422_v13 = vshrl.u32 %v269_v54, 16 }
  0x99   : > { %v5212_v15 = vcombine.low %v397_v56, %v407_v10  ;;  %v2211_v16 = vor.u32 %v2210_v0, %v2206_v61  ;;  %v414_v19 = vrot.slane %v412_v6, 5  ;;  %v420_v21 = vrot.slane %v418_v8, 5  ;;  %v7273_v8 = vld [vmem:[%s7117_s5 + $0x4c] sm:$0xf] }
  0x9a   : > { %v2207_v22 = vsel %vm7153_vm4, %v2202_v11, %v2206_v61  ;;  %v424_v24 = vrot.slane %v422_v13, 4  ;;  %v428_v25 = vshll.u32 %v297_v18, 16  ;;  %v2219_v26 = vshrl.u32 %v5397_v9, 16  ;;  %v5400_v18 = vld [vmem:[%s7117_s5 + $0x48] sm:$0xf] }
  0x9b   : > { %5968 = vmatmul.mubr.msk.bf16.gmra.mrb[4].mxu1 %vm746_vm5, %v5212_v15  ;;  %v2212_v27 = vrot.slane %v2211_v16, 4  ;;  %v415_v28 = vor.u32 %v414_v19, %v411_v12  ;;  %v2222_v43 = vshll.u32 %v5397_v9, 16  ;;  %v2228_v32 = vshll.u32 %v7250_v14, 16  ;;  %v7279_v16 = vld [vmem:[%s7117_s5 + $0x50] sm:$0x1] }
  0x9c   : > { %v425_v33 = vor.u32 %v424_v24, %v420_v21  ;;  %v430_v35 = vrot.slane %v428_v25, 5  ;;  %v2221_v36 = vrot.slane %v2219_v26, 4  ;;  %v2232_v38 = vshrl.u32 %v7250_v14, 16 }
  0x9d   : > { %v2217_v41 = vsel %vm7153_vm4, %v2212_v27, %v2216_v5  ;;  %v416_v44 = vrot.slane %v415_v28, 4  ;;  %v2224_v45 = vrot.slane %v2222_v43, 5  ;;  %v2230_v46 = vrot.slane %v2228_v32, 5  ;;  %v7285_v27 = vld [vmem:[%s7117_s5 + $0x48] sm:$0xf] }
  0x9e   : > { %v5436_v49 = vcombine.low %v2207_v22, %v2217_v41  ;;  %v426_v50 = vrot.slane %v425_v33, 4  ;;  %v2234_v51 = vrot.slane %v2232_v38, 4  ;;  %v2238_v52 = vshll.u32 %v7256_v29, 16 }
  0x9f   : > { %v421_v53 = vsel %vm7153_vm4, %v416_v44, %v420_v21  ;;  %v2225_v54 = vor.u32 %v2224_v45, %v2221_v36  ;;  %v433_v56 = vshrl.u32 %v270_v39, 16  ;;  %v436_v57 = vshll.u32 %v270_v39, 16 }
  0xa0   : > { %6104 = vmatmul.mubr.msk.bf16.gmra.mrb[4].mxu0 %vm746_vm5, %v5436_v49  ;;  %v431_v58 = vsel %vm7153_vm4, %v426_v50, %v430_v35  ;;  %v2235_v59 = vor.u32 %v2234_v51, %v2230_v46  ;;  %v2240_v60 = vrot.slane %v2238_v52, 5  ;;  %v442_v61 = vshll.u32 %v271_v48, 16  ;;  %v7288_v35 = vld [vmem:[%s7117_s5 + $0x4c] sm:$0xf] }
  0xa1   : > { %v5213_v63 = vcombine.low %v421_v53, %v431_v58  ;;  %v2226_v0 = vrot.slane %v2225_v54, 4  ;;  %v435_v5 = vrot.slane %v433_v56, 4  ;;  %v438_v6 = vrot.slane %v436_v57, 5  ;;  %v5403_v58 = vld [vmem:[%s7117_s5 + $0x54] sm:$0xf] }
  0xa2   : > { %v2236_v9 = vrot.slane %v2235_v59, 4  ;;  %v444_v10 = vrot.slane %v442_v61, 5  ;;  %v446_v11 = vshrl.u32 %v271_v48, 16  ;;  %v452_v12 = vshll.u32 %v298_v55, 16 }
  0xa3   : > { %5971 = vmatprep.mubr.msk.bf16.mxu1 %vm746_vm5, %v5213_v63  ;;  %v2231_v13 = vsel %vm7153_vm4, %v2226_v0, %v2230_v46  ;;  %v439_v15 = vor.u32 %v438_v6, %v435_v5  ;;  %v2243_v19 = vshrl.u32 %v5400_v18, 16  ;;  %v2246_v21 = vshll.u32 %v5400_v18, 16  ;;  %v299_v46 = vld [vmem:[%s7117_s5 + $0x50] sm:$0x1]  ;;  %v7304_v63 = vld [vmem:[%s7117_s5 + $0x58] sm:$0xf] }
  0xa4   : > { %v2241_v22 = vsel %vm7153_vm4, %v2236_v9, %v2240_v60  ;;  %v448_v24 = vrot.slane %v446_v11, 4  ;;  %v454_v25 = vrot.slane %v452_v12, 5  ;;  %v2252_v26 = vshll.u32 %v7273_v8, 16 }
  0xa5   : > { %v5437_v28 = vcombine.low %v2231_v13, %v2241_v22  ;;  %v440_v43 = vrot.slane %v439_v15, 4  ;;  %v2245_v32 = vrot.slane %v2243_v19, 4  ;;  %v2248_v33 = vrot.slane %v2246_v21, 5 }
  0xa6   : > { %v449_v36 = vor.u32 %v448_v24, %v444_v10  ;;  %v2254_v38 = vrot.slane %v2252_v26, 5  ;;  %v2256_v39 = vshrl.u32 %v7273_v8, 16  ;;  %v2262_v41 = vshll.u32 %v7279_v16, 16 }
  0xa7   : > { %6107 = vmatprep.mubr.msk.bf16.mxu0 %vm746_vm5, %v5437_v28  ;;  %v445_v44 = vsel %vm7153_vm4, %v440_v43, %v444_v10  ;;  %v2249_v45 = vor.u32 %v2248_v33, %v2245_v32  ;;  %v457_v48 = vshrl.u32 %v7285_v27, 16  ;;  %v460_v49 = vshll.u32 %v7285_v27, 16  ;;  %v7309_v10 = vld [vmem:[%s7117_s5 + $0x5c] sm:$0x1]  ;;  %v7321_v33 = vld [vmem:[%s7117_s5 + $0x58] sm:$0xf] }
  0xa8   : > { %v450_v50 = vrot.slane %v449_v36, 4  ;;  %v2258_v51 = vrot.slane %v2256_v39, 4  ;;  %v2264_v52 = vrot.slane %v2262_v41, 5  ;;  %v466_v53 = vshll.u32 %v7288_v35, 16 }
  0xa9   : > { %v2250_v54 = vrot.slane %v2249_v45, 4  ;;  %v459_v55 = vrot.slane %v457_v48, 4  ;;  %v462_v56 = vrot.slane %v460_v49, 5  ;;  %v470_v57 = vshrl.u32 %v7288_v35, 16  ;;  %v300_v48 = vld [vmem:[%s7117_s5 + $0x5c] sm:$0x1] }
  0xaa   : > { %v455_v59 = vsel %vm7153_vm4, %v450_v50, %v454_v25  ;;  %v2259_v60 = vor.u32 %v2258_v51, %v2254_v38  ;;  %v468_v61 = vrot.slane %v466_v53, 5  ;;  %v476_v18 = vshll.u32 %v299_v46, 16  ;;  %v7315_v25 = vld [vmem:[%s7117_s5 + $0x54] sm:$0xf] }
  0xab   : > { %v5214_v0 = vcombine.low %v445_v44, %v455_v59  ;;  %v2255_v5 = vsel %vm7153_vm4, %v2250_v54, %v2254_v38  ;;  %v463_v6 = vor.u32 %v462_v56, %v459_v55  ;;  %v472_v9 = vrot.slane %v470_v57, 4  ;;  %v5406_v54 = vld [vmem:[%s7117_s5 + $0x60] sm:$0xf]  ;;  %v7335_v59 = vld [vmem:[%s7117_s5 + $0x64] sm:$0xf] }
  0xac   : > { %v2260_v11 = vrot.slane %v2259_v60, 4  ;;  %v478_v12 = vrot.slane %v476_v18, 5  ;;  %v2267_v13 = vshrl.u32 %v5403_v58, 16  ;;  %v2270_v15 = vshll.u32 %v5403_v58, 16 }
  0xad   : > { %5972 = vmatmul.mubr.msk.bf16.gmra.mrb[8].mxu1 %vm746_vm5, %v5214_v0  ;;  %v464_v19 = vrot.slane %v463_v6, 4  ;;  %v473_v21 = vor.u32 %v472_v9, %v468_v61  ;;  %v2276_v22 = vshll.u32 %v7304_v63, 16  ;;  %v2280_v24 = vshrl.u32 %v7304_v63, 16 }
  0xae   : > { %v2265_v26 = vsel %vm7153_vm4, %v2260_v11, %v2264_v52  ;;  %v2269_v28 = vrot.slane %v2267_v13, 4  ;;  %v2272_v43 = vrot.slane %v2270_v15, 5  ;;  %v2286_v32 = vshll.u32 %v7309_v10, 16 }
  0xaf   : > { %v5438_v36 = vcombine.low %v2255_v5, %v2265_v26  ;;  %v469_v38 = vsel %vm7153_vm4, %v464_v19, %v468_v61  ;;  %v474_v39 = vrot.slane %v473_v21, 4  ;;  %v2278_v41 = vrot.slane %v2276_v22, 5  ;;  %v7341_v19 = vld [vmem:[%s7117_s5 + $0x68] sm:$0x1]  ;;  %v7345_v22 = vld [vmem:[%s7117_s5 + $0x60] sm:$0xf] }
  0xb0   : > { %v2273_v44 = vor.u32 %v2272_v43, %v2269_v28  ;;  %v2282_v45 = vrot.slane %v2280_v24, 4  ;;  %v2288_v46 = vrot.slane %v2286_v32, 5  ;;  %v481_v49 = vshrl.u32 %v7315_v25, 16  ;;  %v7351_v32 = vld [vmem:[%s7117_s5 + $0x64] sm:$0xf] }
  0xb1   : > { %6108 = vmatmul.mubr.msk.bf16.gmra.mrb[8].mxu0 %vm746_vm5, %v5438_v36  ;;  %v479_v50 = vsel %vm7153_vm4, %v474_v39, %v478_v12  ;;  %v484_v51 = vshll.u32 %v7315_v25, 16  ;;  %v490_v52 = vshll.u32 %v7321_v33, 16  ;;  %v494_v53 = vshrl.u32 %v7321_v33, 16 }
  0xb2   : > { %v5215_v55 = vcombine.low %v469_v38, %v479_v50  ;;  %v2274_v56 = vrot.slane %v2273_v44, 4  ;;  %v2283_v57 = vor.u32 %v2282_v45, %v2278_v41  ;;  %v483_v58 = vrot.slane %v481_v49, 4 }
  0xb3   : > { %v486_v60 = vrot.slane %v484_v51, 5  ;;  %v492_v61 = vrot.slane %v490_v52, 5  ;;  %v496_v18 = vrot.slane %v494_v53, 4  ;;  %v500_v0 = vshll.u32 %v300_v48, 16  ;;  %v301_v51 = vld [vmem:[%s7117_s5 + $0x68] sm:$0x1] }
  0xb4   : > { %5975 = vmatprep.mubr.msk.bf16.mxu1 %vm746_vm5, %v5215_v55  ;;  %v2279_v5 = vsel %vm7153_vm4, %v2274_v56, %v2278_v41  ;;  %v2284_v6 = vrot.slane %v2283_v57, 4  ;;  %v2291_v9 = vshrl.u32 %v5406_v54, 16  ;;  %v2294_v11 = vshll.u32 %v5406_v54, 16  ;;  %v5465_v54 = vld [vmem:[%s7117_s5 + $0xc] sm:$0xe] }
  0xb5   : > { %v487_v12 = vor.u32 %v486_v60, %v483_v58  ;;  %v497_v13 = vor.u32 %v496_v18, %v492_v61  ;;  %v502_v15 = vrot.slane %v500_v0, 5  ;;  %v2300_v21 = vshll.u32 %v7335_v59, 16  ;;  %v3307_v60 = vld [vmem:[#allocation5 + $0xc] sm:$0x3] }
  0xb6   : > { %v2289_v24 = vsel %vm7153_vm4, %v2284_v6, %v2288_v46  ;;  %v2293_v26 = vrot.slane %v2291_v9, 4  ;;  %v2296_v28 = vrot.slane %v2294_v11, 5  ;;  %v2304_v43 = vshrl.u32 %v7335_v59, 16  ;;  %v7372_v9 = vld [vmem:[%s7117_s5 + $0x6c] sm:$0xf] }
  0xb7   : > { %v5439_v36 = vcombine.low %v2279_v5, %v2289_v24  ;;  %v488_v38 = vrot.slane %v487_v12, 4  ;;  %v498_v39 = vrot.slane %v497_v13, 4  ;;  %v2302_v41 = vrot.slane %v2300_v21, 5  ;;  %v6709_v6 = vld [vmem:[%s7117_s5 + $0x88] sm:$0xf] }
  0xb8   : > { %v2297_v44 = vor.u32 %v2296_v28, %v2293_v26  ;;  %v2306_v45 = vrot.slane %v2304_v43, 4  ;;  %v2310_v48 = vshll.u32 %v7341_v19, 16  ;;  %v505_v49 = vshrl.u32 %v7345_v22, 16  ;;  %v7383_v43 = vld [vmem:[%s7117_s5 + $0x70] sm:$0xf] }
  0xb9   : > { %6111 = vmatprep.mubr.msk.bf16.mxu0 %vm746_vm5, %v5439_v36  ;;  %v493_v46 = vsel %vm7153_vm4, %v488_v38, %v492_v61  ;;  %v503_v50 = vsel %vm7153_vm4, %v498_v39, %v502_v15  ;;  %v508_v52 = vshll.u32 %v7345_v22, 16  ;;  %v514_v53 = vshll.u32 %v7351_v32, 16 }
  0xba   : > { %v5216_v55 = vcombine.low %v493_v46, %v503_v50  ;;  %v2298_v56 = vrot.slane %v2297_v44, 4  ;;  %v2307_v57 = vor.u32 %v2306_v45, %v2302_v41  ;;  %v2312_v58 = vrot.slane %v2310_v48, 5  ;;  %v5466_v50 = vld [vmem:[%s7117_s5 + $0x18] sm:$0xe] }
  0xbb   : > { %v507_v18 = vrot.slane %v505_v49, 4  ;;  %v510_v0 = vrot.slane %v508_v52, 5  ;;  %v516_v5 = vrot.slane %v514_v53, 5  ;;  %v518_v61 = vshrl.u32 %v7351_v32, 16  ;;  %v7402_v53 = vld [vmem:[%s7117_s5 + $0x78] sm:$0xf] }
  0xbc   : > { %5976 = vmatmul.mubr.msk.bf16.gmra.mrb[12].mxu1 %vm746_vm5, %v5216_v55  ;;  %v2303_v11 = vsel %vm7153_vm4, %v2298_v56, %v2302_v41  ;;  %v2308_v12 = vrot.slane %v2307_v57, 4  ;;  %v524_v13 = vshll.u32 %v301_v51, 16  ;;  %v5481_v15 = vrot.slane %v5465_v54, 9  ;;  %v302_v41 = vld [vmem:[%s7117_s5 + $0x74] sm:$0x1] }
  0xbd   : > { %v511_v21 = vor.u32 %v510_v0, %v507_v18  ;;  %v520_v24 = vrot.slane %v518_v61, 4  ;;  %v2868_v26 = vrot.slane %v2866_v1, 4  ;;  %v7380_v28 = vand.u32 %v3307_v60, %v7127_v2  ;;  %v7409_v56 = vld [vmem:[%s7117_s5 + $0x7c] sm:$0xf]  ;;  %v303_v0 = vld [vmem:[%s7117_s5 + $0x80] sm:$0x1] }
  0xbe   : > { %v2313_v36 = vsel %vm7153_vm4, %v2308_v12, %v2312_v58  ;;  %v526_v38 = vrot.slane %v524_v13, 5  ;;  %v2867_v39 = vsel %vm7367_vm8, %v5481_v15, %v2866_v1  ;;  %v529_v44 = vshrl.u32 %v7372_v9, 16 }
  0xbf   : > { %v5440_v45 = vcombine.low %v2303_v11, %v2313_v36  ;;  %v512_v48 = vrot.slane %v511_v21, 4  ;;  %v521_v49 = vor.u32 %v520_v24, %v516_v5  ;;  %v2870_v46 = vsel %vm7367_vm8, %v2868_v26, %v2869_v3  ;;  %6165 = vmatprep.subr.bf16.mxu0 %v7380_v28  ;;  %v5467_v24 = vld [vmem:[%s7117_s5 + $0x24] sm:$0xe] }
  0xc0   : > { %v5497_v51 = vcombine.low %v2867_v39, %v2870_v46  ;;  %v531_v20 = vrot.slane %v529_v44, 4  ;;  %v532_v1 = vshll.u32 %v7372_v9, 16  ;;  %v538_v52 = vshll.u32 %v7383_v43, 16 }
  0xc1   : > { %6112 = vmatmul.mubr.msk.bf16.gmra.mrb[12].mxu0 %vm746_vm5, %v5440_v45  ;;  %v517_v23 = vsel %vm7153_vm4, %v512_v48, %v516_v5  ;;  %v522_v54 = vrot.slane %v521_v49, 4  ;;  %v542_v3 = vshrl.u32 %v7383_v43, 16  ;;  %v548_v55 = vshll.u32 %v302_v41, 16 }
  0xc2   : > { %6133 = vmatprep.mubr.msk.bf16.mxu0 %vm746_vm5, %v5497_v51  ;;  %v534_v57 = vrot.slane %v532_v1, 5  ;;  %v540_v58 = vrot.slane %v538_v52, 5  ;;  %v5482_v60 = vrot.slane %v5466_v50, 9  ;;  %v2877_v18 = vsel %vm7367_vm8, %v7196_v31, %v2876_v37  ;;  %v304_v52 = vld [vmem:[%s7117_s5 + $0x8c] sm:$0x1] }
  0xc3   : > { %v527_v5 = vsel %vm7153_vm4, %v522_v54, %v526_v38  ;;  %v544_v61 = vrot.slane %v542_v3, 4  ;;  %v550_v11 = vrot.slane %v548_v55, 5  ;;  %v553_v12 = vshrl.u32 %v7402_v53, 16  ;;  %v7429_v38 = vld [vmem:[%s7117_s5 + $0x84] sm:$0xf] }
  0xc4   : > { %v5217_v13 = vcombine.low %v517_v23, %v527_v5  ;;  %v535_v15 = vor.u32 %v534_v57, %v531_v20  ;;  %v2874_v4 = vsel %vm7367_vm8, %v5482_v60, %v2873_v17  ;;  %v556_v21 = vshll.u32 %v7402_v53, 16  ;;  %v7434_v17 = vld [vmem:[%s7117_s5 + $0x88] sm:$0xf] }
  0xc5   : > { %v545_v31 = vor.u32 %v544_v61, %v540_v58  ;;  %v5498_v37 = vcombine.low %v2874_v4, %v2877_v18  ;;  %v555_v26 = vrot.slane %v553_v12, 4  ;;  %v562_v36 = vshll.u32 %v7409_v56, 16  ;;  %v7455_v12 = vld [vmem:[%s7117_s5 + $0x90] sm:$0xf] }
  0xc6   : > { %5979 = vmatprep.mubr.msk.bf16.mxu1 %vm746_vm5, %v5217_v13  ;;  %v536_v39 = vrot.slane %v535_v15, 4  ;;  %v558_v41 = vrot.slane %v556_v21, 5  ;;  %v566_v62 = vshrl.u32 %v7409_v56, 16  ;;  %v572_v44 = vshll.u32 %v303_v0, 16 }
  0xc7   : > { %v546_v45 = vrot.slane %v545_v31, 4  ;;  %v564_v48 = vrot.slane %v562_v36, 5  ;;  %v5483_v49 = vrot.slane %v5467_v24, 9  ;;  %v2880_v46 = vrot.slane %v7202_v42, 5  ;;  %v5468_v42 = vld [vmem:[%s7117_s5 + $0x30] sm:$0xe] }
  0xc8   : > { %v541_v50 = vsel %vm7153_vm4, %v536_v39, %v540_v58  ;;  %v559_v51 = vor.u32 %v558_v41, %v555_v26  ;;  %v568_v20 = vrot.slane %v566_v62, 4  ;;  %v574_v1 = vrot.slane %v572_v44, 5  ;;  %v7466_v41 = vld [vmem:[%s7117_s5 + $0x94] sm:$0xf] }
  0xc9   : > { %v551_v23 = vsel %vm7153_vm4, %v546_v45, %v550_v11  ;;  %6134 = vmatmul.mubr.msk.bf16.vlgmr.msra.gmra.mrb[0].mxu0 %vm746_vm5, %v5498_v37  ;;  %v2881_v54 = vsel %vm7367_vm8, %v5483_v49, %v2880_v46  ;;  %v2882_v3 = vrot.slane %v2880_v46, 4  ;;  %v2883_v55 = vrot.slane %v7206_v47, 5  ;;  %v305_v49 = vld [vmem:[%s7117_s5 + $0x98] sm:$0x1] }
  0xca   : > { %v5218_v57 = vcombine.low %v541_v50, %v551_v23  ;;  %6166 = vmatpush3.bf16.msra.mxu0 %v7380_v28  ;;  %v560_v58 = vrot.slane %v559_v51, 4  ;;  %v569_v60 = vor.u32 %v568_v20, %v564_v48  ;;  %v577_v18 = vshrl.u32 %v7429_v38, 16 }
  0xcb   : > { %v2884_v0 = vsel %vm7367_vm8, %v2882_v3, %v2883_v55  ;;  %v580_v5 = vshll.u32 %v7429_v38, 16  ;;  %v586_v61 = vshll.u32 %v7434_v17, 16  ;;  %v590_v11 = vshrl.u32 %v7434_v17, 16 }
  0xcc   : > { %5980 = vmatmul.mubr.msk.bf16.gmra.mrb[16].mxu1 %vm746_vm5, %v5218_v57  ;;  %v565_v47 = vsel %vm7153_vm4, %v560_v58, %v564_v48  ;;  %v570_v28 = vrot.slane %v569_v60, 4  ;;  %v5499_v13 = vcombine.low %v2881_v54, %v2884_v0  ;;  %v579_v15 = vrot.slane %v577_v18, 4  ;;  %v7478_v54 = vld [vmem:[%s7117_s5 + $0x9c] sm:$0xf] }
  0xcd   : > { %v582_v4 = vrot.slane %v580_v5, 5  ;;  %v588_v21 = vrot.slane %v586_v61, 5  ;;  %v592_v24 = vrot.slane %v590_v11, 4  ;;  %v596_v31 = vshll.u32 %v304_v52, 16  ;;  %v7487_v5 = vld [vmem:[%s7117_s5 + $0xa0] sm:$0xf] }
  0xce   : > { %v575_v37 = vsel %vm7153_vm4, %v570_v28, %v574_v1  ;;  %6137 = vmatprep.mubr.msk.bf16.mxu0 %vm746_vm5, %v5499_v13  ;;  %v5484_v26 = vrot.slane %v5468_v42, 9  ;;  %v2887_v36 = vrot.slane %v7227_v34, 5  ;;  %v2890_v39 = vrot.slane %v7231_v40, 5  ;;  %v5469_v34 = vld [vmem:[%s7117_s5 + $0x3c] sm:$0xe] }
  0xcf   : > { %v5219_v62 = vcombine.low %v565_v47, %v575_v37  ;;  %v583_v44 = vor.u32 %v582_v4, %v579_v15  ;;  %v593_v45 = vor.u32 %v592_v24, %v588_v21  ;;  %v598_v48 = vrot.slane %v596_v31, 5  ;;  %v306_v13 = vld [vmem:[%s7117_s5 + $0xa4] sm:$0x1]  ;;  %v5470_v31 = vld [vmem:[%s7117_s5 + $0x48] sm:$0xe] }
  0xd0   : > { %v2888_v46 = vsel %vm7367_vm8, %v5484_v26, %v2887_v36  ;;  %v2889_v50 = vrot.slane %v2887_v36, 4  ;;  %v601_v51 = vshrl.u32 %v7455_v12, 16  ;;  %v604_v20 = vshll.u32 %v7455_v12, 16 }
  0xd1   : > { %5983 = vmatprep.mubr.msk.bf16.mxu1 %vm746_vm5, %v5219_v62  ;;  %v584_v40 = vrot.slane %v583_v44, 4  ;;  %v594_v1 = vrot.slane %v593_v45, 4  ;;  %v610_v52 = vshll.u32 %v7466_v41, 16  ;;  %v614_v23 = vshrl.u32 %v7466_v41, 16 }
  0xd2   : > { %v2891_v3 = vsel %vm7367_vm8, %v2889_v50, %v2890_v39  ;;  %v603_v55 = vrot.slane %v601_v51, 4  ;;  %v606_v42 = vrot.slane %v604_v20, 5  ;;  %v620_v57 = vshll.u32 %v305_v49, 16  ;;  %v7507_v51 = vld [vmem:[%s7117_s5 + $0xac] sm:$0xf] }
  0xd3   : > { %v589_v58 = vsel %vm7153_vm4, %v584_v40, %v588_v21  ;;  %v599_v60 = vsel %vm7153_vm4, %v594_v1, %v598_v48  ;;  %v5500_v18 = vcombine.low %v2888_v46, %v2891_v3  ;;  %v612_v0 = vrot.slane %v610_v52, 5 }
  0xd4   : > { %v5220_v61 = vcombine.low %v589_v58, %v599_v60  ;;  %v607_v11 = vor.u32 %v606_v42, %v603_v55  ;;  %v616_v47 = vrot.slane %v614_v23, 4  ;;  %v622_v28 = vrot.slane %v620_v57, 5  ;;  %v307_v42 = vld [vmem:[%s7117_s5 + $0xb0] sm:$0x1] }
  0xd5   : > { %6138 = vmatmul.mubr.msk.bf16.gmra.mrb[4].mxu0 %vm746_vm5, %v5500_v18  ;;  %v5485_v15 = vrot.slane %v5469_v34, 9  ;;  %v2894_v4 = vrot.slane %v7250_v14, 5  ;;  %v2897_v21 = vrot.slane %v7256_v29, 5  ;;  %v625_v24 = vshrl.u32 %v7478_v54, 16  ;;  %v7502_v29 = vld [vmem:[%s7117_s5 + $0xa8] sm:$0xf] }
  0xd6   : > { %5984 = vmatmul.mubr.msk.bf16.gmra.mrb[20].mxu1 %vm746_vm5, %v5220_v61  ;;  %v608_v37 = vrot.slane %v607_v11, 4  ;;  %v617_v26 = vor.u32 %v616_v47, %v612_v0  ;;  %v628_v36 = vshll.u32 %v7478_v54, 16  ;;  %v634_v39 = vshll.u32 %v7487_v5, 16 }
  0xd7   : > { %v2895_v62 = vsel %vm7367_vm8, %v5485_v15, %v2894_v4  ;;  %v2896_v44 = vrot.slane %v2894_v4, 4  ;;  %v627_v45 = vrot.slane %v625_v24, 4  ;;  %v638_v14 = vshrl.u32 %v7487_v5, 16 }
  0xd8   : > { %v613_v48 = vsel %vm7153_vm4, %v608_v37, %v612_v0  ;;  %v618_v49 = vrot.slane %v617_v26, 4  ;;  %v630_v46 = vrot.slane %v628_v36, 5  ;;  %v636_v50 = vrot.slane %v634_v39, 5  ;;  %v5471_v0 = vld [vmem:[%s7117_s5 + $0x54] sm:$0xe] }
  0xd9   : > { %v2898_v20 = vsel %vm7367_vm8, %v2896_v44, %v2897_v21  ;;  %v640_v34 = vrot.slane %v638_v14, 4  ;;  %v644_v40 = vshll.u32 %v306_v13, 16  ;;  %v5486_v1 = vrot.slane %v5470_v31, 9  ;;  %v7522_v13 = vld [vmem:[%s7117_s5 + $0xb4] sm:$0xf] }
  0xda   : > { %v623_v52 = vsel %vm7153_vm4, %v618_v49, %v622_v28  ;;  %v5501_v23 = vcombine.low %v2895_v62, %v2898_v20  ;;  %v631_v3 = vor.u32 %v630_v46, %v627_v45  ;;  %v2901_v55 = vrot.slane %v7273_v8, 5  ;;  %v7533_v26 = vld [vmem:[%s7117_s5 + $0xb8] sm:$0xf] }
  0xdb   : > { %v5221_v57 = vcombine.low %v613_v48, %v623_v52  ;;  %v641_v58 = vor.u32 %v640_v34, %v636_v50  ;;  %v646_v60 = vrot.slane %v644_v40, 5  ;;  %v2904_v18 = vrot.slane %v7279_v16, 5  ;;  %v308_v34 = vld [vmem:[%s7117_s5 + $0xbc] sm:$0x1] }
  0xdc   : > { %6141 = vmatprep.mubr.msk.bf16.mxu0 %vm746_vm5, %v5501_v23  ;;  %v632_v61 = vrot.slane %v631_v3, 4  ;;  %v2902_v11 = vsel %vm7367_vm8, %v5486_v1, %v2901_v55  ;;  %v2903_v47 = vrot.slane %v2901_v55, 4  ;;  %v649_v28 = vshrl.u32 %v7502_v29, 16  ;;  %v5472_v55 = vld [vmem:[%s7117_s5 + $0x60] sm:$0xe] }
  0xdd   : > { %5987 = vmatprep.mubr.msk.bf16.mxu1 %vm746_vm5, %v5221_v57  ;;  %v642_v8 = vrot.slane %v641_v58, 4  ;;  %v652_v15 = vshll.u32 %v7502_v29, 16  ;;  %v658_v16 = vshll.u32 %v7507_v51, 16  ;;  %v662_v4 = vshrl.u32 %v7507_v51, 16 }
  0xde   : > { %v637_v21 = vsel %vm7153_vm4, %v632_v61, %v636_v50  ;;  %v2905_v24 = vsel %vm7367_vm8, %v2903_v47, %v2904_v18  ;;  %v651_v31 = vrot.slane %v649_v28, 4  ;;  %v668_v37 = vshll.u32 %v307_v42, 16 }
  0xdf   : > { %v647_v36 = vsel %vm7153_vm4, %v642_v8, %v646_v60  ;;  %v5502_v39 = vcombine.low %v2902_v11, %v2905_v24  ;;  %v654_v62 = vrot.slane %v652_v15, 5  ;;  %v660_v44 = vrot.slane %v658_v16, 5  ;;  %v1419_v8 = vld [vmem:[#allocation5 + $0x4] sm:$0x3]  ;;  %v5473_v15 = vld [vmem:[%s7117_s5 + $0x6c] sm:$0xe] }
  0xe0   : > { %v5222_v45 = vcombine.low %v637_v21, %v647_v36  ;;  %v664_v14 = vrot.slane %v662_v4, 4  ;;  %v670_v48 = vrot.slane %v668_v37, 5  ;;  %v5487_v49 = vrot.slane %v5471_v0, 9  ;;  %v5411_v37 = vld [vmem:[%s7117_s5 + $0x74] sm:$0x1] }
  0xe1   : > { %6142 = vmatmul.mubr.msk.bf16.gmra.mrb[8].mxu0 %vm746_vm5, %v5502_v39  ;;  %v655_v46 = vor.u32 %v654_v62, %v651_v31  ;;  %v2908_v50 = vrot.slane %v7304_v63, 5  ;;  %v2911_v20 = vrot.slane %v7309_v10, 5  ;;  %v673_v40 = vshrl.u32 %v7522_v13, 16  ;;  %v5410_v31 = vld [vmem:[%s7117_s5 + $0x70] sm:$0xf] }
  0xe2   : > { %5988 = vmatmul.mubr.msk.bf16.gmra.mrb[24].mxu1 %vm746_vm5, %v5222_v45  ;;  %v665_v1 = vor.u32 %v664_v14, %v660_v44  ;;  %v676_v52 = vshll.u32 %v7522_v13, 16  ;;  %v682_v23 = vshll.u32 %v7533_v26, 16  ;;  %v686_v3 = vshrl.u32 %v7533_v26, 16 }
  0xe3   : > { %v656_v42 = vrot.slane %v655_v46, 4  ;;  %v2909_v63 = vsel %vm7367_vm8, %v5487_v49, %v2908_v50  ;;  %v2910_v57 = vrot.slane %v2908_v50, 4  ;;  %v675_v10 = vrot.slane %v673_v40, 4  ;;  %v6666_v40 = vld [vmem:[%s7117_s5] sm:$0xf] }
  0xe4   : > { %v666_v58 = vrot.slane %v665_v1, 4  ;;  %v678_v60 = vrot.slane %v676_v52, 5  ;;  %v684_v18 = vrot.slane %v682_v23, 5  ;;  %v688_v0 = vrot.slane %v686_v3, 4  ;;  %v7573_v1 = vld [vmem:[%s7117_s5 + $0x4] sm:$0xf] }
  0xe5   : > { %v661_v61 = vsel %vm7153_vm4, %v656_v42, %v660_v44  ;;  %v2912_v11 = vsel %vm7367_vm8, %v2910_v57, %v2911_v20  ;;  %v692_v47 = vshll.u32 %v308_v34, 16  ;;  %v5488_v28 = vrot.slane %v5472_v55, 9  ;;  %v7578_v23 = vld [vmem:[%s7117_s5 + $0x7c] sm:$0xf]  ;;  %v7581_v3 = vld [vmem:[%s7117_s5 + $0x80] sm:$0x1] }
  0xe6   : > { %v671_v16 = vsel %vm7153_vm4, %v666_v58, %v670_v48  ;;  %v5503_v4 = vcombine.low %v2909_v63, %v2912_v11  ;;  %v679_v21 = vor.u32 %v678_v60, %v675_v10  ;;  %v689_v24 = vor.u32 %v688_v0, %v684_v18  ;;  %v5474_v55 = vld [vmem:[%s7117_s5 + $0x78] sm:$0xe]  ;;  %v5416_v60 = vld [vmem:[%s7117_s5 + $0x88] sm:$0xf] }
  0xe7   : > { %v5223_v36 = vcombine.low %v661_v61, %v671_v16  ;;  %v694_v39 = vrot.slane %v692_v47, 5  ;;  %v2915_v62 = vrot.slane %v7335_v59, 5  ;;  %v2918_v44 = vrot.slane %v7341_v19, 5 }
  0xe8   : > { %6145 = vmatprep.mubr.msk.bf16.mxu0 %vm746_vm5, %v5503_v4  ;;  %v680_v45 = vrot.slane %v679_v21, 4  ;;  %v690_v14 = vrot.slane %v689_v24, 4  ;;  %v7562_v48 = vand.u32 %v1419_v8, %v7127_v2  ;;  %v5489_v49 = vrot.slane %v5473_v15, 9  ;;  %v5419_v15 = vld [vmem:[%s7117_s5 + $0x94] sm:$0xf] }
  0xe9   : > { %5991 = vmatprep.mubr.msk.bf16.mxu1 %vm746_vm5, %v5223_v36  ;;  %v2916_v46 = vsel %vm7367_vm8, %v5488_v28, %v2915_v62  ;;  %v2917_v50 = vrot.slane %v2915_v62, 4  ;;  %v2922_v59 = vrot.slane %v5410_v31, 5  ;;  %v2925_v19 = vrot.slane %v5411_v37, 5  ;;  %v5417_v28 = vld [vmem:[%s7117_s5 + $0x8c] sm:$0x1] }
  0xea   : > { %v685_v20 = vsel %vm7153_vm4, %v680_v45, %v684_v18  ;;  %v695_v34 = vsel %vm7153_vm4, %v690_v14, %v694_v39  ;;  %v5241_v52 = vcombine.low %v6666_v40, %v7573_v1  ;;  %6029 = vmatprep.subr.bf16.mxu1 %v7562_v48  ;;  %v5475_v18 = vld [vmem:[%s7117_s5 + $0x84] sm:$0xe]  ;;  %v5490_v61 = vrot.slane %v5474_v55, 9  ;;  %v5420_v31 = vld [vmem:[%s7117_s5 + $0x98] sm:$0x1] }
  0xeb   : > { %v5224_v42 = vcombine.low %v685_v20, %v695_v34  ;;  %v2919_v63 = vsel %vm7367_vm8, %v2917_v50, %v2918_v44  ;;  %v2923_v57 = vsel %vm7367_vm8, %v5489_v49, %v2922_v59  ;;  %v2924_v10 = vrot.slane %v2922_v59, 4  ;;  %v6668_v37 = vld [vmem:[%s7117_s5 + $0xc] sm:$0xf]  ;;  %v7605_v36 = vld [vmem:[%s7117_s5 + $0x10] sm:$0xf] }
  0xec   : > { %v5504_v58 = vcombine.low %v2916_v46, %v2919_v63  ;;  %v2929_v11 = vrot.slane %v7578_v23, 5  ;;  %v2932_v47 = vrot.slane %v7581_v3, 5  ;;  %v5491_v21 = vrot.slane %v5475_v18, 9  ;;  %v5476_v44 = vld [vmem:[%s7117_s5 + $0x90] sm:$0xe] }
  0xed   : > { %5992 = vmatmul.mubr.msk.bf16.gmra.mrb[28].mxu1 %vm746_vm5, %v5224_v42  ;;  %v2926_v0 = vsel %vm7367_vm8, %v2924_v10, %v2925_v19  ;;  %v2936_v24 = vrot.slane %v5416_v60, 5  ;;  %v5242_v39 = vcombine.low %v6668_v37, %v7605_v36  ;;  %v2939_v62 = vrot.slane %v5417_v28, 5  ;;  %v5422_v45 = vld [vmem:[%s7117_s5 + $0xa0] sm:$0xf]  ;;  %v5423_v59 = vld [vmem:[%s7117_s5 + $0xa4] sm:$0x1] }
  0xee   : > { %6146 = vmatmul.mubr.msk.bf16.gmra.mrb[12].mxu0 %vm746_vm5, %v5504_v58  ;;  %5997 = vmatprep.mubr.msk.bf16.mxu1 %vm746_vm5, %v5241_v52  ;;  %v5505_v8 = vcombine.low %v2923_v57, %v2926_v0  ;;  %v2930_v16 = vsel %vm7367_vm8, %v5490_v61, %v2929_v11  ;;  %v2931_v4 = vrot.slane %v2929_v11, 4  ;;  %v2943_v50 = vrot.slane %v5419_v15, 5  ;;  %v5477_v19 = vld [vmem:[%s7117_s5 + $0x9c] sm:$0xe]  ;;  %v6670_v34 = vld [vmem:[%s7117_s5 + $0x18] sm:$0xf] }
  0xef   : > { %v2937_v49 = vsel %vm7367_vm8, %v5491_v21, %v2936_v24  ;;  %v2938_v46 = vrot.slane %v2936_v24, 4  ;;  %v7618_v40 = vld [vmem:[%s7117_s5 + $0x1c] sm:$0xf]  ;;  %v5492_v42 = vrot.slane %v5476_v44, 9  ;;  %v2946_v57 = vrot.slane %v5420_v31, 5 }
  0xf0   : > { %6149 = vmatprep.mubr.msk.bf16.mxu0 %vm746_vm5, %v5505_v8  ;;  %v2933_v14 = vsel %vm7367_vm8, %v2931_v4, %v2932_v47  ;;  %v5243_v52 = vcombine.low %v6670_v34, %v7618_v40  ;;  %v2945_v63 = vrot.slane %v2943_v50, 4  ;;  %v5493_v58 = vrot.slane %v5477_v19, 9  ;;  %v5425_v0 = vld [vmem:[%s7117_s5 + $0xac] sm:$0xf]  ;;  %v5428_v61 = vld [vmem:[%s7117_s5 + $0xb8] sm:$0xf] }
  0xf1   : > { %v5506_v20 = vcombine.low %v2930_v16, %v2933_v14  ;;  %v2940_v55 = vsel %vm7367_vm8, %v2938_v46, %v2939_v62  ;;  %v2950_v60 = vrot.slane %v5422_v45, 5  ;;  %v2953_v18 = vrot.slane %v5423_v59, 5  ;;  %v5426_v8 = vld [vmem:[%s7117_s5 + $0xb0] sm:$0x1]  ;;  %v5478_v15 = vld [vmem:[%s7117_s5 + $0xa8] sm:$0xe] }
  0xf2   : > { %v5507_v10 = vcombine.low %v2937_v49, %v2940_v55  ;;  %v2944_v47 = vsel %vm7367_vm8, %v5492_v42, %v2943_v50  ;;  %v2947_v28 = vsel %vm7367_vm8, %v2945_v63, %v2946_v57  ;;  %v5429_v21 = vld [vmem:[%s7117_s5 + $0xbc] sm:$0x1]  ;;  %v2964_v24 = vrot.slane %v5428_v61, 5  ;;  %v4065_v31 = vld [vmem:[#allocation5 + $0xe] sm:$0x3] }
  0xf3   : > { %v2952_v11 = vrot.slane %v2950_v60, 4  ;;  %v2951_v16 = vsel %vm7367_vm8, %v5493_v58, %v2950_v60  ;;  %v6672_v37 = vld [vmem:[%s7117_s5 + $0x24] sm:$0xf]  ;;  %v5479_v44 = vld [vmem:[%s7117_s5 + $0xb4] sm:$0xe]  ;;  %v5508_v45 = vcombine.low %v2944_v47, %v2947_v28  ;;  %v5494_v50 = vrot.slane %v5478_v15, 9 }
  0xf4   : > { %v6674_v14 = vld [vmem:[%s7117_s5 + $0x30] sm:$0xf]  ;;  %v7649_v49 = vld [vmem:[%s7117_s5 + $0x34] sm:$0xf]  ;;  %v2960_v34 = vrot.slane %v5426_v8, 5  ;;  %v5495_v55 = vrot.slane %v5479_v44, 9  ;;  %v5249_v44 = vcombine.low %v7345_v22, %v7351_v32 }
  0xf5   : > { %5998 = vmatmul.mubr.msk.bf16.vlgmr.msra.gmra.mrb[0].mxu1 %vm746_vm5, %v5242_v39  ;;  %v2954_v4 = vsel %vm7367_vm8, %v2952_v11, %v2953_v18  ;;  %v7643_v39 = vld [vmem:[%s7117_s5 + $0x28] sm:$0xf]  ;;  %v5245_v46 = vcombine.low %v6674_v14, %v7649_v49  ;;  %v1749_v59 = vld [vmem:[#allocation5 + $0x6] sm:$0x3]  ;;  %v2966_v42 = vrot.slane %v2964_v24, 4  ;;  %v2967_v63 = vrot.slane %v5429_v21, 5 }
  0xf6   : > { %6030 = vmatpush3.bf16.msra.mxu1 %v7562_v48  ;;  %6150 = vmatmul.mubr.msk.bf16.gmra.mrb[16].mxu0 %vm746_vm5, %v5506_v20  ;;  %v2957_v48 = vrot.slane %v5425_v0, 5  ;;  %v5244_v62 = vcombine.low %v6672_v37, %v7643_v39  ;;  %v5509_v19 = vcombine.low %v2951_v16, %v2954_v4  ;;  %v5431_v57 = vld [vmem:[%s7117_s5 + $0xc4] sm:$0xf]  ;;  %v2965_v0 = vsel %vm7367_vm8, %v5495_v55, %v2964_v24  ;;  %v5432_v11 = vld [vmem:[%s7117_s5 + $0xc8] sm:$0x1] }
  0xf7   : > { %6001 = vmatprep.mubr.msk.bf16.mxu1 %vm746_vm5, %v5243_v52  ;;  %6153 = vmatprep.mubr.msk.bf16.mxu0 %vm746_vm5, %v5507_v10  ;;  %v7653_v52 = vand.u32 %v4065_v31, %v7127_v2  ;;  %v7661_v10 = vand.u32 %v1749_v59, %v7127_v2  ;;  %v2971_v18 = vrot.slane %v5431_v57, 5  ;;  %v2968_v61 = vsel %vm7367_vm8, %v2966_v42, %v2967_v63  ;;  %v5480_v47 = vld [vmem:[%s7117_s5 + $0xc0] sm:$0xe]  ;;  %v6676_v28 = vld [vmem:[%s7117_s5 + $0x3c] sm:$0xf] }
  0xf8   : > { %v2959_v20 = vrot.slane %v2957_v48, 4  ;;  %v2958_v58 = vsel %vm7367_vm8, %v5494_v50, %v2957_v48  ;;  %v7677_v8 = vld [vmem:[%s7117_s5 + $0x40] sm:$0xf]  ;;  %v5247_v16 = vcombine.low %v7285_v27, %v7288_v35  ;;  %v5511_v4 = vcombine.low %v2965_v0, %v2968_v61  ;;  %v1257_v22 = vld [vmem:[%s7117_s5 + $0x18] sm:$0xe]  ;;  %v6629_v0 = vld [vmem:[%s7117_s5 + $0x24] sm:$0xff]  }
  0xf9   : > { %6199 = vmatprep.subr.bf16.mxu0 %v7653_v52  ;;  %6063 = vmatprep.subr.bf16.mxu1 %v7661_v10  ;;  %v5246_v15 = vcombine.low %v6676_v28, %v7677_v8  ;;  %v5496_v21 = vrot.slane %v5480_v47, 9  ;;  %v2973_v24 = vrot.slane %v2971_v18, 4  ;;  %v2974_v31 = vrot.slane %v5432_v11, 5  ;;  %v1255_v50 = vld [vmem:[%s7117_s5] sm:$0xe] }
  0xfa   : > { %v2961_v60 = vsel %vm7367_vm8, %v2959_v20, %v2960_v34  ;;  %v5248_v35 = vcombine.low %v7315_v25, %v7321_v33  ;;  %v2352_v14 = vshrl.u32 %v7578_v23, 16  ;;  %v1315_v59 = vrot.slane %v7605_v36, 5  ;;  %v1256_v33 = vld [vmem:[%s7117_s5 + $0xc] sm:$0xe]  ;;  %v6678_v32 = vld [vmem:[%s7117_s5 + $0x8] sm:$0x1] }
  0xfb   : > { %v5510_v48 = vcombine.low %v2958_v58, %v2961_v60  ;;  %v2972_v37 = vsel %vm7367_vm8, %v5496_v21, %v2971_v18  ;;  %v2975_v27 = vsel %vm7367_vm8, %v2973_v24, %v2974_v31  ;;  %v1308_v25 = vrot.slane %v7573_v1, 5  ;;  %v6679_v34 = vld [vmem:[%s7117_s5 + $0x14] sm:$0x1]  ;;  %v1258_v42 = vld [vmem:[%s7117_s5 + $0x24] sm:$0xe] }
  0xfc   : > { %v7708_v20 = vrot.slane %v2352_v14, 4  ;;  %v1322_v36 = vrot.slane %v7618_v40, 5  ;;  %v1318_v55 = vrot.slane %v6679_v34, 5  ;;  %v1329_v1 = vrot.slane %v7643_v39, 5  ;;  %v4535_v18 = vld [vmem:[#allocation5 + $0x10] sm:$0x3] }
  0xfd   : > { %6002 = vmatmul.mubr.msk.bf16.gmra.mrb[4].mxu1 %vm746_vm5, %v5244_v62  ;;  %v5512_v62 = vcombine.low %v2972_v37, %v2975_v27  ;;  %v2358_v63 = vshll.u32 %v7581_v3, 16  ;;  %v5250_v57 = vcombine.low %v7372_v9, %v7383_v43  ;;  %v5273_v58 = vrot.slane %v1255_v50, 9  ;;  %v1259_v28 = vld [vmem:[%s7117_s5 + $0x30] sm:$0xe]  ;;  %v6681_v21 = vld [vmem:[%s7117_s5 + $0x2c] sm:$0x1] }
  0xfe   : > { %6154 = vmatmul.mubr.msk.bf16.gmra.mrb[20].mxu0 %vm746_vm5, %v5508_v45  ;;  %6005 = vmatprep.mubr.msk.bf16.mxu1 %vm746_vm5, %v5245_v46  ;;  %v2348_v45 = vshll.u32 %v7578_v23, 16  ;;  %v6627_v46 = vld [vmem:[%s7117_s5 + $0x18] sm:$0xff]   ;;  %v5274_v60 = vrot.slane %v1256_v33, 9  ;;  %v5251_v40 = vcombine.low %v7402_v53, %v7409_v56  ;;  %v1310_v61 = vrot.slane %v1308_v25, 4  ;;  %v6631_v3 = vld [vmem:[%s7117_s5 + $0x30] sm:$0xff]  }
  0xff   : > { %6157 = vmatprep.mubr.msk.bf16.mxu0 %vm746_vm5, %v5509_v19  ;;  %v1311_v19 = vrot.slane %v6678_v32, 5  ;;  %v1317_v11 = vrot.slane %v1315_v59, 4  ;;  %v5275_v47 = vrot.slane %v1257_v22, 9  ;;  %v5276_v43 = vrot.slane %v1258_v42, 9  ;;  %v5593_v33 = vld [vmem:[%s7117_s5 + $0x18] sm:$0xf] }
 0x100   : > { %v7706_v23 = vrot.slane %v2348_v45, 5  ;;  %v1332_v24 = vrot.slane %v6681_v21, 5  ;;  %v1336_v31 = vrot.slane %v7649_v49, 5  ;;  %v7730_v53 = vand.u32 %v4535_v18, %v7127_v2  ;;  %v1261_v45 = vld [vmem:[%s7117_s5 + $0x48] sm:$0xe] }
 0x101   : > { %v5252_v56 = vcombine.low %v7429_v38, %v7434_v17  ;;  %v5253_v37 = vcombine.low %v7455_v12, %v7466_v41  ;;  %v7739_v27 = vsel %vm7367_vm8, %v5273_v58, %v1308_v25  ;;  %v7745_v2 = vrot.slane %v2358_v63, 5  ;;  %v1262_v25 = vld [vmem:[%s7117_s5 + $0x54] sm:$0xe]  ;;  %v6635_v18 = vld [vmem:[%s7117_s5 + $0x48] sm:$0xff]   ;;  %v5599_v39 = vld [vmem:[%s7117_s5 + $0x30] sm:$0xf] }
 0x102   : > { %v7751_v38 = vsel %vm7367_vm8, %v1310_v61, %v1311_v19  ;;  %v7755_v17 = vsel %vm7367_vm8, %v1317_v11, %v1318_v55  ;;  %v7759_v12 = vsel %vm7367_vm8, %v5275_v47, %v1322_v36  ;;  %v7769_v49 = vsel %vm7367_vm8, %v5276_v43, %v1329_v1  ;;  %v5594_v55 = vld [vmem:[%s7117_s5 + $0x1c] sm:$0xf]  ;;  %v6685_v11 = vld [vmem:[%s7117_s5 + $0x44] sm:$0x1]  ;;  %v6694_v42 = vld [vmem:[%s7117_s5 + $0x88] sm:$0xf] }
 0x103   : > { %9037 = vst [vmem:[#allocation13_spill] sm:$0xff] %v7745_v2  ;;  %v5254_v22 = vcombine.low %v7478_v54, %v7487_v5  ;;  %v5255_v32 = vcombine.low %v7502_v29, %v7507_v51  ;;  %v5256_v19 = vcombine.low %v7522_v13, %v7533_v26  ;;  %v1346_v47 = vrot.slane %v6685_v11, 5  ;;  %v5595_v11 = vld [vmem:[%s7117_s5 + $0x20] sm:$0x1]  ;;  %v7924_v26 = vld [vmem:[%s7117_s5 + $0x38] sm:$0x1] }
 0x104   : > { %v3681_v21 = vshrl.u32 %v5593_v33, 16  ;;  %9040 = vst [vmem:[#allocation15_spill] sm:$0xff] %v7924_v26  ;;  %v8046_v2 = vld [vmem:[%s7117_s5 + $0x5c] sm:$0x1]  ;;  %vm5026_vm9 = vcmask 60416  }
 0x105   : > { %6006 = vmatmul.mubr.msk.bf16.gmra.mrb[8].mxu1 %vm746_vm5, %v5246_v15  ;;  %v1260_v15 = vld [vmem:[%s7117_s5 + $0x3c] sm:$0xe]  ;;  %9048 = vst [vmem:[#allocation20_spill] sm:$0xff] %v8046_v2 }
 0x106   : > { %6158 = vmatmul.mubr.msk.bf16.gmra.mrb[24].mxu0 %vm746_vm5, %v5510_v48  ;;  %6009 = vmatprep.mubr.msk.bf16.mxu1 %vm746_vm5, %v5247_v16  ;;  %v1324_v48 = vrot.slane %v1322_v36, 4  ;;  %v6680_v16 = vld [vmem:[%s7117_s5 + $0x20] sm:$0x1]  ;;  %v6683_v36 = vld [vmem:[%s7117_s5 + $0x4c] sm:$0xf] }
 0x107   : > { %6161 = vmatprep.mubr.msk.bf16.mxu0 %vm746_vm5, %v5511_v4  ;;  %v1325_v9 = vrot.slane %v6680_v16, 5  ;;  %v1331_v4 = vrot.slane %v1329_v1, 4  ;;  %v1350_v34 = vrot.slane %v6683_v36, 5 }
 0x109   : > { %v7765_v41 = vsel %vm7367_vm8, %v1324_v48, %v1325_v9  ;;  %v7774_v14 = vsel %vm7367_vm8, %v1331_v4, %v1332_v24  ;;  %v6686_v48 = vld [vmem:[%s7117_s5 + $0x50] sm:$0x1]  ;;  %v5597_v9 = vld [vmem:[%s7117_s5 + $0x28] sm:$0xf]  ;;  %v1352_v43 = vrot.slane %v1350_v34, 4  ;;  %v5280_v4 = vrot.slane %v1262_v25, 9 }
 0x10a   : > { %v1353_v16 = vrot.slane %v6686_v48, 5  ;;  %v3684_v24 = vshll.u32 %v5593_v33, 16  ;;  %v3718_v25 = vshrl.u32 %v5597_v9, 16  ;;  %v6639_v48 = vld [vmem:[%s7117_s5 + $0x60] sm:$0xff]   ;;  %v6689_v33 = vld [vmem:[%s7117_s5 + $0x68] sm:$0x1] }
 0x10d   : > { %6010 = vmatmul.mubr.msk.bf16.gmra.mrb[12].mxu1 %vm746_vm5, %v5248_v35  ;;  %v7743_v35 = vsel %vm7367_vm8, %v5274_v60, %v1315_v59  ;;  %v1343_v59 = vrot.slane %v7677_v8, 5  ;;  %v6633_v8 = vld [vmem:[%s7117_s5 + $0x3c] sm:$0xff]   ;;  %v5596_v60 = vld [vmem:[%s7117_s5 + $0x24] sm:$0xf] }
 0x10e   : > { %6162 = vmatmul.mubr.msk.bf16.gmra.mrb[28].mxu0 %vm746_vm5, %v5512_v62  ;;  %6013 = vmatprep.mubr.msk.bf16.mxu1 %vm746_vm5, %v5249_v44  ;;  %v5277_v62 = vrot.slane %v1259_v28, 9  ;;  %v5278_v44 = vrot.slane %v1260_v15, 9 }
 0x10f   : > { %6167 = vmatprep.mubr.msk.bf16.mxu0 %vm746_vm5, %v6627_v46  ;;  %v6682_v46 = vld [vmem:[%s7117_s5 + $0x38] sm:$0x1]  ;;  %v1345_v15 = vrot.slane %v1343_v59, 4 }
 0x110   : > { %v1339_v50 = vrot.slane %v6682_v46, 5  ;;  %v7807_v61 = vsel %vm7367_vm8, %v5278_v44, %v1343_v59  ;;  %v1263_v46 = vld [vmem:[%s7117_s5 + $0x60] sm:$0xe]  ;;  %v3714_v59 = vshll.u32 %v5597_v9, 16 }
 0x115   : > { %6014 = vmatmul.mubr.msk.bf16.gmra.mrb[16].mxu1 %vm746_vm5, %v5250_v57  ;;  %v6684_v57 = vld [vmem:[%s7117_s5 + $0x58] sm:$0xf] }
 0x116   : > { %6168 = vmatmul.mubr.msk.bf16.vlgmr.msra.gmra.mrb[0].mxu0 %vm746_vm5, %v6629_v0  ;;  %6017 = vmatprep.mubr.msk.bf16.mxu1 %vm746_vm5, %v5251_v40  ;;  %v1357_v58 = vrot.slane %v6684_v57, 5  ;;  %v7803_v40 = vsel %vm7367_vm8, %v5277_v62, %v1336_v31  ;;  %v6687_v62 = vld [vmem:[%s7117_s5 + $0x5c] sm:$0x1]  ;;  %v6637_v57 = vld [vmem:[%s7117_s5 + $0x54] sm:$0xff]  }
 0x117   : > { %6200 = vmatpush3.bf16.msra.mxu0 %v7653_v52  ;;  %6171 = vmatprep.mubr.msk.bf16.mxu0 %vm746_vm5, %v6631_v3  ;;  %v1338_v52 = vrot.slane %v1336_v31, 4  ;;  %v5279_v3 = vrot.slane %v1261_v45, 9  ;;  %v1360_v44 = vrot.slane %v6687_v62, 5  ;;  %v3690_v45 = vshll.u32 %v5594_v55, 16 }
 0x118   : > { %6233 = vmatprep.subr.bf16.mxu0 %v7730_v53  ;;  %v1359_v31 = vrot.slane %v1357_v58, 4 }
 0x119   : > { %v7812_v28 = vsel %vm7367_vm8, %v1338_v52, %v1339_v50  ;;  %v3694_v52 = vshrl.u32 %v5594_v55, 16  ;;  %v3708_v50 = vshll.u32 %v5596_v60, 16  ;;  %v7830_v36 = vsel %vm7367_vm8, %v5279_v3, %v1350_v34  ;;  %v6688_v55 = vld [vmem:[%s7117_s5 + $0x64] sm:$0xf] }
 0x11a   : > { %v7846_v34 = vsel %vm7367_vm8, %v1359_v31, %v1360_v44  ;;  %v5281_v3 = vrot.slane %v1263_v46, 9  ;;  %v7848_v9 = vrot.slane %v3690_v45, 5  ;;  %v1367_v31 = vrot.slane %v6689_v33, 5  ;;  %v6690_v44 = vld [vmem:[%s7117_s5 + $0x70] sm:$0xf] }
 0x11b   : > { %v1371_v0 = vrot.slane %v6690_v44, 5  ;;  %v5598_v46 = vld [vmem:[%s7117_s5 + $0x2c] sm:$0x1]  ;;  %v5602_v45 = vld [vmem:[%s7117_s5 + $0x3c] sm:$0xf] }
 0x11d   : > { %6018 = vmatmul.mubr.msk.bf16.gmra.mrb[20].mxu1 %vm746_vm5, %v5252_v56  ;;  %v3705_v56 = vshrl.u32 %v5596_v60, 16  ;;  %v7836_v60 = vsel %vm7367_vm8, %v1352_v43, %v1353_v16  ;;  %v3696_v16 = vrot.slane %v3694_v52, 4  ;;  %v1264_v43 = vld [vmem:[%s7117_s5 + $0x6c] sm:$0xe] }
 0x11e   : > { %6172 = vmatmul.mubr.msk.bf16.gmra.mrb[4].mxu0 %vm746_vm5, %v6633_v8  ;;  %6021 = vmatprep.mubr.msk.bf16.mxu1 %vm746_vm5, %v5253_v37  ;;  %v7826_v37 = vsel %vm7367_vm8, %v1345_v15, %v1346_v47  ;;  %v1364_v8 = vrot.slane %v6688_v55, 5  ;;  %v3683_v47 = vrot.slane %v3681_v21, 4  ;;  %v3686_v15 = vrot.slane %v3684_v24, 5 }
 0x11f   : > { %6175 = vmatprep.mubr.msk.bf16.mxu0 %vm746_vm5, %v6635_v18  ;;  %v7840_v18 = vsel %vm7367_vm8, %v5280_v4, %v1357_v58  ;;  %v3707_v62 = vrot.slane %v3705_v56, 4  ;;  %v3710_v55 = vrot.slane %v3708_v50, 5  ;;  %v7851_v58 = vrot.slane %v3714_v59, 5 }
 0x120   : > { %v3720_v4 = vrot.slane %v3718_v25, 4  ;;  %v1366_v24 = vrot.slane %v1364_v8, 4  ;;  %v3687_v56 = vor.u32 %v3686_v15, %v3683_v47  ;;  %v3700_v50 = vshll.u32 %v5595_v11, 16  ;;  %v6691_v15 = vld [vmem:[%s7117_s5 + $0x74] sm:$0x1] }
 0x121   : > { %v3697_v54 = vor.u32 %v3696_v16, %v7848_v9  ;;  %v5282_v5 = vrot.slane %v1264_v43, 9  ;;  %v3729_v59 = vshrl.u32 %v5599_v39, 16  ;;  %v3732_v25 = vshll.u32 %v5599_v39, 16  ;;  %v1265_v39 = vld [vmem:[%s7117_s5 + $0x78] sm:$0xe] }
 0x122   : > { %v7879_v33 = vsel %vm7367_vm8, %v5281_v3, %v1364_v8  ;;  %v3711_v29 = vor.u32 %v3710_v55, %v3707_v62  ;;  %v7884_v11 = vsel %vm7367_vm8, %v1366_v24, %v1367_v31  ;;  %v1373_v47 = vrot.slane %v1371_v0, 4  ;;  %v6692_v43 = vld [vmem:[%s7117_s5 + $0x7c] sm:$0xf]  ;;  %v6641_v62 = vld [vmem:[%s7117_s5 + $0x6c] sm:$0xff]  }
 0x123   : > { %v1374_v16 = vrot.slane %v6691_v15, 5  ;;  %v3688_v44 = vrot.slane %v3687_v56, 4  ;;  %v3702_v52 = vrot.slane %v3700_v50, 5  ;;  %v6642_v55 = vld [vmem:[%s7117_s5 + $0x78] sm:$0xff]   ;;  %v7895_v24 = vsel %vm7367_vm8, %v5282_v5, %v1371_v0  ;;  %v6646_v5 = vld [vmem:[%s7117_s5 + $0xa8] sm:$0xff]  }
 0x124   : > { %v3731_v31 = vrot.slane %v3729_v59, 4  ;;  %v3712_v15 = vrot.slane %v3711_v29, 4  ;;  %v5283_v50 = vrot.slane %v1265_v39, 9  ;;  %v1385_v0 = vrot.slane %v6694_v42, 5 }
 0x125   : > { %6022 = vmatmul.mubr.msk.bf16.gmra.mrb[24].mxu1 %vm746_vm5, %v5254_v22  ;;  %v7874_v22 = vld [vmem:[%s7117_s5 + $0x34] sm:$0xf]  ;;  %v7900_v21 = vsel %vm7367_vm8, %v1373_v47, %v1374_v16  ;;  %v3693_v59 = vsel %vm7153_vm4, %v3688_v44, %v7848_v9  ;;  %v9039_v42 = vcombine.low %v7739_v27, %v7751_v38  ;;  %v7927_v9 = vld [vmem:[%s7117_s5 + $0x40] sm:$0xf]  ;;  %v3756_v47 = vshll.u32 %v5602_v45, 16 }
 0x126   : > { %6176 = vmatmul.mubr.msk.bf16.gmra.mrb[8].mxu0 %vm746_vm5, %v6637_v57  ;;  %6025 = vmatprep.mubr.msk.bf16.mxu1 %vm746_vm5, %v5255_v32  ;;  %9038 = vst [vmem:[#allocation14_spill] sm:$0xff] %v7874_v22  ;;  %v3721_v57 = vor.u32 %v3720_v4, %v7851_v58  ;;  %v3724_v32 = vshll.u32 %v5598_v46, 16  ;;  %v3738_v8 = vshll.u32 %v7874_v22, 16  ;;  %v3742_v3 = vshrl.u32 %v7874_v22, 16  ;;  %9041 = vst [vmem:[#allocation16_spill] sm:$0xff] %v7927_v9 }
 0x127   : > { %6179 = vmatprep.mubr.msk.bf16.mxu0 %vm746_vm5, %v6639_v48  ;;  %v1378_v48 = vrot.slane %v6692_v43, 5  ;;  %v3698_v4 = vrot.slane %v3697_v54, 4  ;;  %v3734_v46 = vrot.slane %v3732_v25, 5  ;;  %v6693_v54 = vld [vmem:[%s7117_s5 + $0x80] sm:$0x1]  ;;  %v3717_v38 = vsel %vm7153_vm4, %v3712_v15, %v7851_v58 }
 0x128   : > { %v3722_v43 = vrot.slane %v3721_v57, 4  ;;  %v3726_v56 = vrot.slane %v3724_v32, 5  ;;  %v1381_v1 = vrot.slane %v6693_v54, 5  ;;  %v7913_v25 = vrot.slane %v3738_v8, 5  ;;  %v1266_v57 = vld [vmem:[%s7117_s5 + $0x84] sm:$0xe] }
 0x129   : > { %v1380_v63 = vrot.slane %v1378_v48, 4  ;;  %v3744_v29 = vrot.slane %v3742_v3, 4  ;;  %v3703_v13 = vsel %vm7153_vm4, %v3698_v4, %v3702_v52  ;;  %v3753_v32 = vshrl.u32 %v5602_v45, 16  ;;  %v6695_v8 = vld [vmem:[%s7117_s5 + $0x8c] sm:$0x1] }
 0x12a   : > { %v3727_v52 = vsel %vm7153_vm4, %v3722_v43, %v3726_v56  ;;  %v7939_v16 = vsel %vm7367_vm8, %v5283_v50, %v1378_v48  ;;  %v5284_v39 = vrot.slane %v1266_v57, 9  ;;  %v1387_v44 = vrot.slane %v1385_v0, 4  ;;  %v6644_v56 = vld [vmem:[%s7117_s5 + $0x90] sm:$0xff]  }
 0x12b   : > { %v7943_v45 = vsel %vm7367_vm8, %v1380_v63, %v1381_v1  ;;  %v1388_v3 = vrot.slane %v6695_v8, 5  ;;  %v3745_v58 = vor.u32 %v3744_v29, %v7913_v25  ;;  %v3762_v4 = vshll.u32 %v7927_v9, 16  ;;  %v6643_v1 = vld [vmem:[%s7117_s5 + $0x84] sm:$0xff]  }
 0x12c   : > { %v3766_v48 = vshrl.u32 %v7927_v9, 16  ;;  %v7955_v63 = vcombine.low %v3693_v59, %v3703_v13  ;;  %v3755_v15 = vrot.slane %v3753_v32, 4  ;;  %v3758_v43 = vrot.slane %v3756_v47, 5  ;;  %v7965_v29 = vld [vmem:[%s7117_s5 + $0x44] sm:$0x1] }
 0x12d   : > { %6026 = vmatmul.mubr.msk.bf16.gmra.mrb[28].mxu1 %vm746_vm5, %v5256_v19  ;;  %v3735_v19 = vor.u32 %v3734_v46, %v3731_v31  ;;  %v7952_v31 = vld [vmem:[%s7117_s5 + $0x4c] sm:$0xf]  ;;  %v7960_v50 = vcombine.low %v3717_v38, %v3727_v52  ;;  %9042 = vst [vmem:[#allocation17_spill] sm:$0xff] %v7965_v29  ;;  %v7969_v8 = vsel %vm7367_vm8, %v5284_v39, %v1385_v0  ;;  %v1267_v13 = vld [vmem:[%s7117_s5 + $0x90] sm:$0xe]  ;;  %v7982_v38 = vrot.slane %v3745_v58, 4 }
 0x12e   : > { %6180 = vmatmul.mubr.msk.bf16.gmra.mrb[12].mxu0 %vm746_vm5, %v6641_v62  ;;  %6031 = vmatprep.mubr.msk.bf16.mxu1 %vm746_vm5, %v9039_v42  ;;  %v5605_v62 = vld [vmem:[%s7117_s5 + $0x48] sm:$0xf]  ;;  %v7973_v59 = vsel %vm7367_vm8, %v1387_v44, %v1388_v3  ;;  %v3790_v32 = vshrl.u32 %v7952_v31, 16  ;;  %v9043_v47 = vcombine.low %v7743_v35, %v7755_v17  ;;  %v7986_v52 = vrot.slane %v3762_v4, 5  ;;  %v5608_v44 = vld [vmem:[%s7117_s5 + $0x54] sm:$0xf] }
 0x12f   : > { %6183 = vmatprep.mubr.msk.bf16.mxu0 %vm746_vm5, %v6642_v55  ;;  %v3748_v55 = vshll.u32 %v7924_v26, 16  ;;  %v7957_v46 = vrot.slane %v3735_v19, 4  ;;  %v3777_v57 = vshrl.u32 %v5605_v62, 16  ;;  %v3780_v42 = vshll.u32 %v5605_v62, 16  ;;  %v6696_v62 = vld [vmem:[%s7117_s5 + $0x94] sm:$0xf] }
 0x130   : > { %v3786_v19 = vshll.u32 %v7952_v31, 16  ;;  %v3768_v39 = vrot.slane %v3766_v48, 4  ;;  %v3759_v17 = vor.u32 %v3758_v43, %v3755_v15  ;;  %v3772_v3 = vshll.u32 %v7965_v29, 16  ;;  %v1268_v9 = vld [vmem:[%s7117_s5 + $0x9c] sm:$0xe] }
 0x131   : > { %v7984_v0 = vrot.slane %v3748_v55, 5  ;;  %v1392_v58 = vrot.slane %v6696_v62, 5  ;;  %v7998_v55 = vld [vmem:[%s7117_s5 + $0x58] sm:$0xf]  ;;  %v9045_v4 = vcombine.low %v7759_v12, %v7765_v41  ;;  %v5285_v48 = vrot.slane %v1267_v13, 9 }
 0x132   : > { %9044 = vst [vmem:[#allocation18_spill] sm:$0xff] %v7998_v55  ;;  %v3779_v15 = vrot.slane %v3777_v57, 4  ;;  %v3782_v43 = vrot.slane %v3780_v42, 5  ;;  %v3792_v62 = vrot.slane %v3790_v32, 4  ;;  %v3801_v54 = vshrl.u32 %v5608_v44, 16 }
 0x133   : > { %v3804_v12 = vshll.u32 %v5608_v44, 16  ;;  %v5611_v41 = vld [vmem:[%s7117_s5 + $0x60] sm:$0xf]  ;;  %v3769_v13 = vor.u32 %v3768_v39, %v7986_v52  ;;  %v3810_v57 = vshll.u32 %v7998_v55, 16  ;;  %v3814_v42 = vshrl.u32 %v7998_v55, 16 }
 0x134   : > { %v8022_v32 = vrot.slane %v3759_v17, 4  ;;  %v8024_v44 = vrot.slane %v3772_v3, 5  ;;  %v8034_v39 = vld [vmem:[%s7117_s5 + $0x64] sm:$0xf]  ;;  %v3825_v35 = vshrl.u32 %v5611_v41, 16  ;;  %v3828_v29 = vshll.u32 %v5611_v41, 16 }
 0x135   : > { %6032 = vmatmul.mubr.msk.bf16.vlgmr.msra.gmra.mrb[0].mxu1 %vm746_vm5, %v9043_v47  ;;  %v8010_v47 = vrot.slane %v3786_v19, 5  ;;  %v6645_v19 = vld [vmem:[%s7117_s5 + $0x9c] sm:$0xff]   ;;  %9046 = vst [vmem:[#allocation19_spill] sm:$0xff] %v8034_v39  ;;  %v3783_v17 = vor.u32 %v3782_v43, %v3779_v15  ;;  %v3803_v26 = vrot.slane %v3801_v54, 4  ;;  %v3806_v22 = vrot.slane %v3804_v12, 5 }
 0x136   : > { %6064 = vmatpush3.bf16.msra.mxu1 %v7661_v10  ;;  %6184 = vmatmul.mubr.msk.bf16.gmra.mrb[16].mxu0 %vm746_vm5, %v6643_v1  ;;  %v8008_v1 = vld [vmem:[%s7117_s5 + $0x50] sm:$0x1]  ;;  %v6697_v10 = vld [vmem:[%s7117_s5 + $0x98] sm:$0x1]  ;;  %v8048_v55 = vrot.slane %v3810_v57, 5  ;;  %v3816_v15 = vrot.slane %v3814_v42, 4  ;;  %v9049_v54 = vcombine.low %v7803_v40, %v7812_v28 }
 0x137   : > { %6035 = vmatprep.mubr.msk.bf16.mxu1 %vm746_vm5, %v9045_v4  ;;  %6187 = vmatprep.mubr.msk.bf16.mxu0 %vm746_vm5, %v6644_v56  ;;  %v3751_v56 = vsel %vm7153_vm4, %v7982_v38, %v7984_v0  ;;  %v1394_v4 = vrot.slane %v1392_v58, 4  ;;  %v1395_v27 = vrot.slane %v6697_v10, 5  ;;  %v8030_v38 = vsel %vm7367_vm8, %v5285_v48, %v1392_v58  ;;  %v6698_v48 = vld [vmem:[%s7117_s5 + $0xa0] sm:$0xf] }
 0x138   : > { %6267 = vmatprep.subr.bf16.mxu1 %v7132_v7  ;;  %v3796_v0 = vshll.u32 %v8008_v1, 16  ;;  %v3793_v3 = vor.u32 %v3792_v62, %v8010_v47  ;;  %v9047_v10 = vcombine.low %v7769_v49, %v7774_v14  ;;  %v8042_v58 = vrot.slane %v3769_v13, 4  ;;  %v1269_v14 = vld [vmem:[%s7117_s5 + $0xa8] sm:$0xe] }
 0x139   : > { %v1399_v7 = vrot.slane %v6698_v48, 5  ;;  %v8057_v49 = vsel %vm7367_vm8, %v1394_v4, %v1395_v27  ;;  %v1406_v43 = vrot.slane %v7507_v51, 5  ;;  %v3834_v62 = vshll.u32 %v8034_v39, 16  ;;  %v6699_v27 = vld [vmem:[%s7117_s5 + $0xa4] sm:$0x1] }
 0x13a   : > { %v3838_v12 = vshrl.u32 %v8034_v39, 16  ;;  %v3798_v41 = vrot.slane %v3796_v0, 5  ;;  %v5286_v13 = vrot.slane %v1268_v9, 9  ;;  %v3827_v40 = vrot.slane %v3825_v35, 4  ;;  %v6647_v39 = vld [vmem:[%s7117_s5 + $0xb4] sm:$0xff]  }
 0x13b   : > { %v3830_v28 = vrot.slane %v3828_v29, 5  ;;  %v3784_v57 = vrot.slane %v3783_v17, 4  ;;  %v3794_v42 = vrot.slane %v3793_v3, 4  ;;  %v3807_v4 = vor.u32 %v3806_v22, %v3803_v26  ;;  %v6700_v9 = vld [vmem:[%s7117_s5 + $0xb0] sm:$0x1]  ;;  %v6648_v17 = vld [vmem:[%s7117_s5 + $0xc0] sm:$0xff]  }
 0x13c   : > { %v1401_v51 = vrot.slane %v1399_v7, 4  ;;  %v3820_v48 = vshll.u32 %v8046_v2, 16  ;;  %v1409_v35 = vrot.slane %v6700_v9, 5  ;;  %v8069_v29 = vrot.slane %v3834_v62, 5 }
 0x13d   : > { %6036 = vmatmul.mubr.msk.bf16.gmra.mrb[4].mxu1 %vm746_vm5, %v9047_v10  ;;  %v3817_v10 = vor.u32 %v3816_v15, %v8048_v55  ;;  %v3840_v0 = vrot.slane %v3838_v12, 4  ;;  %v9050_v22 = vsel %vm7153_vm4, %v7957_v46, %v7913_v25  ;;  %v3765_v3 = vsel %vm7153_vm4, %v8022_v32, %v7986_v52  ;;  %v5614_v32 = vld [vmem:[%s7117_s5 + $0x6c] sm:$0xf]  ;;  %v8204_v12 = vld [vmem:[%s7117_s5 + $0x74] sm:$0x1] }
 0x13e   : > { %6188 = vmatmul.mubr.msk.bf16.gmra.mrb[20].mxu0 %vm746_vm5, %v6645_v19  ;;  %6039 = vmatprep.mubr.msk.bf16.mxu1 %vm746_vm5, %v9049_v54  ;;  %v1402_v19 = vrot.slane %v6699_v27, 5  ;;  %v5287_v54 = vrot.slane %v1269_v14, 9  ;;  %v8077_v26 = vcombine.low %v9050_v22, %v3751_v56  ;;  %v3775_v15 = vsel %vm7153_vm4, %v8042_v58, %v8024_v44  ;;  %v8088_v14 = vld [vmem:[%s7117_s5 + $0x68] sm:$0x1]  ;;  %v1270_v56 = vld [vmem:[%s7117_s5 + $0xb4] sm:$0xe] }
 0x13f   : > { %6191 = vmatprep.mubr.msk.bf16.mxu0 %vm746_vm5, %v6646_v5  ;;  %v1408_v5 = vrot.slane %v1406_v43, 4  ;;  %9051 = vst [vmem:[#allocation21_spill] sm:$0xff] %v8088_v14  ;;  %v3831_v62 = vor.u32 %v3830_v28, %v3827_v40  ;;  %v3789_v25 = vsel %vm7153_vm4, %v3784_v57, %v8010_v47  ;;  %v8097_v46 = vsel %vm7367_vm8, %v5286_v13, %v1399_v7  ;;  %v8133_v57 = vld [vmem:[%s7117_s5 + $0x70] sm:$0xf] }
 0x140   : > { %v8099_v52 = vrot.slane %v3807_v4, 4  ;;  %v9052_v44 = vcombine.low %v7807_v61, %v7826_v37  ;;  %v3799_v58 = vsel %vm7153_vm4, %v3794_v42, %v3798_v41  ;;  %v8111_v47 = vsel %vm7367_vm8, %v1401_v51, %v1402_v19  ;;  %9057 = vst [vmem:[#allocation25_spill] sm:$0xff] %v8133_v57  ;;  %v6649_v27 = vld [vmem:[%s7117_s5 + $0xcc] sm:$0xff]   ;;  %9063 = vst [vmem:[#allocation29_spill] sm:$0xff] %v8204_v12 }
 0x141   : > { %9053 = vst [vmem:[#allocation22_spill] sm:$0xff] %v8111_v47  ;;  %v8113_v7 = vrot.slane %v3817_v10, 4  ;;  %v8115_v13 = vrot.slane %v3820_v48, 5  ;;  %v9054_v61 = vcombine.low %v7830_v36, %v7836_v60  ;;  %v8124_v37 = vsel %vm7367_vm8, %v5287_v54, %v1406_v43  ;;  %v8190_v10 = vld [vmem:[%s7117_s5 + $0x94] sm:$0xf] }
 0x142   : > { %9055 = vst [vmem:[#allocation23_spill] sm:$0xff] %v8124_v37  ;;  %v8128_v41 = vsel %vm7367_vm8, %v1408_v5, %v1409_v35  ;;  %v3841_v40 = vor.u32 %v3840_v0, %v8069_v29  ;;  %v3844_v28 = vshll.u32 %v8088_v14, 16  ;;  %v8136_v36 = vrot.slane %v3831_v62, 4  ;;  %v5617_v35 = vld [vmem:[%s7117_s5 + $0x78] sm:$0xf]  ;;  %9060 = vst [vmem:[#allocation28_spill] sm:$0xff] %v8190_v10 }
 0x143   : > { %9056 = vst [vmem:[#allocation24_spill] sm:$0xff] %v8128_v41  ;;  %v5288_v60 = vrot.slane %v1270_v56, 9  ;;  %v3849_v42 = vshrl.u32 %v5614_v32, 16  ;;  %v8140_v19 = vcombine.low %v3765_v3, %v3775_v15  ;;  %v8142_v4 = vcombine.low %v3789_v25, %v3799_v58  ;;  %v8159_v0 = vld [vmem:[%s7117_s5 + $0x7c] sm:$0xf] }
 0x144   : > { %v3852_v5 = vshll.u32 %v5614_v32, 16  ;;  %v3858_v9 = vshll.u32 %v8133_v57, 16  ;;  %9058 = vst [vmem:[#allocation26_spill] sm:$0xff] %v8159_v0  ;;  %v8163_v22 = vrot.slane %v3844_v28, 5  ;;  %v8166_v3 = vld [vmem:[%s7117_s5 + $0xbc] sm:$0x1] }
 0x145   : > { %6040 = vmatmul.mubr.msk.bf16.gmra.mrb[8].mxu1 %vm746_vm5, %v9052_v44  ;;  %v3862_v62 = vshrl.u32 %v8133_v57, 16  ;;  %v5620_v25 = vld [vmem:[%s7117_s5 + $0x84] sm:$0xf]  ;;  %v8181_v58 = vrot.slane %v3849_v42, 4  ;;  %v3873_v28 = vshrl.u32 %v5617_v35, 16  ;;  %v3882_v54 = vshll.u32 %v8159_v0, 16 }
 0x146   : > { %6192 = vmatmul.mubr.msk.bf16.gmra.mrb[24].mxu0 %vm746_vm5, %v6647_v39  ;;  %6043 = vmatprep.mubr.msk.bf16.mxu1 %vm746_vm5, %v9054_v61  ;;  %v6701_v39 = vld [vmem:[%s7117_s5 + $0xb8] sm:$0xf]  ;;  %v8184_v61 = vld [vmem:[%s7117_s5 + $0x88] sm:$0xf]  ;;  %v3886_v51 = vshrl.u32 %v8159_v0, 16  ;;  %v8196_v42 = vrot.slane %v3858_v9, 5 }
 0x147   : > { %6195 = vmatprep.mubr.msk.bf16.mxu0 %vm746_vm5, %v6648_v17  ;;  %v1413_v43 = vrot.slane %v6701_v39, 5  ;;  %v8161_v17 = vrot.slane %v3841_v40, 4  ;;  %9059 = vst [vmem:[#allocation27_spill] sm:$0xff] %v8184_v61  ;;  %v5623_v40 = vld [vmem:[%s7117_s5 + $0x90] sm:$0xf]  ;;  %v3876_v39 = vshll.u32 %v5617_v35, 16  ;;  %v9062_v35 = vcombine.low %v7879_v33, %v7884_v11 }
 0x148   : > { %v3897_v56 = vshrl.u32 %v5620_v25, 16  ;;  %v3900_v48 = vshll.u32 %v5620_v25, 16  ;;  %v3924_v9 = vshll.u32 %v5623_v40, 16  ;;  %v3864_v11 = vrot.slane %v3862_v62, 4  ;;  %v8225_v33 = vld [vmem:[%s7117_s5 + $0x8c] sm:$0x1] }
 0x149   : > { %v8177_v32 = vsel %vm7367_vm8, %v5288_v60, %v1413_v43  ;;  %v8179_v44 = vrot.slane %v1413_v43, 4  ;;  %v9061_v60 = vcombine.low %v7840_v18, %v7846_v34  ;;  %v3854_v43 = vrot.slane %v3852_v5, 5  ;;  %v8230_v47 = vld [vmem:[%s7117_s5 + $0xa0] sm:$0xf] }
 0x14a   : > { %v3906_v18 = vshll.u32 %v8184_v61, 16  ;;  %v3910_v34 = vshrl.u32 %v8184_v61, 16  ;;  %v3921_v5 = vshrl.u32 %v5623_v40, 16  ;;  %v3930_v25 = vshll.u32 %v8190_v10, 16 }
 0x14b   : > { %v3878_v15 = vrot.slane %v3876_v39, 5  ;;  %v8219_v40 = vrot.slane %v3882_v54, 5  ;;  %v3888_v61 = vrot.slane %v3886_v51, 4  ;;  %v3855_v0 = vor.u32 %v3854_v43, %v8181_v58 }
 0x14c   : > { %v3868_v57 = vshll.u32 %v8204_v12, 16  ;;  %v3899_v62 = vrot.slane %v3897_v56, 4  ;;  %v3902_v14 = vrot.slane %v3900_v48, 5  ;;  %v8227_v2 = vrot.slane %v3906_v18, 5 }
 0x14d   : > { %6044 = vmatmul.mubr.msk.bf16.gmra.mrb[12].mxu1 %vm746_vm5, %v9061_v60  ;;  %v3934_v60 = vshrl.u32 %v8190_v10, 16  ;;  %v3912_v41 = vrot.slane %v3910_v34, 4  ;;  %v3923_v37 = vrot.slane %v3921_v5, 4  ;;  %v3926_v10 = vrot.slane %v3924_v9, 5 }
 0x14e   : > { %6196 = vmatmul.mubr.msk.bf16.gmra.mrb[28].mxu0 %vm746_vm5, %v6649_v27  ;;  %6047 = vmatprep.mubr.msk.bf16.mxu1 %vm746_vm5, %v9062_v35  ;;  %v8215_v27 = vld [vmem:[%s7117_s5 + $0x80] sm:$0x1]  ;;  %v3875_v35 = vrot.slane %v3873_v28, 4  ;;  %v8233_v28 = vld [vmem:[%s7117_s5 + $0x98] sm:$0x1]  ;;  %v8235_v54 = vrot.slane %v3930_v25, 5  ;;  %v3865_v43 = vor.u32 %v3864_v11, %v8196_v42  ;;  %v3889_v56 = vor.u32 %v3888_v61, %v8219_v40 }
 0x14f   : > { %6201 = vmatprep.mubr.msk.bf16.mxu0 %vm746_vm5, %v7955_v63  ;;  %v5626_v63 = vld [vmem:[%s7117_s5 + $0x9c] sm:$0xf]  ;;  %v3936_v51 = vrot.slane %v3934_v60, 4  ;;  %v3892_v48 = vshll.u32 %v8215_v27, 16  ;;  %v9064_v18 = vcombine.low %v7895_v24, %v7900_v21  ;;  %v3870_v34 = vrot.slane %v3868_v57, 5 }
 0x150   : > { %v3945_v39 = vshrl.u32 %v5626_v63, 16  ;;  %v3948_v58 = vshll.u32 %v5626_v63, 16  ;;  %v3879_v12 = vor.u32 %v3878_v15, %v3875_v35  ;;  %v3916_v5 = vshll.u32 %v8225_v33, 16 }
 0x151   : > { %v3954_v9 = vshll.u32 %v8230_v47, 16  ;;  %v3958_v25 = vshrl.u32 %v8230_v47, 16  ;;  %v9065_v15 = vcombine.low %v7939_v16, %v7943_v45  ;;  %v3903_v61 = vor.u32 %v3902_v14, %v3899_v62 }
 0x152   : > { %v3913_v21 = vor.u32 %v3912_v41, %v8227_v2  ;;  %v3927_v24 = vor.u32 %v3926_v10, %v3923_v37  ;;  %v3940_v57 = vshll.u32 %v8233_v28, 16  ;;  %v3856_v11 = vrot.slane %v3855_v0, 4  ;;  %v5629_v41 = vld [vmem:[%s7117_s5 + $0xa8] sm:$0xf] }
 0x153   : > { %v3947_v60 = vrot.slane %v3945_v39, 4  ;;  %v3950_v16 = vrot.slane %v3948_v58, 5  ;;  %v3866_v45 = vrot.slane %v3865_v43, 4  ;;  %v3880_v35 = vrot.slane %v3879_v12, 4  ;;  %v8273_v43 = vld [vmem:[%s7117_s5 + $0xac] sm:$0xf] }
 0x154   : > { %v3890_v14 = vrot.slane %v3889_v56, 4  ;;  %v3894_v63 = vrot.slane %v3892_v48, 5  ;;  %v9066_v37 = vrot.slane %v8166_v3, 5  ;;  %v3918_v10 = vrot.slane %v3916_v5, 5 }
 0x155   : > { %6048 = vmatmul.mubr.msk.bf16.gmra.mrb[16].mxu1 %vm746_vm5, %v9064_v18  ;;  %v8270_v0 = vrot.slane %v3954_v9, 5  ;;  %v3960_v62 = vrot.slane %v3958_v25, 4  ;;  %v3914_v39 = vrot.slane %v3913_v21, 4  ;;  %v3928_v58 = vrot.slane %v3927_v24, 4 }
 0x156   : > { %6202 = vmatmul.mubr.msk.bf16.vlgmr.msra.gmra.mrb[0].mxu0 %vm746_vm5, %v7960_v50  ;;  %6051 = vmatprep.mubr.msk.bf16.mxu1 %vm746_vm5, %v9065_v15  ;;  %v3937_v50 = vor.u32 %v3936_v51, %v8235_v54  ;;  %v3904_v51 = vrot.slane %v3903_v61, 4  ;;  %v3942_v12 = vrot.slane %v3940_v57, 5  ;;  %v3951_v48 = vor.u32 %v3950_v16, %v3947_v60 }
 0x157   : > { %6234 = vmatpush3.bf16.msra.mxu0 %v7730_v53  ;;  %6205 = vmatprep.mubr.msk.bf16.mxu0 %vm746_vm5, %v8077_v26  ;;  %v8265_v53 = vsel %vm7367_vm8, %v8179_v44, %v9066_v37  ;;  %v8268_v26 = vld [vmem:[%s7117_s5 + $0xa4] sm:$0x1]  ;;  %v3969_v3 = vshrl.u32 %v5629_v41, 16  ;;  %v3972_v18 = vshll.u32 %v5629_v41, 16  ;;  %v3861_v44 = vsel %vm7153_vm4, %v3856_v11, %v8196_v42 }
 0x158   : > { %v3938_v56 = vrot.slane %v3937_v50, 4  ;;  %v3871_v5 = vsel %vm7153_vm4, %v3866_v45, %v3870_v34  ;;  %v3885_v9 = vsel %vm7153_vm4, %v3880_v35, %v8219_v40  ;;  %v3895_v25 = vsel %vm7153_vm4, %v3890_v14, %v3894_v63  ;;  %v5632_v35 = vld [vmem:[%s7117_s5 + $0xb4] sm:$0xf] }
 0x159   : > { %v9067_v15 = vcombine.low %v7969_v8, %v7973_v59  ;;  %v3961_v61 = vor.u32 %v3960_v62, %v8270_v0  ;;  %v3964_v42 = vshll.u32 %v8268_v26, 16  ;;  %v3978_v21 = vshll.u32 %v8273_v43, 16 }
 0x15a   : > { %v3982_v34 = vshrl.u32 %v8273_v43, 16  ;;  %v9068_v40 = vor.u32 %v7708_v20, %v7706_v23  ;;  %v9069_v8 = vcombine.low %v8030_v38, %v8057_v49  ;;  %v3909_v59 = vsel %vm7153_vm4, %v3904_v51, %v8227_v2 }
 0x15b   : > { %v3919_v57 = vsel %vm7153_vm4, %v3914_v39, %v3918_v10  ;;  %v3933_v20 = vsel %vm7153_vm4, %v3928_v58, %v8235_v54  ;;  %v3943_v38 = vsel %vm7153_vm4, %v3938_v56, %v3942_v12  ;;  %v3952_v49 = vrot.slane %v3951_v48, 4  ;;  %v8356_v10 = vld [vmem:[%s7117_s5 + $0xb8] sm:$0xf]  ;;  %v5679_v12 = vld [vmem:[%s7117_s5 + $0x60] sm:$0xe] }
 0x15c   : > { %v8296_v24 = vrot.slane %v9068_v40, 4  ;;  %v3971_v11 = vrot.slane %v3969_v3, 4  ;;  %v3974_v50 = vrot.slane %v3972_v18, 5  ;;  %v9070_v2 = vsel %vm7153_vm4, %v8113_v7, %v8115_v13  ;;  %v9080_v40 = vld [vmem:[#allocation20_spill] sm:$0xff] }
 0x15d   : > { %6052 = vmatmul.mubr.msk.bf16.gmra.mrb[20].mxu1 %vm746_vm5, %v9067_v15  ;;  %v9071_v54 = vsel %vm7153_vm4, %v8099_v52, %v8048_v55  ;;  %v9072_v60 = vsel %vm7153_vm4, %v8161_v17, %v8163_v22  ;;  %v9073_v16 = vsel %vm7153_vm4, %v8136_v36, %v8069_v29  ;;  %v5304_v7 = vcombine.low %v8177_v32, %v8265_v53  ;;  %v5677_v55 = vld [vmem:[%s7117_s5 + $0x48] sm:$0xe]  ;;  %v5678_v17 = vld [vmem:[%s7117_s5 + $0x54] sm:$0xe] }
 0x15e   : > { %6206 = vmatmul.mubr.msk.bf16.gmra.mrb[4].mxu0 %vm746_vm5, %v8140_v19  ;;  %6055 = vmatprep.mubr.msk.bf16.mxu1 %vm746_vm5, %v9069_v8  ;;  %v8317_v19 = vld [vmem:[%s7117_s5 + $0xb0] sm:$0x1]  ;;  %v5647_v45 = vcombine.low %v9073_v16, %v9072_v60  ;;  %v8341_v13 = vcombine.low %v3861_v44, %v3871_v5  ;;  %v3962_v52 = vrot.slane %v3961_v61, 4  ;;  %v3966_v14 = vrot.slane %v3964_v42, 5  ;;  %v9074_v44 = vld [vmem:[#allocation22_spill] sm:$0xff] }
 0x15f   : > { %6209 = vmatprep.mubr.msk.bf16.mxu0 %vm746_vm5, %v8142_v4  ;;  %v5646_v4 = vcombine.low %v9071_v54, %v9070_v2  ;;  %v8345_v63 = vrot.slane %v3978_v21, 5  ;;  %v3984_v41 = vrot.slane %v3982_v34, 4  ;;  %v8348_v22 = vcombine.low %v3885_v9, %v3895_v25  ;;  %v9076_v15 = vld [vmem:[#allocation18_spill] sm:$0xff]  ;;  %v5680_v42 = vld [vmem:[%s7117_s5 + $0x6c] sm:$0xe] }
 0x160   : > { %v8350_v37 = vcombine.low %v3909_v59, %v3919_v57  ;;  %v8352_v29 = vcombine.low %v3933_v20, %v3943_v38  ;;  %v3988_v36 = vshll.u32 %v8317_v19, 16  ;;  %v3957_v62 = vsel %vm7153_vm4, %v3952_v49, %v8270_v0  ;;  %v9081_v49 = vld [vmem:[#allocation19_spill] sm:$0xff]  ;;  %v9082_v54 = vld [vmem:[#allocation21_spill] sm:$0xff] }
 0x161   : > { %v3975_v51 = vor.u32 %v3974_v50, %v3971_v11  ;;  %v3993_v39 = vshrl.u32 %v5632_v35, 16  ;;  %v5693_v58 = vrot.slane %v5677_v55, 9  ;;  %v3996_v56 = vshll.u32 %v5632_v35, 16  ;;  %v8400_v16 = vld [vmem:[%s7117_s5 + $0xbc] sm:$0x1] }
 0x162   : > { %v4452_v48 = vrot.slane %v7952_v31, 5  ;;  %v4455_v3 = vrot.slane %v8008_v1, 5  ;;  %v5694_v18 = vrot.slane %v5678_v17, 9  ;;  %v9075_v5 = vcombine.low %v8097_v46, %v9074_v44  ;;  %v9077_v31 = vld [vmem:[#allocation23_spill] sm:$0xff]  ;;  %v9078_v1 = vld [vmem:[#allocation24_spill] sm:$0xff] }
 0x163   : > { %v3967_v9 = vsel %vm7153_vm4, %v3962_v52, %v3966_v14  ;;  %v3985_v0 = vor.u32 %v3984_v41, %v8345_v63  ;;  %v4002_v25 = vshll.u32 %v8356_v10, 16  ;;  %v4459_v61 = vrot.slane %v9076_v15, 5  ;;  %v6650_v14 = vld [vmem:[%s7117_s5 + $0xc] sm:$0xff]   ;;  %v5635_v17 = vld [vmem:[%s7117_s5 + $0xc0] sm:$0xf] }
 0x164   : > { %v9079_v21 = vcombine.low %v9077_v31, %v9078_v1  ;;  %v8381_v46 = vsel %vm7367_vm8, %v5693_v58, %v4452_v48  ;;  %v4454_v34 = vrot.slane %v4452_v48, 4  ;;  %v4462_v8 = vrot.slane %v9080_v40, 5  ;;  %v5412_v1 = vld [vmem:[%s7117_s5 + $0x78] sm:$0xf]  ;;  %v5682_v40 = vld [vmem:[%s7117_s5 + $0x84] sm:$0xe] }
 0x165   : > { %6056 = vmatmul.mubr.msk.bf16.gmra.mrb[24].mxu1 %vm746_vm5, %v9075_v5  ;;  %v5695_v59 = vrot.slane %v5679_v12, 9  ;;  %v8385_v57 = vrot.slane %v3988_v36, 5  ;;  %v8389_v20 = vsel %vm7367_vm8, %v5694_v18, %v4459_v61  ;;  %v4461_v38 = vrot.slane %v4459_v61, 4  ;;  %v9084_v12 = vld [vmem:[#allocation29_spill] sm:$0xff]  ;;  %v8434_v61 = vld [vmem:[%s7117_s5 + $0xc4] sm:$0xf] }
 0x166   : > { %6210 = vmatmul.mubr.msk.bf16.gmra.mrb[8].mxu0 %vm746_vm5, %v5646_v4  ;;  %6059 = vmatprep.mubr.msk.bf16.mxu1 %vm746_vm5, %v9079_v21  ;;  %v4466_v11 = vrot.slane %v9081_v49, 5  ;;  %v8392_v50 = vrot.slane %v3975_v51, 4  ;;  %v8396_v2 = vsel %vm7367_vm8, %v4454_v34, %v4455_v3  ;;  %v4469_v4 = vrot.slane %v9082_v54, 5  ;;  %v9083_v51 = vld [vmem:[#allocation25_spill] sm:$0xff] }
 0x167   : > { %6213 = vmatprep.mubr.msk.bf16.mxu0 %vm746_vm5, %v5647_v45  ;;  %v5696_v60 = vrot.slane %v5680_v42, 9  ;;  %v5709_v45 = vcombine.low %v8381_v46, %v8396_v2  ;;  %v8406_v35 = vsel %vm7367_vm8, %v4461_v38, %v4462_v8  ;;  %v8413_v41 = vrot.slane %v3993_v39, 4  ;;  %v5681_v39 = vld [vmem:[%s7117_s5 + $0x78] sm:$0xe] }
 0x168   : > { %v8410_v55 = vsel %vm7367_vm8, %v5695_v59, %v4466_v11  ;;  %v4468_v52 = vrot.slane %v4466_v11, 4  ;;  %v5710_v36 = vcombine.low %v8389_v20, %v8406_v35  ;;  %v4473_v58 = vrot.slane %v9083_v51, 5 }
 0x169   : > { %v4476_v48 = vrot.slane %v9084_v12, 5  ;;  %v8420_v3 = vcombine.low %v3957_v62, %v3967_v9  ;;  %v8422_v18 = vrot.slane %v3996_v56, 5  ;;  %v8424_v44 = vrot.slane %v4002_v25, 5 }
 0x16a   : > { %v8428_v5 = vsel %vm7367_vm8, %v4468_v52, %v4469_v4  ;;  %v8431_v15 = vrot.slane %v3985_v0, 4  ;;  %v8440_v62 = vsel %vm7367_vm8, %v5696_v60, %v4473_v58  ;;  %v4475_v56 = vrot.slane %v4473_v58, 4  ;;  %v6651_v4 = vld [vmem:[%s7117_s5 + $0x18] sm:$0xff]   ;;  %v5638_v58 = vld [vmem:[%s7117_s5 + $0xcc] sm:$0xf] }
 0x16b   : > { %v5711_v42 = vcombine.low %v8410_v55, %v8428_v5  ;;  %v3981_v9 = vsel %vm7153_vm4, %v8392_v50, %v8345_v63  ;;  %v4006_v0 = vshrl.u32 %v8356_v10, 16  ;;  %v4012_v25 = vshll.u32 %v8400_v16, 16  ;;  %v6713_v5 = vld [vmem:[%s7117_s5 + $0x98] sm:$0x1] }
 0x16c   : > { %v4017_v31 = vshrl.u32 %v5635_v17, 16  ;;  %v8458_v32 = vsel %vm7367_vm8, %v4475_v56, %v4476_v48  ;;  %v5697_v53 = vrot.slane %v5681_v39, 9  ;;  %v4483_v34 = vrot.slane %v8215_v27, 5  ;;  %v9087_v56 = vld [vmem:[#allocation27_spill] sm:$0xff] }
 0x16d   : > { %6060 = vmatmul.mubr.msk.bf16.gmra.mrb[28].mxu1 %vm746_vm5, %v5304_v7  ;;  %v9085_v7 = vld [vmem:[#allocation26_spill] sm:$0xff]  ;;  %v4020_v8 = vshll.u32 %v5635_v17, 16  ;;  %v4030_v59 = vshrl.u32 %v8434_v61, 16  ;;  %v2339_v27 = vshrl.u32 %v5412_v1, 16  ;;  %v2342_v54 = vshll.u32 %v5412_v1, 16 }
 0x16e   : > { %6214 = vmatmul.mubr.msk.bf16.gmra.mrb[12].mxu0 %vm746_vm5, %v8341_v13  ;;  %6065 = vmatprep.mubr.msk.bf16.mxu1 %vm746_vm5, %v6650_v14  ;;  %v4480_v21 = vrot.slane %v9085_v7, 5  ;;  %v4026_v13 = vshll.u32 %v8434_v61, 16  ;;  %v4008_v60 = vrot.slane %v4006_v0, 4  ;;  %v4019_v52 = vrot.slane %v4017_v31, 4  ;;  %v9086_v14 = vld [vmem:[#allocation13_spill] sm:$0xff]  ;;  %v6652_v0 = vld [vmem:[%s7117_s5 + $0x24] sm:$0xff]  }
 0x16f   : > { %6217 = vmatprep.mubr.msk.bf16.mxu0 %vm746_vm5, %v8348_v22  ;;  %v8475_v22 = vld [vmem:[%s7117_s5 + $0xc8] sm:$0x1]  ;;  %v2361_v17 = vsel %vm7153_vm4, %v8296_v24, %v9086_v14  ;;  %v5698_v51 = vrot.slane %v5682_v40, 9  ;;  %v2341_v48 = vrot.slane %v2339_v27, 4  ;;  %v2344_v39 = vrot.slane %v2342_v54, 5 }
 0x170   : > { %v8471_v49 = vsel %vm7367_vm8, %v5697_v53, %v4480_v21  ;;  %v4482_v11 = vrot.slane %v4480_v21, 4  ;;  %v4487_v1 = vrot.slane %v9087_v56, 5  ;;  %v4022_v53 = vrot.slane %v4020_v8, 5  ;;  %v5683_v24 = vld [vmem:[%s7117_s5 + $0x90] sm:$0xe] }
 0x171   : > { %v8488_v7 = vrot.slane %v4026_v13, 5  ;;  %v4490_v21 = vrot.slane %v8225_v33, 5  ;;  %v4032_v40 = vrot.slane %v4030_v59, 4  ;;  %v8495_v14 = vld [vmem:[%s7117_s5 + $0xd0] sm:$0xf]  ;;  %v2345_v38 = vor.u32 %v2344_v39, %v2341_v48 }
 0x172   : > { %v8484_v12 = vsel %vm7367_vm8, %v4482_v11, %v4483_v34  ;;  %v8499_v34 = vsel %vm7367_vm8, %v5698_v51, %v4487_v1  ;;  %v4489_v11 = vrot.slane %v4487_v1, 4  ;;  %v3991_v8 = vsel %vm7153_vm4, %v8431_v15, %v8385_v57  ;;  %v9088_v27 = vld [vmem:[#allocation12_spill] sm:$0xff] }
 0x173   : > { %v5713_v31 = vcombine.low %v8471_v49, %v8484_v12  ;;  %v3999_v33 = vor.u32 %v8422_v18, %v8413_v41  ;;  %v4009_v13 = vor.u32 %v4008_v60, %v8424_v44  ;;  %v4036_v59 = vshll.u32 %v8475_v22, 16  ;;  %v9089_v39 = vld [vmem:[#allocation28_spill] sm:$0xff] }
 0x174   : > { %v4041_v54 = vshrl.u32 %v5638_v58, 16  ;;  %v8515_v51 = vsel %vm7367_vm8, %v4489_v11, %v4490_v21  ;;  %v5699_v57 = vrot.slane %v5683_v24, 9  ;;  %v4044_v41 = vshll.u32 %v5638_v58, 16  ;;  %v8542_v24 = vld [vmem:[%s7117_s5 + $0xd4] sm:$0x1] }
 0x175   : > { %6066 = vmatmul.mubr.msk.bf16.vlgmr.msra.gmra.mrb[0].mxu1 %vm746_vm5, %v6651_v4  ;;  %v2346_v4 = vrot.slane %v2345_v38, 4  ;;  %v4050_v18 = vshll.u32 %v8495_v14, 16  ;;  %v4054_v15 = vshrl.u32 %v8495_v14, 16  ;;  %v4023_v38 = vor.u32 %v4022_v53, %v4019_v52  ;;  %v6654_v53 = vld [vmem:[%s7117_s5 + $0x3c] sm:$0xff]  }
 0x176   : > { %6268 = vmatpush3.bf16.msra.mxu1 %v9088_v27  ;;  %6218 = vmatmul.mubr.msk.bf16.gmra.mrb[16].mxu0 %vm746_vm5, %v8350_v37  ;;  %v5714_v37 = vcombine.low %v8499_v34, %v8515_v51  ;;  %v4033_v60 = vor.u32 %v4032_v40, %v8488_v7  ;;  %v4494_v56 = vrot.slane %v9089_v39, 5  ;;  %v5653_v58 = vcombine.low %v3981_v9, %v3991_v8 }
 0x177   : > { %6069 = vmatprep.mubr.msk.bf16.mxu1 %vm746_vm5, %v6652_v0  ;;  %6221 = vmatprep.mubr.msk.bf16.mxu0 %vm746_vm5, %v8352_v29  ;;  %v2351_v48 = vsel %vm7153_vm4, %v2346_v4, %v7706_v23  ;;  %v6653_v29 = vld [vmem:[%s7117_s5 + $0x30] sm:$0xff]   ;;  %v4014_v1 = vrot.slane %v4012_v25, 5  ;;  %v4497_v0 = vrot.slane %v8233_v28, 5  ;;  %v4000_v21 = vrot.slane %v3999_v33, 4  ;;  %v5684_v25 = vld [vmem:[%s7117_s5 + $0x9c] sm:$0xe] }
 0x178   : > { %v8537_v52 = vcombine.low %v2351_v48, %v2361_v17  ;;  %v4010_v23 = vrot.slane %v4009_v13, 4  ;;  %v8546_v40 = vsel %vm7367_vm8, %v5699_v57, %v4494_v56  ;;  %v4496_v11 = vrot.slane %v4494_v56, 4  ;;  %v6703_v48 = vld [vmem:[%s7117_s5 + $0x1c] sm:$0xf]  ;;  %v6655_v56 = vld [vmem:[%s7117_s5 + $0x48] sm:$0xff]  }
 0x179   : > { %v4043_v27 = vrot.slane %v4041_v54, 4  ;;  %v4046_v63 = vrot.slane %v4044_v41, 5  ;;  %v8548_v50 = vrot.slane %v4050_v18, 5  ;;  %v4056_v9 = vrot.slane %v4054_v15, 4  ;;  %v5673_v18 = vld [vmem:[%s7117_s5 + $0x18] sm:$0xe] }
 0x17a   : > { %v4024_v17 = vrot.slane %v4023_v38, 4  ;;  %v4034_v8 = vrot.slane %v4033_v60, 4  ;;  %v4038_v28 = vrot.slane %v4036_v59, 5  ;;  %v8553_v33 = vsel %vm7367_vm8, %v4496_v11, %v4497_v0  ;;  %v6656_v0 = vld [vmem:[%s7117_s5 + $0x54] sm:$0xff]  }
 0x17b   : > { %v5715_v13 = vcombine.low %v8546_v40, %v8553_v33  ;;  %v4005_v59 = vsel %vm7153_vm4, %v4000_v21, %v8424_v44  ;;  %v4015_v54 = vsel %vm7153_vm4, %v4010_v23, %v4014_v1  ;;  %v4060_v4 = vshll.u32 %v8542_v24, 16  ;;  %v5685_v1 = vld [vmem:[%s7117_s5 + $0xa8] sm:$0xe] }
 0x17c   : > { %v5700_v57 = vrot.slane %v5684_v25, 9  ;;  %v4047_v41 = vor.u32 %v4046_v63, %v4043_v27  ;;  %v4501_v15 = vrot.slane %v8230_v47, 5  ;;  %v4504_v38 = vrot.slane %v8268_v26, 5  ;;  %v6704_v63 = vld [vmem:[%s7117_s5 + $0x20] sm:$0x1] }
 0x17d   : > { %6070 = vmatmul.mubr.msk.bf16.gmra.mrb[4].mxu1 %vm746_vm5, %v6653_v29  ;;  %v4029_v44 = vsel %vm7153_vm4, %v4024_v17, %v8488_v7  ;;  %v4039_v60 = vsel %vm7153_vm4, %v4034_v8, %v4038_v28  ;;  %v4424_v39 = vrot.slane %v6703_v48, 5  ;;  %v5654_v47 = vcombine.low %v4005_v59, %v4015_v54  ;;  %v5674_v59 = vld [vmem:[%s7117_s5 + $0x24] sm:$0xe]  ;;  %v6705_v54 = vld [vmem:[%s7117_s5 + $0x28] sm:$0xf] }
 0x17e   : > { %6222 = vmatmul.mubr.msk.bf16.gmra.mrb[20].mxu0 %vm746_vm5, %v8420_v3  ;;  %6073 = vmatprep.mubr.msk.bf16.mxu1 %vm746_vm5, %v6654_v53  ;;  %v4057_v3 = vor.u32 %v4056_v9, %v8548_v50  ;;  %v8581_v29 = vsel %vm7367_vm8, %v5700_v57, %v4501_v15  ;;  %v4062_v26 = vrot.slane %v4060_v4, 5  ;;  %v5689_v53 = vrot.slane %v5673_v18, 9 }
 0x17f   : > { %6225 = vmatprep.mubr.msk.bf16.mxu0 %vm746_vm5, %v5653_v58  ;;  %v4503_v58 = vrot.slane %v4501_v15, 4  ;;  %v5655_v7 = vcombine.low %v4029_v44, %v4039_v60  ;;  %v4048_v21 = vrot.slane %v4047_v41, 4  ;;  %v4426_v27 = vrot.slane %v4424_v39, 4  ;;  %v6657_v60 = vld [vmem:[%s7117_s5 + $0x60] sm:$0xff]  }
 0x180   : > { %v4058_v23 = vrot.slane %v4057_v3, 4  ;;  %v4427_v9 = vrot.slane %v6704_v63, 5  ;;  %v5701_v17 = vrot.slane %v5685_v1, 9  ;;  %v4508_v8 = vrot.slane %v8273_v43, 5  ;;  %v5686_v3 = vld [vmem:[%s7117_s5 + $0xb4] sm:$0xe] }
 0x181   : > { %v8587_v11 = vsel %vm7367_vm8, %v4503_v58, %v4504_v38  ;;  %v4511_v28 = vrot.slane %v8317_v19, 5  ;;  %v4431_v4 = vrot.slane %v6705_v54, 5  ;;  %v4053_v57 = vsel %vm7153_vm4, %v4048_v21, %v8548_v50  ;;  %v9090_v38 = vld [vmem:[#allocation14_spill] sm:$0xff]  ;;  %v5675_v50 = vld [vmem:[%s7117_s5 + $0x30] sm:$0xe] }
 0x182   : > { %v5716_v25 = vcombine.low %v8581_v29, %v8587_v11  ;;  %v4063_v43 = vsel %vm7153_vm4, %v4058_v23, %v4062_v26  ;;  %v8607_v19 = vsel %vm7367_vm8, %v5701_v17, %v4508_v8  ;;  %v4510_v41 = vrot.slane %v4508_v8, 4  ;;  %v6658_v1 = vld [vmem:[%s7117_s5 + $0x6c] sm:$0xff]   ;;  %v5676_v54 = vld [vmem:[%s7117_s5 + $0x3c] sm:$0xe] }
 0x183   : > { %v4425_v18 = vsel %vm7367_vm8, %v5689_v53, %v4424_v39  ;;  %v4428_v15 = vsel %vm7367_vm8, %v4426_v27, %v4427_v9  ;;  %v4438_v44 = vrot.slane %v9090_v38, 5  ;;  %v5690_v48 = vrot.slane %v5674_v59, 9  ;;  %v9091_v9 = vld [vmem:[#allocation15_spill] sm:$0xff] }
 0x184   : > { %v5656_v58 = vcombine.low %v4053_v57, %v4063_v43  ;;  %v5702_v26 = vrot.slane %v5686_v3, 9  ;;  %v5705_v53 = vcombine.low %v4425_v18, %v4428_v15  ;;  %v4515_v21 = vrot.slane %v8356_v10, 5  ;;  %v5687_v59 = vld [vmem:[%s7117_s5 + $0xc0] sm:$0xe]  ;;  %v9092_v57 = vld [vmem:[#allocation16_spill] sm:$0xff]  ;;  %v6659_v38 = vld [vmem:[%s7117_s5 + $0x78] sm:$0xff]  }
 0x185   : > { %6074 = vmatmul.mubr.msk.bf16.gmra.mrb[8].mxu1 %vm746_vm5, %v6655_v56  ;;  %v8619_v56 = vsel %vm7367_vm8, %v4510_v41, %v4511_v28  ;;  %v4518_v23 = vrot.slane %v8400_v16, 5  ;;  %v5691_v27 = vrot.slane %v5675_v50, 9  ;;  %v4440_v63 = vrot.slane %v4438_v44, 4 }
 0x186   : > { %6226 = vmatmul.mubr.msk.bf16.gmra.mrb[24].mxu0 %vm746_vm5, %v5654_v47  ;;  %6077 = vmatprep.mubr.msk.bf16.mxu1 %vm746_vm5, %v6656_v0  ;;  %v6706_v47 = vld [vmem:[%s7117_s5 + $0x2c] sm:$0x1]  ;;  %v5717_v39 = vcombine.low %v8607_v19, %v8619_v56  ;;  %v4441_v17 = vrot.slane %v9091_v9, 5  ;;  %v8631_v8 = vsel %vm7367_vm8, %v5702_v26, %v4515_v21  ;;  %v4517_v28 = vrot.slane %v4515_v21, 4 }
 0x187   : > { %6229 = vmatprep.mubr.msk.bf16.mxu0 %vm746_vm5, %v5655_v7  ;;  %v4434_v0 = vrot.slane %v6706_v47, 5  ;;  %v4433_v7 = vrot.slane %v4431_v4, 4  ;;  %v4432_v10 = vsel %vm7367_vm8, %v5690_v48, %v4431_v4  ;;  %v4445_v43 = vrot.slane %v9092_v57, 5 }
 0x188   : > { %v8645_v41 = vsel %vm7367_vm8, %v4517_v28, %v4518_v23  ;;  %v4439_v3 = vsel %vm7367_vm8, %v5691_v27, %v4438_v44  ;;  %v4442_v18 = vsel %vm7367_vm8, %v4440_v63, %v4441_v17  ;;  %v5703_v15 = vrot.slane %v5687_v59, 9  ;;  %v5688_v23 = vld [vmem:[%s7117_s5 + $0xcc] sm:$0xe] }
 0x189   : > { %v4435_v16 = vsel %vm7367_vm8, %v4433_v7, %v4434_v0  ;;  %v5718_v4 = vcombine.low %v8631_v8, %v8645_v41  ;;  %v4522_v48 = vrot.slane %v8434_v61, 5  ;;  %v4525_v50 = vrot.slane %v8475_v22, 5  ;;  %v9093_v0 = vld [vmem:[#allocation17_spill] sm:$0xff] }
 0x18a   : > { %v5692_v47 = vrot.slane %v5676_v54, 9  ;;  %v4448_v44 = vrot.slane %v9093_v0, 5  ;;  %v5707_v26 = vcombine.low %v4439_v3, %v4442_v18  ;;  %v6707_v61 = vld [vmem:[%s7117_s5 + $0x70] sm:$0xf]  ;;  %v5704_v59 = vrot.slane %v5688_v23, 9 }
 0x18b   : > { %v8661_v7 = vsel %vm7367_vm8, %v5703_v15, %v4522_v48  ;;  %v4524_v21 = vrot.slane %v4522_v48, 4  ;;  %v2324_v22 = vshll.u32 %v6707_v61, 16  ;;  %v2328_v9 = vshrl.u32 %v6707_v61, 16  ;;  %v6661_v15 = vld [vmem:[%s7117_s5 + $0x90] sm:$0xff]   ;;  %v6663_v61 = vld [vmem:[%s7117_s5 + $0xa8] sm:$0xff]  }
 0x18c   : > { %v4529_v54 = vrot.slane %v8495_v14, 5  ;;  %v4532_v57 = vrot.slane %v8542_v24, 5  ;;  %v6708_v24 = vld [vmem:[%s7117_s5 + $0x74] sm:$0x1]  ;;  %v2372_v23 = vshll.u32 %v6709_v6, 16 }
 0x18d   : > { %6078 = vmatmul.mubr.msk.bf16.gmra.mrb[12].mxu1 %vm746_vm5, %v6657_v60  ;;  %v5409_v60 = vld [vmem:[%s7117_s5 + $0x6c] sm:$0xf]  ;;  %v8668_v17 = vsel %vm7367_vm8, %v4524_v21, %v4525_v50 }
 0x18e   : > { %6230 = vmatmul.mubr.msk.bf16.gmra.mrb[28].mxu0 %vm746_vm5, %v5656_v58  ;;  %6081 = vmatprep.mubr.msk.bf16.mxu1 %vm746_vm5, %v6658_v1  ;;  %v5706_v58 = vcombine.low %v4432_v10, %v4435_v16  ;;  %v6660_v1 = vld [vmem:[%s7117_s5 + $0x84] sm:$0xff]   ;;  %v2315_v27 = vshrl.u32 %v5409_v60, 16  ;;  %v2318_v63 = vshll.u32 %v5409_v60, 16  ;;  %v5719_v28 = vcombine.low %v8661_v7, %v8668_v17 }
 0x18f   : > { %6235 = vmatprep.mubr.msk.bf16.mxu0 %vm746_vm5, %v5705_v53  ;;  %v4447_v53 = vrot.slane %v4445_v43, 4  ;;  %v4446_v10 = vsel %vm7367_vm8, %v5692_v47, %v4445_v43  ;;  %v2330_v60 = vrot.slane %v2328_v9, 4  ;;  %v8686_v48 = vsel %vm7367_vm8, %v5704_v59, %v4529_v54 }
 0x190   : > { %v2317_v3 = vrot.slane %v2315_v27, 4  ;;  %v2320_v18 = vrot.slane %v2318_v63, 5  ;;  %v4531_v50 = vrot.slane %v4529_v54, 4  ;;  %v2334_v47 = vshll.u32 %v6708_v24, 16  ;;  %v5418_v63 = vld [vmem:[%s7117_s5 + $0x90] sm:$0xf] }
 0x191   : > { %v4449_v16 = vsel %vm7367_vm8, %v4447_v53, %v4448_v44  ;;  %v2376_v27 = vshrl.u32 %v6709_v6, 16  ;;  %v5421_v54 = vld [vmem:[%s7117_s5 + $0x9c] sm:$0xf] }
 0x192   : > { %v5708_v43 = vcombine.low %v4446_v10, %v4449_v16  ;;  %v8692_v14 = vsel %vm7367_vm8, %v4531_v50, %v4532_v57  ;;  %v2321_v44 = vor.u32 %v2320_v18, %v2317_v3  ;;  %v6664_v57 = vld [vmem:[%s7117_s5 + $0xb4] sm:$0xff]   ;;  %v8710_v3 = vrot.slane %v2372_v23, 5 }
 0x193   : > { %v5720_v0 = vcombine.low %v8686_v48, %v8692_v14  ;;  %v2378_v18 = vrot.slane %v2376_v27, 4  ;;  %v6710_v50 = vld [vmem:[%s7117_s5 + $0x94] sm:$0xf] }
 0x194   : > { %v2322_v9 = vrot.slane %v2321_v44, 4  ;;  %v2396_v46 = vshll.u32 %v6710_v50, 16  ;;  %v2400_v2 = vshrl.u32 %v6710_v50, 16 }
 0x195   : > { %6082 = vmatmul.mubr.msk.bf16.gmra.mrb[16].mxu1 %vm746_vm5, %v6659_v38  ;;  %v8682_v38 = vrot.slane %v2324_v22, 5  ;;  %v2336_v22 = vrot.slane %v2334_v47, 5  ;;  %v2379_v6 = vor.u32 %v2378_v18, %v8710_v3 }
 0x196   : > { %6236 = vmatmul.mubr.msk.bf16.vlgmr.msra.gmra.mrb[0].mxu0 %vm746_vm5, %v5706_v58  ;;  %6085 = vmatprep.mubr.msk.bf16.mxu1 %vm746_vm5, %v6660_v1  ;;  %v6662_v58 = vld [vmem:[%s7117_s5 + $0x9c] sm:$0xff]   ;;  %v5415_v1 = vld [vmem:[%s7117_s5 + $0x84] sm:$0xf] }
 0x197   : > { %6239 = vmatprep.mubr.msk.bf16.mxu0 %vm746_vm5, %v5707_v26  ;;  %v2331_v26 = vor.u32 %v2330_v60, %v8682_v38  ;;  %v2363_v53 = vshrl.u32 %v5415_v1, 16  ;;  %v2366_v21 = vshll.u32 %v5415_v1, 16  ;;  %v2390_v60 = vshll.u32 %v5418_v63, 16 }
 0x198   : > { %v2327_v47 = vsel %vm7153_vm4, %v2322_v9, %v8682_v38  ;;  %v8731_v38 = vrot.slane %v2396_v46, 5  ;;  %v5427_v46 = vld [vmem:[%s7117_s5 + $0xb4] sm:$0xf] }
 0x199   : > { %v2332_v59 = vrot.slane %v2331_v26, 4  ;;  %v2365_v10 = vrot.slane %v2363_v53, 4  ;;  %v2368_v16 = vrot.slane %v2366_v21, 5  ;;  %v6712_v26 = vld [vmem:[%s7117_s5 + $0x8c] sm:$0x1]  ;;  %v2392_v27 = vrot.slane %v2390_v60, 5 }
 0x19a   : > { %v2382_v53 = vshll.u32 %v6712_v26, 16  ;;  %v6714_v60 = vld [vmem:[%s7117_s5 + $0xa4] sm:$0x1] }
 0x19b   : > { %v2337_v44 = vsel %vm7153_vm4, %v2332_v59, %v2336_v22  ;;  %v2369_v21 = vor.u32 %v2368_v16, %v2365_v10  ;;  %v6665_v22 = vld [vmem:[%s7117_s5 + $0xc0] sm:$0xff]   ;;  %v2380_v16 = vrot.slane %v2379_v6, 4  ;;  %v2430_v50 = vshll.u32 %v6714_v60, 16 }
 0x19c   : > { %v5441_v9 = vcombine.low %v2327_v47, %v2337_v44  ;;  %v2384_v59 = vrot.slane %v2382_v53, 5 }
 0x19d   : > { %6086 = vmatmul.mubr.msk.bf16.gmra.mrb[20].mxu1 %vm746_vm5, %v6661_v15  ;;  %v2387_v15 = vshrl.u32 %v5418_v63, 16  ;;  %v2402_v63 = vrot.slane %v2400_v2, 4  ;;  %v2370_v10 = vrot.slane %v2369_v21, 4  ;;  %v2459_v21 = vshrl.u32 %v5427_v46, 16 }
 0x19e   : > { %6240 = vmatmul.mubr.msk.bf16.gmra.mrb[4].mxu0 %vm746_vm5, %v5708_v43  ;;  %6089 = vmatprep.mubr.msk.bf16.mxu1 %vm746_vm5, %v6662_v58  ;;  %v2414_v43 = vshll.u32 %v5421_v54, 16  ;;  %v6711_v58 = vld [vmem:[%s7117_s5 + $0xa0] sm:$0xf]  ;;  %v2385_v44 = vsel %vm7153_vm4, %v2380_v16, %v2384_v59 }
 0x19f   : > { %6243 = vmatprep.mubr.msk.bf16.mxu0 %vm746_vm5, %v5709_v45  ;;  %v2411_v45 = vshrl.u32 %v5421_v54, 16  ;;  %v2420_v1 = vshll.u32 %v6711_v58, 16  ;;  %v2424_v24 = vshrl.u32 %v6711_v58, 16  ;;  %v2389_v23 = vrot.slane %v2387_v15, 4  ;;  %v5430_v16 = vld [vmem:[%s7117_s5 + $0xc0] sm:$0xf] }
 0x1a0   : > { %v2416_v35 = vrot.slane %v2414_v43, 5  ;;  %v2406_v54 = vshll.u32 %v6713_v5, 16  ;;  %v6715_v43 = vld [vmem:[%s7117_s5 + $0xac] sm:$0xf]  ;;  %v2375_v47 = vsel %vm7153_vm4, %v2370_v10, %v8710_v3  ;;  %v2432_v3 = vrot.slane %v2430_v50, 5 }
 0x1a1   : > { %v2413_v20 = vrot.slane %v2411_v45, 4  ;;  %v2393_v55 = vor.u32 %v2392_v27, %v2389_v23  ;;  %v2444_v58 = vshll.u32 %v6715_v43, 16  ;;  %v5443_v59 = vcombine.low %v2375_v47, %v2385_v44  ;;  %v6718_v50 = vld [vmem:[%s7117_s5 + $0xc4] sm:$0xf] }
 0x1a2   : > { %v2408_v53 = vrot.slane %v2406_v54, 5  ;;  %v2461_v10 = vrot.slane %v2459_v21, 4 }
 0x1a3   : > { %v2417_v18 = vor.u32 %v2416_v35, %v2413_v20  ;;  %v2394_v26 = vrot.slane %v2393_v55, 4 }
 0x1a5   : > { %6090 = vmatmul.mubr.msk.bf16.gmra.mrb[24].mxu1 %vm746_vm5, %v6663_v61  ;;  %v2426_v61 = vrot.slane %v2424_v24, 4  ;;  %v9094_v24 = vcombine.low %v8440_v62, %v8458_v32  ;;  %v2462_v62 = vshll.u32 %v5427_v46, 16  ;;  %v6716_v32 = vld [vmem:[%s7117_s5 + $0xb8] sm:$0xf]  ;;  %v2399_v55 = vsel %vm7153_vm4, %v2394_v26, %v8731_v38 }
 0x1a6   : > { %6244 = vmatmul.mubr.msk.bf16.gmra.mrb[8].mxu0 %vm746_vm5, %v5710_v36  ;;  %6093 = vmatprep.mubr.msk.bf16.mxu1 %vm746_vm5, %v6664_v57  ;;  %v8733_v36 = vrot.slane %v2420_v1, 5  ;;  %v2403_v57 = vor.u32 %v2402_v63, %v8731_v38  ;;  %v2448_v1 = vshrl.u32 %v6715_v43, 16  ;;  %v2468_v6 = vshll.u32 %v6716_v32, 16  ;;  %v6719_v43 = vld [vmem:[%s7117_s5 + $0xbc] sm:$0x1] }
 0x1a7   : > { %6247 = vmatprep.mubr.msk.bf16.mxu0 %vm746_vm5, %v5711_v42  ;;  %v5424_v42 = vld [vmem:[%s7117_s5 + $0xa8] sm:$0xf]  ;;  %v2472_v23 = vshrl.u32 %v6716_v32, 16  ;;  %v2418_v63 = vrot.slane %v2417_v18, 4  ;;  %v2464_v49 = vrot.slane %v2462_v62, 5  ;;  %v2483_v38 = vshrl.u32 %v5430_v16, 16 }
 0x1a8   : > { %v2427_v15 = vor.u32 %v2426_v61, %v8733_v36  ;;  %v2435_v2 = vshrl.u32 %v5424_v42, 16  ;;  %v2438_v45 = vshll.u32 %v5424_v42, 16  ;;  %v2404_v27 = vrot.slane %v2403_v57, 4 }
 0x1a9   : > { %v2470_v12 = vrot.slane %v2468_v6, 5  ;;  %v2423_v54 = vsel %vm7153_vm4, %v2418_v63, %v8733_v36  ;;  %v2486_v36 = vshll.u32 %v5430_v16, 16  ;;  %v2492_v46 = vshll.u32 %v6718_v50, 16 }
 0x1aa   : > { %v2428_v20 = vrot.slane %v2427_v15, 4  ;;  %v2437_v35 = vrot.slane %v2435_v2, 4  ;;  %v2440_v61 = vrot.slane %v2438_v45, 5  ;;  %v2409_v5 = vsel %vm7153_vm4, %v2404_v27, %v2408_v53  ;;  %v6717_v15 = vld [vmem:[%s7117_s5 + $0xb0] sm:$0x1] }
 0x1ab   : > { %v2454_v60 = vshll.u32 %v6717_v15, 16  ;;  %v2465_v2 = vor.u32 %v2464_v49, %v2461_v10  ;;  %v2485_v47 = vrot.slane %v2483_v38, 4  ;;  %v2488_v44 = vrot.slane %v2486_v36, 5 }
 0x1ac   : > { %v2433_v42 = vsel %vm7153_vm4, %v2428_v20, %v2432_v3  ;;  %v2441_v57 = vor.u32 %v2440_v61, %v2437_v35  ;;  %v2494_v26 = vrot.slane %v2492_v46, 5 }
 0x1ad   : > { %6094 = vmatmul.mubr.msk.bf16.gmra.mrb[28].mxu1 %vm746_vm5, %v6665_v22  ;;  %v2446_v22 = vrot.slane %v2444_v58, 5  ;;  %v2478_v58 = vshll.u32 %v6719_v43, 16  ;;  %v5445_v34 = vcombine.low %v2423_v54, %v2433_v42  ;;  %v2466_v21 = vrot.slane %v2465_v2, 4 }
 0x1ae   : > { %6248 = vmatmul.mubr.msk.bf16.gmra.mrb[12].mxu0 %vm746_vm5, %v9094_v24  ;;  %6115 = vmatprep.mubr.msk.bf16.mxu1 %vm746_vm5, %v5441_v9  ;;  %v2450_v9 = vrot.slane %v2448_v1, 4  ;;  %v5444_v1 = vcombine.low %v2399_v55, %v2409_v5  ;;  %v2442_v51 = vrot.slane %v2441_v57, 4  ;;  %v2456_v24 = vrot.slane %v2454_v60, 5 }
 0x1af   : > { %6251 = vmatprep.mubr.msk.bf16.mxu0 %vm746_vm5, %v5713_v31  ;;  %v2474_v31 = vrot.slane %v2472_v23, 4  ;;  %v2480_v32 = vrot.slane %v2478_v58, 5  ;;  %v6720_v23 = vld [vmem:[%s7117_s5 + $0xc8] sm:$0x1]  ;;  %v2471_v63 = vsel %vm7153_vm4, %v2466_v21, %v2470_v12 }
 0x1b0   : > { %v2451_v18 = vor.u32 %v2450_v9, %v2446_v22  ;;  %v2447_v40 = vsel %vm7153_vm4, %v2442_v51, %v2446_v22  ;;  %v2502_v27 = vshll.u32 %v6720_v23, 16 }
 0x1b1   : > { %v2475_v45 = vor.u32 %v2474_v31, %v2470_v12  ;;  %v8834_v12 = vld [vmem:[#allocation7] ss:$0 sm:$0xff] }
 0x1b2   : > { %v2504_v35 = vrot.slane %v2502_v27, 5 }
 0x1b3   : > { %v2476_v62 = vrot.slane %v2475_v45, 4 }
 0x1b5   : > { %6116 = vmatmul.mubr.msk.bf16.vlgmr.msra.gmra.mrb[16].mxu1 %vm746_vm5, %v8537_v52  ;;  %v2496_v52 = vshrl.u32 %v6718_v50, 16  ;;  %v2481_v29 = vsel %vm7153_vm4, %v2476_v62, %v2480_v32 }
 0x1b6   : > { %6252 = vmatmul.mubr.msk.bf16.gmra.mrb[16].mxu0 %vm746_vm5, %v5714_v37  ;;  %6119 = vmatprep.mubr.msk.bf16.mxu1 %vm746_vm5, %v5443_v59  ;;  %v2452_v37 = vrot.slane %v2451_v18, 4 }
 0x1b7   : > { %6255 = vmatprep.mubr.msk.bf16.mxu0 %vm746_vm5, %v5715_v13  ;;  %v2498_v53 = vrot.slane %v2496_v52, 4  ;;  %v2489_v13 = vor.u32 %v2488_v44, %v2485_v47 }
 0x1b8   : > { %v2457_v33 = vsel %vm7153_vm4, %v2452_v37, %v2456_v24 }
 0x1b9   : > { %v2499_v6 = vor.u32 %v2498_v53, %v2494_v26  ;;  %v5446_v11 = vcombine.low %v2447_v40, %v2457_v33  ;;  %v2490_v20 = vrot.slane %v2489_v13, 4 }
 0x1bb   : > { %v2500_v3 = vrot.slane %v2499_v6, 4  ;;  %v2495_v19 = vsel %vm7153_vm4, %v2490_v20, %v2494_v26 }
 0x1bd   : > { %6120 = vmatmul.mubr.msk.bf16.gmra.mrb[20].mxu1 %vm746_vm5, %v5444_v1  ;;  %v2505_v56 = vsel %vm7153_vm4, %v2500_v3, %v2504_v35 }
 0x1be   : > { %6256 = vmatmul.mubr.msk.bf16.gmra.mrb[20].mxu0 %vm746_vm5, %v5716_v25  ;;  %6123 = vmatprep.mubr.msk.bf16.mxu1 %vm746_vm5, %v5445_v34  ;;  %v5447_v25 = vcombine.low %v2471_v63, %v2481_v29 }
 0x1bf   : > { %6259 = vmatprep.mubr.msk.bf16.mxu0 %vm746_vm5, %v5717_v39  ;;  %v5448_v39 = vcombine.low %v2495_v19, %v2505_v56 }
 0x1c5   : > { %6124 = vmatmul.mubr.msk.bf16.gmra.mrb[24].mxu1 %vm746_vm5, %v5446_v11 }
 0x1c6   : > { %6260 = vmatmul.mubr.msk.bf16.gmra.mrb[24].mxu0 %vm746_vm5, %v5718_v4  ;;  %6127 = vmatprep.mubr.msk.bf16.mxu1 %vm746_vm5, %v5447_v25 }
 0x1c7   : > { %6263 = vmatprep.mubr.msk.bf16.mxu0 %vm746_vm5, %v5719_v28 }
 0x1cd   : > { %6128 = vmatmul.mubr.msk.bf16.gmra.mrb[28].mxu1 %vm746_vm5, %v5448_v39 }
 0x1ce   : > { %6264 = vmatmul.mubr.msk.bf16.gmra.mrb[28].mxu0 %vm746_vm5, %v5720_v0 }
 0x248   : > { %v6067_v8 = vpop.f32.mrb[0].mxu1 }
 0x249   : > { %v1915_v41 = vpop.f32.mrb[1].mxu1 }
 0x24a   : > { %v6068_v4 = vpop.f32.mrb[2].mxu1 }
 0x24b   : > { %v1918_v61 = vpop.f32.mrb[3].mxu1 }
 0x250   : > { %v6071_v22 = vpop.f32.mrb[4].mxu1 }
 0x251   : > { %v1931_v30 = vpop.f32.mrb[5].mxu1 }
 0x252   : > { %v6072_v9 = vpop.f32.mrb[6].mxu1 }
 0x253   : > { %v1934_v59 = vpop.f32.mrb[7].mxu1 }
 0x258   : > { %v6075_v7 = vpop.f32.mrb[8].mxu1 }
 0x259   : > { %v1947_v17 = vpop.f32.mrb[9].mxu1 }
 0x25a   : > { %v8822_v28 = vpop.f32.mrb[10].mxu1 }
 0x25b   : > { %v8824_v10 = vpop.f32.mrb[11].mxu1 }
 0x260   : > { %v8826_v49 = vpop.f32.mrb[12].mxu1 }
 0x261   : > { %v8828_v48 = vpop.f32.mrb[13].mxu1 }
 0x262   : > { %v8830_v14 = vpop.f32.mrb[14].mxu1 }
 0x263   : > { %v8832_v0 = vpop.f32.mrb[15].mxu1 }
 0x269   : > { %v6237_v31 = vpop.f32.mrb[0].mxu0 }
 0x26a   : > { %v6269_v16 = vadd.f32 %v6237_v31, %v6067_v8  ;;  %v4669_v55 = vpop.f32.mrb[1].mxu0 }
 0x26b   : > { %v6270_v5 = vadd.f32 %v4669_v55, %v1915_v41  ;;  %v6238_v54 = vpop.f32.mrb[2].mxu0 }
 0x26c   : > { %v4836_v42 = vadd.f32 %v6269_v16, %v8834_v12  ;;  %v6271_v57 = vadd.f32 %v6238_v54, %v6068_v4  ;;  %v4672_v18 = vpop.f32.mrb[3].mxu0 }
 0x26d   : > { %v4834_v15 = vadd.f32 %v6270_v5, %v8834_v12  ;;  %v6272_v60 = vadd.f32 %v4672_v18, %v1918_v61 }
 0x26e   : > { %v4868_v38 = vmax.f32 %v4836_v42, 0.0  ;;  %v4837_v36 = vadd.f32 %v6271_v57, %v8834_v12 }
 0x26f   : > { %v4866_v50 = vmax.f32 %v4834_v15, 0.0  ;;  %v4835_v46 = vadd.f32 %v6272_v60, %v8834_v12 }
 0x270   : > { %v5777_v52 = vpack.c.bf16 %v4868_v38, %v4868_v38  ;;  %v4869_v2 = vmax.f32 %v4837_v36, 0.0 }
 0x271   : > { %v5775_v45 = vpack.c.bf16 %v4866_v50, %v4866_v50  ;;  %v4867_v43 = vmax.f32 %v4835_v46, 0.0  ;;  %v6241_v58 = vpop.f32.mrb[4].mxu0 }
 0x272   : > { %5029 = vst.msk [vmem:[%s8841_s22 + $0x8] sm:$0xf] %vm5026_vm9, %v5777_v52  ;;  %v5778_v1 = vpack.c.bf16 %v4869_v2, %v4869_v2  ;;  %v6273_v34 = vadd.f32 %v6241_v58, %v6071_v22  ;;  %v4685_v51 = vpop.f32.mrb[5].mxu0 }
 0x273   : > { %5027 = vst.msk [vmem:[%s8841_s22] sm:$0xf] %vm5026_vm9, %v5775_v45  ;;  %v5776_v37 = vpack.c.bf16 %v4867_v43, %v4867_v43  ;;  %v6274_v24 = vadd.f32 %v4685_v51, %v1931_v30  ;;  %v6242_v47 = vpop.f32.mrb[6].mxu0 }
 0x274   : > { %5030 = vst.msk [vmem:[%s8841_s22 + $0xc] sm:$0xf] %vm5026_vm9, %v5778_v1  ;;  %v4840_v44 = vadd.f32 %v6273_v34, %v8834_v12  ;;  %v6275_v26 = vadd.f32 %v6242_v47, %v6072_v9  ;;  %v4688_v53 = vpop.f32.mrb[7].mxu0 }
 0x275   : > { %5028 = vst.msk [vmem:[%s8841_s22 + $0x4] sm:$0xf] %vm5026_vm9, %v5776_v37  ;;  %v4838_v21 = vadd.f32 %v6274_v24, %v8834_v12  ;;  %v6276_v62 = vadd.f32 %v4688_v53, %v1934_v59 }
 0x276   : > { %v4872_v32 = vmax.f32 %v4840_v44, 0.0  ;;  %v4841_v40 = vadd.f32 %v6275_v26, %v8834_v12 }
 0x277   : > { %v4870_v33 = vmax.f32 %v4838_v21, 0.0  ;;  %v4839_v13 = vadd.f32 %v6276_v62, %v8834_v12 }
 0x278   : > { %v5781_v6 = vpack.c.bf16 %v4872_v32, %v4872_v32  ;;  %v4873_v23 = vmax.f32 %v4841_v40, 0.0 }
 0x279   : > { %v5779_v27 = vpack.c.bf16 %v4870_v33, %v4870_v33  ;;  %v4871_v63 = vmax.f32 %v4839_v13, 0.0  ;;  %v6245_v29 = vpop.f32.mrb[8].mxu0 }
 0x27a   : > { %5033 = vst.msk [vmem:[%s8841_s22 + $0x18] sm:$0xf] %vm5026_vm9, %v5781_v6  ;;  %v5782_v11 = vpack.c.bf16 %v4873_v23, %v4873_v23  ;;  %v6277_v25 = vadd.f32 %v6245_v29, %v6075_v7  ;;  %v4701_v20 = vpop.f32.mrb[9].mxu0 }
 0x27b   : > { %5031 = vst.msk [vmem:[%s8841_s22 + $0x10] sm:$0xf] %vm5026_vm9, %v5779_v27  ;;  %v5780_v3 = vpack.c.bf16 %v4871_v63, %v4871_v63  ;;  %v6278_v35 = vadd.f32 %v4701_v20, %v1947_v17  ;;  %v6246_v19 = vpop.f32.mrb[10].mxu0 }
 0x27c   : > { %5034 = vst.msk [vmem:[%s8841_s22 + $0x1c] sm:$0xf] %vm5026_vm9, %v5782_v11  ;;  %v4844_v56 = vadd.f32 %v6277_v25, %v8834_v12  ;;  %v6279_v39 = vadd.f32 %v6246_v19, %v8822_v28  ;;  %v4704_v8 = vpop.f32.mrb[11].mxu0 }
 0x27d   : > { %5032 = vst.msk [vmem:[%s8841_s22 + $0x14] sm:$0xf] %vm5026_vm9, %v5780_v3  ;;  %v4842_v41 = vadd.f32 %v6278_v35, %v8834_v12  ;;  %v6280_v4 = vadd.f32 %v4704_v8, %v8824_v10 }
 0x27e   : > { %v4876_v61 = vmax.f32 %v4844_v56, 0.0  ;;  %v4845_v22 = vadd.f32 %v6279_v39, %v8834_v12 }
 0x27f   : > { %v4874_v30 = vmax.f32 %v4842_v41, 0.0  ;;  %v4843_v9 = vadd.f32 %v6280_v4, %v8834_v12 }
 0x280   : > { %v5785_v59 = vpack.c.bf16 %v4876_v61, %v4876_v61  ;;  %v4877_v7 = vmax.f32 %v4845_v22, 0.0 }
 0x281   : > { %v5783_v17 = vpack.c.bf16 %v4874_v30, %v4874_v30  ;;  %v4875_v28 = vmax.f32 %v4843_v9, 0.0  ;;  %v6249_v31 = vpop.f32.mrb[12].mxu0 }
 0x282   : > { %5037 = vst.msk [vmem:[%s8841_s22 + $0x28] sm:$0xf] %vm5026_vm9, %v5785_v59  ;;  %v5786_v16 = vpack.c.bf16 %v4877_v7, %v4877_v7  ;;  %v6281_v55 = vadd.f32 %v6249_v31, %v8826_v49  ;;  %v4717_v5 = vpop.f32.mrb[13].mxu0 }
 0x283   : > { %5035 = vst.msk [vmem:[%s8841_s22 + $0x20] sm:$0xf] %vm5026_vm9, %v5783_v17  ;;  %v5784_v10 = vpack.c.bf16 %v4875_v28, %v4875_v28  ;;  %v6282_v54 = vadd.f32 %v4717_v5, %v8828_v48  ;;  %v6250_v42 = vpop.f32.mrb[14].mxu0 }
 0x284   : > { %5038 = vst.msk [vmem:[%s8841_s22 + $0x2c] sm:$0xf] %vm5026_vm9, %v5786_v16  ;;  %v4848_v57 = vadd.f32 %v6281_v55, %v8834_v12  ;;  %v6283_v18 = vadd.f32 %v6250_v42, %v8830_v14  ;;  %v4720_v15 = vpop.f32.mrb[15].mxu0 }
 0x285   : > { %5036 = vst.msk [vmem:[%s8841_s22 + $0x24] sm:$0xf] %vm5026_vm9, %v5784_v10  ;;  %v4846_v60 = vadd.f32 %v6282_v54, %v8834_v12  ;;  %v6284_v49 = vadd.f32 %v4720_v15, %v8832_v0 }
 0x286   : > { %v4880_v38 = vmax.f32 %v4848_v57, 0.0  ;;  %v4849_v36 = vadd.f32 %v6283_v18, %v8834_v12 }
 0x287   : > { %v4878_v48 = vmax.f32 %v4846_v60, 0.0  ;;  %v4847_v50 = vadd.f32 %v6284_v49, %v8834_v12 }
 0x288   : > { %v5789_v46 = vpack.c.bf16 %v4880_v38, %v4880_v38  ;;  %v4881_v52 = vmax.f32 %v4849_v36, 0.0  ;;  %v6117_v2 = vpop.f32.mrb[16].mxu1 }
 0x289   : > { %v5787_v14 = vpack.c.bf16 %v4878_v48, %v4878_v48  ;;  %v4879_v45 = vmax.f32 %v4847_v50, 0.0  ;;  %v6253_v43 = vpop.f32.mrb[16].mxu0  ;;  %v2705_v58 = vpop.f32.mrb[17].mxu1 }
 0x28a   : > { %5041 = vst.msk [vmem:[%s8841_s22 + $0x38] sm:$0xf] %vm5026_vm9, %v5789_v46  ;;  %v5790_v1 = vpack.c.bf16 %v4881_v52, %v4881_v52  ;;  %v6285_v0 = vadd.f32 %v6253_v43, %v6117_v2  ;;  %v4733_v34 = vpop.f32.mrb[17].mxu0  ;;  %v6118_v51 = vpop.f32.mrb[18].mxu1 }
 0x28b   : > { %5039 = vst.msk [vmem:[%s8841_s22 + $0x30] sm:$0xf] %vm5026_vm9, %v5787_v14  ;;  %v5788_v37 = vpack.c.bf16 %v4879_v45, %v4879_v45  ;;  %v6286_v24 = vadd.f32 %v4733_v34, %v2705_v58  ;;  %v6254_v47 = vpop.f32.mrb[18].mxu0  ;;  %v2708_v44 = vpop.f32.mrb[19].mxu1 }
 0x28c   : > { %5042 = vst.msk [vmem:[%s8841_s22 + $0x3c] sm:$0xf] %vm5026_vm9, %v5790_v1  ;;  %v4852_v26 = vadd.f32 %v6285_v0, %v8834_v12  ;;  %v6287_v53 = vadd.f32 %v6254_v47, %v6118_v51  ;;  %v4736_v21 = vpop.f32.mrb[19].mxu0 }
 0x28d   : > { %5040 = vst.msk [vmem:[%s8841_s22 + $0x34] sm:$0xf] %vm5026_vm9, %v5788_v37  ;;  %v4850_v62 = vadd.f32 %v6286_v24, %v8834_v12  ;;  %v6288_v32 = vadd.f32 %v4736_v21, %v2708_v44 }
 0x28e   : > { %v4884_v40 = vmax.f32 %v4852_v26, 0.0  ;;  %v4853_v33 = vadd.f32 %v6287_v53, %v8834_v12 }
 0x28f   : > { %v4882_v13 = vmax.f32 %v4850_v62, 0.0  ;;  %v4851_v6 = vadd.f32 %v6288_v32, %v8834_v12 }
 0x290   : > { %v5793_v23 = vpack.c.bf16 %v4884_v40, %v4884_v40  ;;  %v4885_v27 = vmax.f32 %v4853_v33, 0.0  ;;  %v6121_v63 = vpop.f32.mrb[20].mxu1 }
 0x291   : > { %v5791_v29 = vpack.c.bf16 %v4882_v13, %v4882_v13  ;;  %v4883_v11 = vmax.f32 %v4851_v6, 0.0  ;;  %v6257_v25 = vpop.f32.mrb[20].mxu0  ;;  %v2721_v20 = vpop.f32.mrb[21].mxu1 }
 0x292   : > { %5045 = vst.msk [vmem:[%s8841_s22 + $0x48] sm:$0xf] %vm5026_vm9, %v5793_v23  ;;  %v5794_v3 = vpack.c.bf16 %v4885_v27, %v4885_v27  ;;  %v6289_v35 = vadd.f32 %v6257_v25, %v6121_v63  ;;  %v4749_v19 = vpop.f32.mrb[21].mxu0  ;;  %v6122_v56 = vpop.f32.mrb[22].mxu1 }
 0x293   : > { %5043 = vst.msk [vmem:[%s8841_s22 + $0x40] sm:$0xf] %vm5026_vm9, %v5791_v29  ;;  %v5792_v39 = vpack.c.bf16 %v4883_v11, %v4883_v11  ;;  %v6290_v8 = vadd.f32 %v4749_v19, %v2721_v20  ;;  %v6258_v41 = vpop.f32.mrb[22].mxu0  ;;  %v2724_v4 = vpop.f32.mrb[23].mxu1 }
 0x294   : > { %5046 = vst.msk [vmem:[%s8841_s22 + $0x4c] sm:$0xf] %vm5026_vm9, %v5794_v3  ;;  %v4856_v61 = vadd.f32 %v6289_v35, %v8834_v12  ;;  %v6291_v22 = vadd.f32 %v6258_v41, %v6122_v56  ;;  %v4752_v30 = vpop.f32.mrb[23].mxu0 }
 0x295   : > { %5044 = vst.msk [vmem:[%s8841_s22 + $0x44] sm:$0xf] %vm5026_vm9, %v5792_v39  ;;  %v4854_v9 = vadd.f32 %v6290_v8, %v8834_v12  ;;  %v6292_v59 = vadd.f32 %v4752_v30, %v2724_v4 }
 0x296   : > { %v4888_v7 = vmax.f32 %v4856_v61, 0.0  ;;  %v4857_v17 = vadd.f32 %v6291_v22, %v8834_v12 }
 0x297   : > { %v4886_v28 = vmax.f32 %v4854_v9, 0.0  ;;  %v4855_v31 = vadd.f32 %v6292_v59, %v8834_v12 }
 0x298   : > { %v5797_v16 = vpack.c.bf16 %v4888_v7, %v4888_v7  ;;  %v4889_v55 = vmax.f32 %v4857_v17, 0.0  ;;  %v6125_v5 = vpop.f32.mrb[24].mxu1 }
 0x299   : > { %v5795_v10 = vpack.c.bf16 %v4886_v28, %v4886_v28  ;;  %v4887_v54 = vmax.f32 %v4855_v31, 0.0  ;;  %v6261_v42 = vpop.f32.mrb[24].mxu0  ;;  %v2737_v57 = vpop.f32.mrb[25].mxu1 }
 0x29a   : > { %5049 = vst.msk [vmem:[%s8841_s22 + $0x58] sm:$0xf] %vm5026_vm9, %v5797_v16  ;;  %v5798_v18 = vpack.c.bf16 %v4889_v55, %v4889_v55  ;;  %v6293_v15 = vadd.f32 %v6261_v42, %v6125_v5  ;;  %v4765_v60 = vpop.f32.mrb[25].mxu0  ;;  %v6126_v49 = vpop.f32.mrb[26].mxu1 }
 0x29b   : > { %5047 = vst.msk [vmem:[%s8841_s22 + $0x50] sm:$0xf] %vm5026_vm9, %v5795_v10  ;;  %v5796_v38 = vpack.c.bf16 %v4887_v54, %v4887_v54  ;;  %v6294_v36 = vadd.f32 %v4765_v60, %v2737_v57  ;;  %v6262_v48 = vpop.f32.mrb[26].mxu0  ;;  %v2740_v50 = vpop.f32.mrb[27].mxu1 }
 0x29c   : > { %5050 = vst.msk [vmem:[%s8841_s22 + $0x5c] sm:$0xf] %vm5026_vm9, %v5798_v18  ;;  %v4860_v46 = vadd.f32 %v6293_v15, %v8834_v12  ;;  %v6295_v52 = vadd.f32 %v6262_v48, %v6126_v49  ;;  %v4768_v2 = vpop.f32.mrb[27].mxu0 }
 0x29d   : > { %5048 = vst.msk [vmem:[%s8841_s22 + $0x54] sm:$0xf] %vm5026_vm9, %v5796_v38  ;;  %v4858_v14 = vadd.f32 %v6294_v36, %v8834_v12  ;;  %v6296_v45 = vadd.f32 %v4768_v2, %v2740_v50 }
 0x29e   : > { %v4892_v43 = vmax.f32 %v4860_v46, 0.0  ;;  %v4861_v58 = vadd.f32 %v6295_v52, %v8834_v12 }
 0x29f   : > { %v4890_v1 = vmax.f32 %v4858_v14, 0.0  ;;  %v4859_v0 = vadd.f32 %v6296_v45, %v8834_v12 }
 0x2a0   : > { %v5801_v34 = vpack.c.bf16 %v4892_v43, %v4892_v43  ;;  %v4893_v51 = vmax.f32 %v4861_v58, 0.0  ;;  %v6129_v37 = vpop.f32.mrb[28].mxu1 }
 0x2a1   : > { %v5799_v24 = vpack.c.bf16 %v4890_v1, %v4890_v1  ;;  %v4891_v47 = vmax.f32 %v4859_v0, 0.0  ;;  %v6265_v44 = vpop.f32.mrb[28].mxu0  ;;  %v2753_v26 = vpop.f32.mrb[29].mxu1 }
 0x2a2   : > { %5053 = vst.msk [vmem:[%s8841_s22 + $0x68] sm:$0xf] %vm5026_vm9, %v5801_v34  ;;  %v5802_v53 = vpack.c.bf16 %v4893_v51, %v4893_v51  ;;  %v6297_v21 = vadd.f32 %v6265_v44, %v6129_v37  ;;  %v4781_v62 = vpop.f32.mrb[29].mxu0  ;;  %v6130_v32 = vpop.f32.mrb[30].mxu1 }
 0x2a3   : > { %5051 = vst.msk [vmem:[%s8841_s22 + $0x60] sm:$0xf] %vm5026_vm9, %v5799_v24  ;;  %v5800_v40 = vpack.c.bf16 %v4891_v47, %v4891_v47  ;;  %v6298_v33 = vadd.f32 %v4781_v62, %v2753_v26  ;;  %v6266_v13 = vpop.f32.mrb[30].mxu0  ;;  %v2756_v6 = vpop.f32.mrb[31].mxu1 }
 0x2a4   : > { %5054 = vst.msk [vmem:[%s8841_s22 + $0x6c] sm:$0xf] %vm5026_vm9, %v5802_v53  ;;  %v4864_v23 = vadd.f32 %v6297_v21, %v8834_v12  ;;  %v6299_v27 = vadd.f32 %v6266_v13, %v6130_v32  ;;  %v4784_v63 = vpop.f32.mrb[31].mxu0 }
 0x2a5   : > { %5052 = vst.msk [vmem:[%s8841_s22 + $0x64] sm:$0xf] %vm5026_vm9, %v5800_v40  ;;  %v4862_v29 = vadd.f32 %v6298_v33, %v8834_v12  ;;  %v6300_v11 = vadd.f32 %v4784_v63, %v2756_v6 }
 0x2a6   : > { %v4896_v25 = vmax.f32 %v4864_v23, 0.0  ;;  %v4865_v20 = vadd.f32 %v6299_v27, %v8834_v12 }
 0x2a7   : > { %v4894_v3 = vmax.f32 %v4862_v29, 0.0  ;;  %v4863_v35 = vadd.f32 %v6300_v11, %v8834_v12 }
 0x2a8   : > { %v5805_v19 = vpack.c.bf16 %v4896_v25, %v4896_v25  ;;  %v4897_v56 = vmax.f32 %v4865_v20, 0.0 }
 0x2a9   : > { %v5803_v39 = vpack.c.bf16 %v4894_v3, %v4894_v3  ;;  %v4895_v8 = vmax.f32 %v4863_v35, 0.0 }
 0x2aa   : > { %5057 = vst.msk [vmem:[%s8841_s22 + $0x78] sm:$0xf] %vm5026_vm9, %v5805_v19  ;;  %v5806_v41 = vpack.c.bf16 %v4897_v56, %v4897_v56 }
 0x2ab   : > { %5055 = vst.msk [vmem:[%s8841_s22 + $0x70] sm:$0xf] %vm5026_vm9, %v5803_v39  ;;  %v5804_v12 = vpack.c.bf16 %v4895_v8, %v4895_v8 }
 0x2ac   : > { %5058 = vst.msk [vmem:[%s8841_s22 + $0x7c] sm:$0xf] %vm5026_vm9, %v5806_v41 }
 0x2ad   : > { %5056 = vst.msk [vmem:[%s8841_s22 + $0x74] sm:$0xf] %vm5026_vm9, %v5804_v12 }
 0x2ae   : > { %6820 = shalt.err (!%p6817_p2)
}
 0x2af   : > { %s6821_s10 = scalar_lea.hbm %s8940_s9, 2048  ;;  %s6825_s29 = scalar_lea.hbm %s9000_s3, 4096 }
 0x2b0   : > { %p6822_p0 = scmp.ne.s32.totalorder %s8940_s9, %s6821_s10  ;;  %p6826_p6 = scmp.lt.u32.totalorder %s8940_s9, %s9000_s3 }
 0x2b1   : > { %p6827_p7 = scmp.lt.u32.totalorder %s6825_s29, %s6821_s10  ;;  %p6829_p8 = scmp.lt.u32.totalorder %s6821_s10, %s8940_s9 }
 0x2b2   : > { %p6823_p4 = pnand %p6822_p0, %p9095_p12 }
 0x2b3   : > { %p6828_p11 = por %p6827_p7, %p6826_p6 }
 0x2b4   : > { %p6824_p13 = pneg %p6823_p4 }
 0x2b5   : > { %p6830_p1 = por %p6829_p8, %p6828_p11 }
 0x2b7   : > { %p6831_p10 = pnand %p6830_p1, %p6824_p13 }
 0x2b9   : > { %6834 = shalt.err (!%p6831_p10)
}
 0x2ba   : > { %s6904_s22 = smov 64   ;;  %s6905_s24 = smov 4  }
 0x2bb   : > { %6538 = dma.vmem_to_hbm [thread:$0]  (%p9095_p12), %s8942_s30, 2048, %s8940_s9, %s5060_s15, %s6904_s22, %s6904_s22, %s6905_s24  }
 0x2bc PF: > { %s5092_s7 = sand.u32 1, %s6873_s12   ;;  %p9096_p3 = scmp.ne.s32.totalorder %s9025_s23, 0 }
 0x2bd   : > { %p9097_p5 = scmp.ge.s32.totalorder %s6893_s17, 2  ;;  %s5093_s26 = scalar_lea.sflag [#allocation4], %s5092_s7 }
 0x2bf   : > { %p6552_p9 = pnand %p9097_p5, %p9096_p3 }
 0x2c1   : > { %6868 = dma.done.wait (!%p6552_p9), %s5093_s26, 2048  }
 0x2c2   : > { %6870 = vsyncadd (!%p6552_p9), %s5093_s26, 4294965248  ;;  %s20_s17 = sadd.s32 1, %s6893_s17   ;;  %s9098_s12 = smov %s6877_s13 }
 0x2c3   : > { %p17_p2 = scmp.ge.s32.totalorder %s20_s17, 4   ;;  %s9099_s13 = smov %s6881_s14 }
 0x2c4   : > { %s9100_s14 = smov %s7072_s4  ;;  %s9101_s15 = smov %s6889_s16 }
 0x2c5   : > { %s9102_s16 = smov %s9104_s18  ;;  %19 = sbr.rel (!%p17_p2) target bundleno = 7 (0x7), region = 98 }
 0x2cc   :  { %5098 = vsyncpa [#allocation3], 1 }
 0x2cd   :  { %5100 = vsyncpa [#allocation3 + $0x1], 1 }
 0x2ce   :  { %5101 = vsyncpa [#allocation6], 1 }
 0x2cf   :  { %5102 = vsyncpa [#allocation4], 1 }
 0x2d0   :  { %5104 = vsyncpa [#allocation4 + $0x1], 1 }

</bundles_post_ra>
